<compile_context>
chip_gen: v7x
topology: tpu7x:2x2x1
jax: 0.10.0
libtpu: 0.0.40
codegen_flags: <defaults>
</compile_context>

<pallas_src>
import functools

import numpy as np
import jax
import jax.numpy as jnp
from jax import lax
from jax.experimental import pallas as pl
from jax.experimental.pallas import tpu as pltpu


def _roi_crop_group_kernel(gbid_ref, coord_ref, feat_ref, out_ref, *,
                           crop_size, H, Wf, C, P):
    """One grid step == one group of P points sharing a single feature map.

    gbid_ref  : SMEM scalar prefetch (G,) int32   image index per group (drives feat DMA)
    coord_ref : VMEM (1, 2, P*crop^2) f32         [sample_y; sample_x] per output column
    feat_ref  : VMEM (1, C, H*W)     bf16         the group's feature map (channels-major)
    out_ref   : VMEM (1, C, P*crop^2) f32         transposed crops (lane-dense store)
    """
    del gbid_ref  # only used inside the feature index_map
    HW = H * Wf
    PCC = P * crop_size * crop_size

    coords = coord_ref[...]                               # (1, 2, PCC) f32
    py = coords[0, 0:1, :]                                # (1, PCC) sample y per column
    px = coords[0, 1:2, :]                                # (1, PCC) sample x per column

    # Separable triangle (bilinear) weights, built on small (H, PCC) / (Wf, PCC)
    # tiles -- no (HW, PCC) int div/mod.  Coordinate math stays in f32 (bf16 has
    # ~1-pixel ULP at coords ~300); only the final factors are cast to bf16 so
    # the big outer-product multiply and the MXU matmul run single-pass bf16.
    # (On v5e-only deployments, cast after the multiply instead.)
    row = lax.broadcasted_iota(jnp.int32, (H, PCC), 0).astype(jnp.float32)
    col = lax.broadcasted_iota(jnp.int32, (Wf, PCC), 0).astype(jnp.float32)

    wy = jnp.maximum(0.0, 1.0 - jnp.abs(row - py))        # (H, PCC)
    wy = jnp.where((py >= 0.0) & (py <= float(H - 1)), wy, 0.0)
    wx = jnp.maximum(0.0, 1.0 - jnp.abs(col - px))        # (Wf, PCC)
    wx = jnp.where((px >= 0.0) & (px <= float(Wf - 1)), wx, 0.0)

    wy = wy.astype(jnp.bfloat16)
    wx = wx.astype(jnp.bfloat16)
    # Combined bilinear weight matrix, transposed: (HW, PCC).
    wct = (wy[:, None, :] * wx[None, :, :]).reshape(HW, PCC)

    feat = feat_ref[0]                                    # (C, HW) bf16
    out_ref[0] = jnp.dot(feat, wct,
                         preferred_element_type=jnp.float32)   # (C, PCC) f32


def fine_preprocess_forward(features, sample_points, img_idxs, config,
                            points_per_step=32):
    """JAX/Pallas equivalent of FinePreprocess.forward (sparse path).

    features      : (B, n_view, C, H, W) float32   (PyTorch 'b n c h w')
    sample_points : (B, n_view, n_track, 2) float32, (x, y) pixel coords
    img_idxs      : (B, n_view, n_track) int32, index into flattened (b n) dim
    Returns (features_crop, sparse) with
    features_crop : (B, n_view, n_track, crop_size**2, C) float32.
    """
    crop = config["crop_size"]
    assert crop >= config["window_size"]
    assert crop > 1
    if config["enable_rescaled_crop"]:
        raise ValueError
    if not config["sparse"]:
        B, n_view = features.shape[:2]
        return features.reshape((B * n_view,) + features.shape[2:]), False

    B, n_view, n_track, two = sample_points.shape
    assert B == 1, "Currently only support batchsize == 1"
    assert two == 2

    n_imgs = B * n_view
    C, H, Wf = features.shape[2], features.shape[3], features.shape[4]
    HW = H * Wf
    cc = crop * crop
    P = max(1, int(points_per_step))
    PCC = P * cc
    n_pts = n_imgs * n_track

    # Native NCHW layout, flattened to (n_imgs, C, H*W) and cast to bf16:
    # halves the per-step feature DMA bytes + VMEM footprint; MXU accumulates f32.
    feat_flat = features.reshape(n_imgs, C, HW).astype(jnp.bfloat16)

    pts = sample_points.reshape(-1, 2).astype(jnp.float32)     # (n_pts, 2)
    bids = img_idxs.reshape(-1).astype(jnp.int32)              # (n_pts,)

    # ---- group points by image, P points per grid step -----------------------
    order = jnp.argsort(bids, stable=True)
    sorted_bids = bids[order]
    counts = jnp.bincount(bids, length=n_imgs).astype(jnp.int32)
    groups_per_img = (counts + P - 1) // P
    zero = jnp.zeros((1,), jnp.int32)
    group_base = jnp.concatenate(
        [zero, jnp.cumsum(groups_per_img)[:-1].astype(jnp.int32)])
    img_start = jnp.concatenate(
        [zero, jnp.cumsum(counts)[:-1].astype(jnp.int32)])
    pos_in_img = jnp.arange(n_pts, dtype=jnp.int32) - img_start[sorted_bids]
    g_of_pt = group_base[sorted_bids] + pos_in_img // P
    s_of_pt = pos_in_img % P
    dest = g_of_pt * P + s_of_pt               # slot in padded (group, slot) layout

    G = n_pts // P + n_imgs                    # static upper bound on #groups
    GP = G * P

    slot_src = jnp.full((GP,), -1, jnp.int32).at[dest].set(order.astype(jnp.int32))
    valid = slot_src >= 0
    safe = jnp.maximum(slot_src, 0)
    # Padding slots get hugely out-of-range coords -> all-zero weights -> zero crop.
    xs = jnp.where(valid, pts[safe, 0], -1e9)
    ys = jnp.where(valid, pts[safe, 1], -1e9)

    # Empty padding groups inherit the LAST image's id so they never force a
    # redundant feature re-DMA (block index stays constant at the tail).
    group_bid = jnp.full((G,), n_imgs - 1, jnp.int32).at[g_of_pt].set(sorted_bids)

    # ---- precompute per-output-column sample coordinates ----------------------
    # transform_fpcoor=False / crop_and_resize grid:
    #   pos_k = (coord - r) + k * (2r) / (crop - 1),  k = 0..crop-1
    r = float(crop // 2)
    step = 2.0 * r / float(crop - 1)
    offs = jnp.arange(crop, dtype=jnp.float32) * step - r                    # (crop,)
    py = jnp.broadcast_to(ys[:, None, None] + offs[None, :, None],
                          (GP, crop, crop)).reshape(G, PCC)
    px = jnp.broadcast_to(xs[:, None, None] + offs[None, None, :],
                          (GP, crop, crop)).reshape(G, PCC)
    coords = jnp.stack([py, px], axis=1)                                     # (G, 2, PCC)

    kernel = functools.partial(_roi_crop_group_kernel,
                               crop_size=crop, H=H, Wf=Wf, C=C, P=P)

    grid_spec = pltpu.PrefetchScalarGridSpec(
        num_scalar_prefetch=1,                 # group_bid -> SMEM, drives feat DMA
        grid=(G,),
        in_specs=[
            pl.BlockSpec((1, 2, PCC), lambda g, gb: (g, 0, 0)),      # [py; px]
            pl.BlockSpec((1, C, HW), lambda g, gb: (gb[g], 0, 0)),   # features
        ],
        out_specs=pl.BlockSpec((1, C, PCC), lambda g, gb: (g, 0, 0)),
    )

    out = pl.pallas_call(
        kernel,
        out_shape=jax.ShapeDtypeStruct((G, C, PCC), jnp.float32),
        grid_spec=grid_spec,
        compiler_params=pltpu.CompilerParams(
            dimension_semantics=("parallel",),
            vmem_limit_bytes=64 * 1024 * 1024),
    )(group_bid, coords, feat_flat)

    # (G, C, P*cc) -> (G*P, cc, C), then gather back to the original point order.
    crops = jnp.transpose(out.reshape(G, C, P, cc), (0, 2, 3, 1)).reshape(GP, cc, C)
    dest_orig = jnp.zeros((n_pts,), jnp.int32).at[order].set(dest.astype(jnp.int32))
    features_crop = crops[dest_orig].reshape(B, n_view, n_track, cc, C)
    return features_crop, True


def _reference_np(feat_nhwc, pts, bids, crop):
    """Pure NumPy crop_and_resize (transform_fpcoor=False) reference."""
    feat = np.asarray(feat_nhwc, np.float32)
    pts = np.asarray(pts, np.float32)
    bids = np.asarray(bids)
    _, H, W, C = feat.shape
    N = pts.shape[0]
    r = crop // 2
    step = 2.0 * r / (crop - 1)
    out = np.zeros((N, crop * crop, C), np.float32)
    for p in range(N):
        x, y = float(pts[p, 0]), float(pts[p, 1])
        fm = feat[int(bids[p])]
        for i in range(crop):
            py = y - r + i * step
            for j in range(crop):
                px = x - r + j * step
                if py < 0 or py > H - 1 or px < 0 or px > W - 1:
                    continue  # extrapolation_value = 0
                y0 = int(np.floor(py)); x0 = int(np.floor(px))
                y1 = min(y0 + 1, H - 1); x1 = min(x0 + 1, W - 1)
                wy = py - y0; wx = px - x0
                val = (fm[y0, x0] * (1 - wy) * (1 - wx)
                       + fm[y0, x1] * (1 - wy) * wx
                       + fm[y1, x0] * wy * (1 - wx)
                       + fm[y1, x1] * wy * wx)
                out[p, i * crop + j] = val
    return out


if __name__ == "__main__":
    # FinePreprocess has no learnable parameters used in forward
    # (RoIAlign is parameter-free), so no weight init is required.
    config = dict(crop_size=8, window_size=8, enable_rescaled_crop=False, sparse=True)

    B, n_view, n_track = 1, 2, 32
    C_feat, H, Wf = 32, 16, 16

    key = jax.random.PRNGKey(0)
    k1, k2, k3 = jax.random.split(key, 3)
    features = jax.random.normal(k1, (B, n_view, C_feat, H, Wf), jnp.float32)
    sample_points = jax.random.uniform(
        k2, (B, n_view, n_track, 2), jnp.float32, minval=1.0, maxval=float(H - 2)
    )
    img_idxs = jax.random.randint(k3, (B, n_view, n_track), 0, B * n_view).astype(jnp.int32)

    features_crop, sparse = fine_preprocess_forward(features, sample_points, img_idxs, config)
    features_crop = jax.block_until_ready(features_crop)

    # Cross-check against a NumPy reference.
    feat_nhwc_np = np.transpose(
        np.asarray(features).reshape(B * n_view, C_feat, H, Wf), (0, 2, 3, 1)
    )
    ref = _reference_np(
        feat_nhwc_np,
        np.asarray(sample_points).reshape(-1, 2),
        np.asarray(img_idxs).reshape(-1),
        config["crop_size"],
    ).reshape(B, n_view, n_track, config["crop_size"] ** 2, C_feat)

    assert sparse is True
    assert features_crop.shape == ref.shape
    max_err = float(np.max(np.abs(np.asarray(features_crop) - ref)))
    assert np.allclose(np.asarray(features_crop), ref, rtol=2e-2, atol=2e-2), (
        f"Pallas RoIAlign mismatch vs reference (max abs err {max_err:.4f})"
    )
    print("KERNEL_OK")
</pallas_src>

<mosaic_0001>
module attributes {stable_mosaic.version = 11 : i64} {
  func.func @_roi_crop_group_kernel(%arg0: i32, %arg1: memref<4xi32, #tpu.memory_space<smem>>, %arg2: memref<1x2x2048xf32, #tpu.memory_space<vmem>>, %arg3: memref<1x32x256xbf16, #tpu.memory_space<vmem>>, %arg4: memref<1x32x2048xf32, #tpu.memory_space<vmem>>) attributes {dimension_semantics = [#tpu.dimension_semantics<parallel>], iteration_bounds = array<i64: 4>, scalar_prefetch = 1 : i64, scratch_operands = 0 : i64, tpu.core_type = #tpu.core_type<tc>, window_params = [{transform_indices = @transform_0, window_bounds = array<i64: 1, 2, 2048>}, {transform_indices = @transform_1, window_bounds = array<i64: 1, 32, 256>}, {transform_indices = @transform_2, window_bounds = array<i64: 1, 32, 2048>}]} {
    %c0 = arith.constant 0 : index
    %c0_0 = arith.constant 0 : index
    %c0_1 = arith.constant 0 : index
    %0 = vector.load %arg2[%c0, %c0_0, %c0_1] : memref<1x2x2048xf32, #tpu.memory_space<vmem>>, vector<1x2x2048xf32>
    %1 = vector.extract_strided_slice %0 {offsets = [0, 0, 0], sizes = [1, 1, 2048], strides = [1, 1, 1]} : vector<1x2x2048xf32> to vector<1x1x2048xf32>
    %2 = vector.shape_cast %1 : vector<1x1x2048xf32> to vector<1x2048xf32>
    %3 = vector.extract_strided_slice %0 {offsets = [0, 1, 0], sizes = [1, 1, 2048], strides = [1, 1, 1]} : vector<1x2x2048xf32> to vector<1x1x2048xf32>
    %4 = vector.shape_cast %3 : vector<1x1x2048xf32> to vector<1x2048xf32>
    %5 = tpu.iota {dimensions = array<i32: 0>} : vector<16x2048xi32>
    %6 = arith.sitofp %5 : vector<16x2048xi32> to vector<16x2048xf32>
    %7 = tpu.iota {dimensions = array<i32: 0>} : vector<16x2048xi32>
    %8 = arith.sitofp %7 : vector<16x2048xi32> to vector<16x2048xf32>
    %9 = vector.broadcast %2 : vector<1x2048xf32> to vector<16x2048xf32>
    %10 = arith.subf %6, %9 : vector<16x2048xf32>
    %11 = math.absf %10 : vector<16x2048xf32>
    %cst = arith.constant 1.000000e+00 : f32
    %12 = vector.broadcast %cst : f32 to vector<16x2048xf32>
    %13 = arith.subf %12, %11 : vector<16x2048xf32>
    %cst_2 = arith.constant 0.000000e+00 : f32
    %14 = vector.broadcast %cst_2 : f32 to vector<16x2048xf32>
    %15 = arith.maximumf %14, %13 : vector<16x2048xf32>
    %cst_3 = arith.constant 0.000000e+00 : f32
    %16 = vector.broadcast %cst_3 : f32 to vector<1x2048xf32>
    %17 = arith.cmpf oge, %2, %16 : vector<1x2048xf32>
    %cst_4 = arith.constant 1.500000e+01 : f32
    %18 = vector.broadcast %cst_4 : f32 to vector<1x2048xf32>
    %19 = arith.cmpf ole, %2, %18 : vector<1x2048xf32>
    %20 = arith.andi %17, %19 : vector<1x2048xi1>
    %cst_5 = arith.constant 0.000000e+00 : f32
    %21 = vector.shape_cast %20 : vector<1x2048xi1> to vector<1x2048xi1>
    %22 = vector.broadcast %21 : vector<1x2048xi1> to vector<16x2048xi1>
    %23 = vector.broadcast %cst_5 : f32 to vector<16x2048xf32>
    %24 = arith.select %22, %15, %23 : vector<16x2048xi1>, vector<16x2048xf32>
    %25 = vector.broadcast %4 : vector<1x2048xf32> to vector<16x2048xf32>
    %26 = arith.subf %8, %25 : vector<16x2048xf32>
    %27 = math.absf %26 : vector<16x2048xf32>
    %cst_6 = arith.constant 1.000000e+00 : f32
    %28 = vector.broadcast %cst_6 : f32 to vector<16x2048xf32>
    %29 = arith.subf %28, %27 : vector<16x2048xf32>
    %cst_7 = arith.constant 0.000000e+00 : f32
    %30 = vector.broadcast %cst_7 : f32 to vector<16x2048xf32>
    %31 = arith.maximumf %30, %29 : vector<16x2048xf32>
    %cst_8 = arith.constant 0.000000e+00 : f32
    %32 = vector.broadcast %cst_8 : f32 to vector<1x2048xf32>
    %33 = arith.cmpf oge, %4, %32 : vector<1x2048xf32>
    %cst_9 = arith.constant 1.500000e+01 : f32
    %34 = vector.broadcast %cst_9 : f32 to vector<1x2048xf32>
    %35 = arith.cmpf ole, %4, %34 : vector<1x2048xf32>
    %36 = arith.andi %33, %35 : vector<1x2048xi1>
    %cst_10 = arith.constant 0.000000e+00 : f32
    %37 = vector.shape_cast %36 : vector<1x2048xi1> to vector<1x2048xi1>
    %38 = vector.broadcast %37 : vector<1x2048xi1> to vector<16x2048xi1>
    %39 = vector.broadcast %cst_10 : f32 to vector<16x2048xf32>
    %40 = arith.select %38, %31, %39 : vector<16x2048xi1>, vector<16x2048xf32>
    %41 = arith.truncf %24 : vector<16x2048xf32> to vector<16x2048xbf16>
    %42 = arith.truncf %40 : vector<16x2048xf32> to vector<16x2048xbf16>
    %43 = vector.shape_cast %41 : vector<16x2048xbf16> to vector<16x1x2048xbf16>
    %44 = vector.shape_cast %42 : vector<16x2048xbf16> to vector<1x16x2048xbf16>
    %45 = vector.broadcast %43 : vector<16x1x2048xbf16> to vector<16x16x2048xbf16>
    %46 = vector.broadcast %44 : vector<1x16x2048xbf16> to vector<16x16x2048xbf16>
    %47 = arith.mulf %45, %46 : vector<16x16x2048xbf16>
    %48 = vector.shape_cast %47 : vector<16x16x2048xbf16> to vector<256x2048xbf16>
    %c0_11 = arith.constant 0 : index
    %c0_12 = arith.constant 0 : index
    %c0_13 = arith.constant 0 : index
    %49 = vector.load %arg3[%c0_11, %c0_12, %c0_13] : memref<1x32x256xbf16, #tpu.memory_space<vmem>>, vector<1x32x256xbf16>
    %50 = vector.shape_cast %49 : vector<1x32x256xbf16> to vector<32x256xbf16>
    %cst_14 = arith.constant dense<0.000000e+00> : vector<32x2048xf32>
    %51 = tpu.matmul %50, %48, %cst_14 {dimension_numbers = #tpu.dot_dimension_numbers<[1], [0], [0], [1], [0, 0, 1, 1], [], []>} : vector<32x256xbf16>, vector<256x2048xbf16>, vector<32x2048xf32> -> vector<32x2048xf32>
    %c0_15 = arith.constant 0 : index
    %c0_16 = arith.constant 0 : index
    %c0_17 = arith.constant 0 : index
    %52 = vector.load %arg4[%c0_15, %c0_16, %c0_17] : memref<1x32x2048xf32, #tpu.memory_space<vmem>>, vector<1x32x2048xf32>
    %53 = vector.shape_cast %52 : vector<1x32x2048xf32> to vector<32x2048xf32>
    %54 = vector.shape_cast %51 : vector<32x2048xf32> to vector<1x32x2048xf32>
    tpu.vector_store %arg4[%c0_15, %c0_16, %c0_17], %54 {strides = array<i32>} : memref<1x32x2048xf32, #tpu.memory_space<vmem>>, vector<1x32x2048xf32>,
    return
  }
  func.func @transform_0(%arg0: i32, %arg1: memref<4xi32, #tpu.memory_space<smem>>) -> (i32, i32, i32) {
    %c0_i32 = arith.constant 0 : i32
    %c0_i32_0 = arith.constant 0 : i32
    %c0_i32_1 = arith.constant 0 : i32
    return %arg0, %c0_i32, %c0_i32_0 : i32, i32, i32
  }
  func.func @transform_1(%arg0: i32, %arg1: memref<4xi32, #tpu.memory_space<smem>>) -> (i32, i32, i32) {
    %0 = arith.index_cast %arg0 : i32 to index
    %1 = memref.load %arg1[%0] : memref<4xi32, #tpu.memory_space<smem>>
    %c0_i32 = arith.constant 0 : i32
    %c0_i32_0 = arith.constant 0 : i32
    %c0_i32_1 = arith.constant 0 : i32
    return %1, %c0_i32, %c0_i32_0 : i32, i32, i32
  }
  func.func @transform_2(%arg0: i32, %arg1: memref<4xi32, #tpu.memory_space<smem>>) -> (i32, i32, i32) {
    %c0_i32 = arith.constant 0 : i32
    %c0_i32_0 = arith.constant 0 : i32
    %c0_i32_1 = arith.constant 0 : i32
    return %arg0, %c0_i32, %c0_i32_0 : i32, i32, i32
  }
}

</mosaic_0001>

<bundles_post_ra>
// kernel: tpu_custom_call.1
= control target key start
LH: loop header
LB: loop body
LE: loop exit
PB: predicated region body
PF: predicated region fallthrough
CT: control target
= control target key end

     0   :  { %s7865_s0 = inlined_call_operand.hbm [shape: s32[4], index: 0, kind: input, shape index: {}]   ;;  %s7866_s1 = inlined_call_operand.hbm [shape: f32[4,2,2048], index: 1, kind: input, shape index: {}]   ;;  %s7867_s2 = inlined_call_operand.hbm [shape: bf16[2,32,256], index: 2, kind: input, shape index: {}]   ;;  %s7868_s3 = inlined_call_operand.hbm [shape: f32[4,32,2048], index: 3, kind: output, shape index: {}]  }
   0x1   :  { %7895 = sst [smem:[#allocation28_spill]] %s7866_s1  ;;  %s5367_s14 = scalar_lea.hbm %s7865_s0, 16 }
   0x2   :  { %p5368_p0 = scmp.ne.s32.totalorder %s7865_s0, %s5367_s14  ;;  %p5371_p1 = scmp.lt.u32.totalorder %s5367_s14, %s7865_s0 }
   0x4   :  { %p5373_p2 = pnand %p5371_p1, %p5368_p0 }
   0x6   :  { %5376 = shalt.err (!%p5373_p2)  }
   0x7   :  { %s5535_s19 = smov [#allocation3]  }
   0x8   :  { %9 = dma.hbm_to_smem %s7865_s0, 16, %s5535_s19, [#allocation2] }
   0x9   :  { %5493 = dma.done.wait [#allocation2], 16 }
   0xa   :  { %5494 = vsyncadd [#allocation2], 4294967280 }
   0xb   :  { %11 = sfence }
   0xc   :  { %12 = vsyncpa [#allocation5], 0 }
   0xd   :  { %14 = vsyncpa [#allocation5 + $0x1], 0 }
   0xe   :  { %15 = vsyncpa [#allocation8], 0 }
   0xf   :  { %17 = vsyncpa [#allocation8 + $0x1], 0 }
  0x10   :  { %18 = vsyncpa [#allocation6], 0 }
  0x11   :  { %20 = vsyncpa [#allocation6 + $0x1], 0  ;;  %s5577_s22 = smov 0   ;;  %s5579_s23 = smov 0  }
  0x12   :  { %s5581_s24 = smov 0   ;;  %s5583_s25 = smov 0  }
  0x13   :  { %s5585_s26 = smov 0   ;;  %s5587_s0 = smov 0  }
  0x14   :  { %s5589_s27 = smov 0  }
  0x15 LB: > { %s5611_s28 = sadd.s32 4294967295, %s5533_s27   ;;  %s5212_s29 = sadd.s32 4294967294, %s5533_s27   ;;  %s5533_s27 = sphi %s5589_s27, %s7954_s27   ;;  %s5529_s0 = sphi %s5587_s0, %s7953_s0   ;;  %s5525_s26 = sphi %s5585_s26, %s7952_s26   ;;  %s5521_s25 = sphi %s5583_s25, %s7951_s25   ;;  %s5517_s24 = sphi %s5581_s24, %s7950_s24   ;;  %s5513_s23 = sphi %s5579_s23, %s7949_s23   ;;  %s5509_s22 = sphi %s5577_s22, %s7948_s22  }
  0x16   : > { %s5615_s30 = sadd.s32 1, %s5533_s27   ;;  %s33_s4 = sadd.s32 1, %s5529_s0 }
  0x17   : > { %s30_s5 = ssub.s32 %s5533_s27, %s5615_s30  ;;  %p40_p3 = scmp.ne.s32.totalorder %s5529_s0, %s5525_s26 }
  0x18   : > { %p31_p4 = scmp.eq.s32.totalorder %s30_s5, 0  ;;  %p41_p5 = scmp.eq.s32.totalorder %s5533_s27, 0 }
  0x19   : > { %p46_p6 = scmp.ne.s32.totalorder %s5525_s26, %s5521_s25  ;;  %p47_p7 = scmp.eq.s32.totalorder %s5611_s28, 0 }
  0x1a   : > { %s5627_s6 = scalar_select %p31_p4, %s5529_s0, %s33_s4  }
  0x1b   : > { %p5632_p8 = por %p41_p5, %p40_p3  ;;  %p5639_p9 = por %p47_p7, %p46_p6 }
  0x1c   : > { %s56_s9 = sld [smem:[#allocation3 + %s5533_s27]]  ;;  %s61_s11 = sadd.s32 1, %s5517_s24 }
  0x1d   : > { %s7897_s8 = scalar_select %p5639_p9, 1, 0 }
  0x1e   : > { %s57_s10 = sld [smem:[#allocation3 + %s5615_s30]]  ;;  %p68_p10 = scmp.ne.s32.totalorder %s5517_s24, %s5513_s23 }
  0x1f   : > { %p74_p11 = scmp.ne.s32.totalorder %s5513_s23, %s5509_s22  ;;  %p98_p12 = scmp.eq.s32.totalorder %s5611_s28, 3 }
  0x20   : > { %p5650_p13 = por %p68_p10, %p41_p5  ;;  %p104_p0 = scmp.eq.s32.totalorder %s5212_s29, 3 }
  0x21   : > { %p5654_p1 = por %p74_p11, %p47_p7  ;;  %p5661_p2 = por %p98_p12, %p40_p3 }
  0x22   : > { %p5668_p4 = por %p104_p0, %p46_p6  ;;  %p7869_p5 = scmp.lt.s32.totalorder %s5533_s27, 4 }
  0x23   : > { %s7899_s13 = scalar_select %p5654_p1, 1, 0 }
  0x24   : > { %s7900_s14 = scalar_select %p5661_p2, 1, 0 }
  0x25   : > { %s7901_s15 = scalar_select %p5668_p4, 1, 0 }
  0x26   : > { %s58_s16 = ssub.s32 %s56_s9, %s57_s10  ;;  %s124_s17 = sand.u32 1, %s5529_s0  }
  0x27   : > { %p59_p10 = scmp.eq.s32.totalorder %s58_s16, 0  ;;  %s5215_s18 = sshll.u32 %s124_s17, 5 }
  0x28   : > { %s5266_s20 = sshll.u32 %s5533_s27, 9  ;;  %s7902_s1 = sld [smem:[#allocation28_spill]] }
  0x29   : > { %s5675_s19 = scalar_select %p59_p10, %s5517_s24, %s61_s11  }
  0x2a   : > { %s128_s4 = scalar_lea.vmem [#allocation4], %s5215_s18  ;;  %p5689_p3 = pnand %p7869_p5, %p5632_p8 }
  0x2b   : > { %s136_s5 = sshll.u32 %s128_s4, 4  ;;  %s143_s10 = sand.u32 1, %s5517_s24   ;;  %s5683_s5 = int_to_ptr.vmem [resolvable:$true] %s136_s5 }
  0x2c   : > { %s125_s11 = scalar_lea.sflag [#allocation5], %s124_s17  ;;  %p5379_p12 = pneg %p5689_p3 }
  0x2e   : > { %s5681_s29 = scalar_lea.hbm %s7902_s1, %s5266_s20  ;;  %s5382_s20 = scalar_lea.hbm %s7902_s1, 2048 }
  0x2f   : > { %s5377_s16 = scalar_lea.hbm %s5681_s29, 512  ;;  %p5383_p8 = scmp.lt.u32.totalorder %s5681_s29, %s7902_s1 }
  0x30   : > { %p5378_p11 = scmp.ne.s32.totalorder %s5681_s29, %s5377_s16  ;;  %p5384_p5 = scmp.lt.u32.totalorder %s5382_s20, %s5377_s16 }
  0x31   : > { %p5386_p7 = scmp.lt.u32.totalorder %s5377_s16, %s5681_s29 }
  0x32   : > { %p5380_p0 = pnand %p5379_p12, %p5378_p11  ;;  %p5385_p6 = por %p5384_p5, %p5383_p8 }
  0x34   : > { %p5381_p10 = pneg %p5380_p0  ;;  %p5387_p4 = por %p5386_p7, %p5385_p6 }
  0x36   : > { %p5388_p2 = pnand %p5387_p4, %p5381_p10 }
  0x38   : > { %5391 = shalt.err (!%p5388_p2)
}
  0x39   : > { %s5392_s17 = scalar_lea.vmem %s5683_s5, 512  ;;  %s5536_s4 = smov [#allocation4]  }
  0x3a   : > { %p5393_p11 = scmp.ne.s32.totalorder %s5683_s5, %s5392_s17  ;;  %s5397_s7 = sshll.u32 %s5536_s4, 4  ;;  %s5398_s7 = int_to_ptr.vmem [resolvable:$false] %s5397_s7 }
  0x3b   : > { %s5399_s18 = scalar_lea.vmem %s5398_s7, 1024  ;;  %p5400_p9 = scmp.lt.s32.totalorder %s5683_s5, %s5398_s7 }
  0x3c   : > { %p5395_p0 = pnand %p5393_p11, %p5379_p12  ;;  %p5401_p5 = scmp.lt.s32.totalorder %s5399_s18, %s5392_s17 }
  0x3e   : > { %p5396_p1 = pneg %p5395_p0  ;;  %p5402_p8 = por %p5401_p5, %p5400_p9 }
  0x40   : > { %p5403_p6 = pnand %p5402_p8, %p5396_p1 }
  0x42   : > { %5406 = shalt.err (!%p5403_p6)
}
  0x43   : > { %5280 = dma.hbm_to_vmem [thread:$0]  (!%p5689_p3), %s5681_s29, 512, %s5683_s5, %s125_s11  }
  0x44   : > { %p7904_p2 = scmp.lt.s32.totalorder %s5533_s27, 5  ;;  %p7905_p9 = scmp.ge.s32.totalorder %s5533_s27, 1 }
  0x45   : > { %s5218_s9 = sshll.u32 %s143_s10, 5  ;;  %p7907_p4 = scmp.lt.s32.totalorder %s5533_s27, 4 }
  0x46   : > { %p5725_p1 = pnand %p7905_p9, %p7904_p2  ;;  %s147_s11 = scalar_lea.vmem [#allocation7], %s5218_s9 }
  0x47   : > { %p5735_p7 = pnand %p7907_p4, %p5650_p13  ;;  %p7909_p3 = pmov %p7907_p4 }
  0x48   : > { %s5270_s21 = scalar_select %p5650_p13, [#allocation3], [#allocation10] }
  0x49   : > { %s5271_s29 = scalar_select %p5650_p13, %s5533_s27, 0 }
  0x4a   : > { %s7956_s21 = smov (!%p7909_p3, %s5270_s21), [#allocation11]  ;;  %p7910_p12 = pmov %p7909_p3 }
  0x4b   : > { %s155_s22 = sshll.u32 %s147_s11, 4  ;;  %s5757_s12 = scalar_lea.sflag [#allocation8], %s143_s10  ;;  %s5748_s22 = int_to_ptr.vmem [resolvable:$true] %s155_s22 }
  0x4c   : > { %s7958_s29 = smov (!%p7910_p12, %s5271_s29), 0  ;;  %p5409_p10 = pneg %p5735_p7 }
  0x4d   : > { %s148_s5 = sld [smem:[%s7956_s21 + %s7958_s29]]  ;;  %s5412_s29 = scalar_lea.hbm %s7867_s2, 1024 }
  0x53   : > { %s5267_s17 = sshll.u32 %s148_s5, 9 }
  0x54   : > { %s5753_s18 = scalar_lea.hbm %s7867_s2, %s5267_s17 }
  0x55   : > { %s5407_s1 = scalar_lea.hbm %s5753_s18, 512  ;;  %p5413_p5 = scmp.lt.u32.totalorder %s5753_s18, %s7867_s2 }
  0x56   : > { %p5408_p13 = scmp.ne.s32.totalorder %s5753_s18, %s5407_s1  ;;  %p5414_p8 = scmp.lt.u32.totalorder %s5412_s29, %s5407_s1 }
  0x57   : > { %p5416_p2 = scmp.lt.u32.totalorder %s5407_s1, %s5753_s18 }
  0x58   : > { %p5410_p11 = pnand %p5409_p10, %p5408_p13  ;;  %p5415_p6 = por %p5414_p8, %p5413_p5 }
  0x5a   : > { %p5411_p0 = pneg %p5410_p11  ;;  %p5417_p9 = por %p5416_p2, %p5415_p6 }
  0x5c   : > { %p5418_p4 = pnand %p5417_p9, %p5411_p0 }
  0x5e   : > { %5421 = shalt.err (!%p5418_p4)
}
  0x5f   : > { %s5422_s10 = scalar_lea.vmem %s5748_s22, 512  ;;  %s5537_s17 = smov [#allocation7]  }
  0x60   : > { %p5423_p3 = scmp.ne.s32.totalorder %s5748_s22, %s5422_s10  ;;  %s5427_s4 = sshll.u32 %s5537_s17, 4  ;;  %s5428_s4 = int_to_ptr.vmem [resolvable:$false] %s5427_s4 }
  0x61   : > { %s5429_s7 = scalar_lea.vmem %s5428_s4, 1024  ;;  %p5430_p11 = scmp.lt.s32.totalorder %s5748_s22, %s5428_s4 }
  0x62   : > { %p5425_p12 = pnand %p5423_p3, %p5409_p10  ;;  %p5431_p5 = scmp.lt.s32.totalorder %s5429_s7, %s5422_s10 }
  0x64   : > { %p5426_p13 = pneg %p5425_p12  ;;  %p5432_p8 = por %p5431_p5, %p5430_p11 }
  0x66   : > { %p5433_p6 = pnand %p5432_p8, %p5426_p13 }
  0x68   : > { %5436 = shalt.err (!%p5433_p6)
}
  0x69   : > { %s5538_s1 = smov 128   ;;  %s5539_s9 = smov 8  }
  0x6a   : > { %5285 = dma.hbm_to_vmem [thread:$0]  (!%p5735_p7), %s5753_s18, 512, %s5748_s22, %s5757_s12, %s5538_s1, %s5538_s1, %s5539_s9  }
  0x6b   : > { %167 = sbr.rel (%p5725_p1) target bundleno = 804 (0x324), region = 28 }
  0x72   : > { %s5788_s21 = sand.u32 1, %s5525_s26   ;;  %p7911_p10 = scmp.ne.s32.totalorder %s7897_s8, 0 }
  0x73   : > { %s5222_s29 = sshll.u32 %s5788_s21, 5  ;;  %s170_s5 = scalar_lea.sflag [#allocation5], %s5788_s21 }
  0x74   : > { %s5792_s11 = scalar_lea.vmem [#allocation4], %s5222_s29 }
  0x75   : > { %5496 = dma.done.wait (%p7911_p10), %s170_s5, 512  }
  0x76   : > { %5498 = vsyncadd (%p7911_p10), %s170_s5, 4294966784  ;;  %s178_s20 = sand.u32 1, %s5513_s23   ;;  %p7912_p1 = scmp.ne.s32.totalorder %s7899_s13, 0 }
  0x77   : > { %s5223_s16 = sshll.u32 %s178_s20, 5  ;;  %s179_s22 = scalar_lea.sflag [#allocation8], %s178_s20 }
  0x78   : > { %s5799_s18 = scalar_lea.vmem [#allocation7], %s5223_s16 }
  0x79   : > { %5500 = dma.done.wait (%p7912_p1), %s179_s22, 512  }
  0x7a   : > { %5502 = vsyncadd (%p7912_p1), %s179_s22, 4294966784  ;;  %v213_v0 = vlaneseq  ;;  %v5540_v2 = vmov 1966171168   ;;  %v5816_v11 = vld [vmem:[%s5792_s11] sm:$0xff]  ;;  %v5819_v12 = vld [vmem:[%s5792_s11 + $0x8] sm:$0xff]  ;;  %s5224_s8 = sshll.u32 %s5788_s21, 9 }
  0x7b   : > { %v1191_v3 = vunpack.c.l.s4 %v5540_v2  ;;  %vm494_vm0 = vcmp.ge.f32.partialorder %v5816_v11, 0.0  ;;  %vm495_vm1 = vcmp.ge.f32.partialorder %v5819_v12, 0.0  ;;  %vm498_vm2 = vcmp.le.f32.partialorder %v5816_v11, 15.0  ;;  %s7480_s13 = scalar_lea.vmem [#allocation9], %s5224_s8  ;;  %s5268_s12 = sshll.u32 %s5611_s28, 13 }
  0x7c   : > { %v214_v1 = vshrl.u32 %v213_v0, 7  ;;  %vm499_vm3 = vcmp.le.f32.partialorder %v5819_v12, 15.0  ;;  %vm502_vm4 = vmand %vm494_vm0, %vm498_vm2  ;;  %s5116_s10 = sshll.u32 %s7480_s13, 4  ;;  %s7806_s7 = scalar_lea.hbm %s7868_s3, %s5268_s12  ;;  %s7808_s10 = int_to_ptr.vmem [resolvable:$true] %s5116_s10 }
  0x7d   : > { %v1192_v10 = vunpack.c.0.s8 %v1191_v3  ;;  %vm503_vm5 = vmand %vm495_vm1, %vm499_vm3  ;;  %s5103_s28 = scalar_lea.sflag [#allocation6], %s5788_s21  ;;  %s5437_s1 = scalar_lea.vmem %s7808_s10, 8192 }
  0x7e   : > { %v215_v4 = vadd.s32 8, %v214_v1  ;;  %v5805_v5 = vsub.s32 0, %v214_v1  ;;  %v5807_v6 = vsub.s32 2, %v214_v1  ;;  %v5809_v7 = vsub.s32 4, %v214_v1  ;;  %p5438_p7 = scmp.ne.s32.totalorder %s7808_s10, %s5437_s1  ;;  %p7946_p0 = scmp.ne.s32.totalorder %s7900_s14, 0 }
  0x7f   : > { %v5811_v8 = vsub.s32 6, %v214_v1  ;;  %v5813_v9 = vcvt.s32.f32 %v214_v1  ;;  %v5823_v14 = vsub.s32 1, %v214_v1  ;;  %v5825_v15 = vsub.s32 3, %v214_v1  ;;  %s5542_s9 = smov [#allocation9]  }
  0x80   : > { %7913 = vst [vmem:[#allocation16_spill] sm:$0xff] %v5807_v6  ;;  %7914 = vst [vmem:[#allocation17_spill] sm:$0xff] %v5809_v7  ;;  %v5821_v13 = vcvt.s32.f32 %v215_v4  ;;  %v5827_v16 = vsub.s32 5, %v214_v1  ;;  %v225_v17 = vrot.slane %v5816_v11, %v5805_v5  ;;  %v229_v18 = vrot.slane %v5816_v11, %v5807_v6  ;;  %p5439_p2 = pnand %p5438_p7, %p7946_p0  ;;  %s5441_s29 = sshll.u32 %s5542_s9, 4  ;;  %s5442_s29 = int_to_ptr.vmem [resolvable:$false] %s5441_s29 }
  0x81   : > { %7915 = vst [vmem:[#allocation18_spill] sm:$0xff] %v5811_v8  ;;  %7916 = vst [vmem:[#allocation19_spill] sm:$0xff] %v5813_v9  ;;  %v233_v19 = vrot.slane %v5816_v11, %v5809_v7  ;;  %v237_v20 = vrot.slane %v5816_v11, %v5811_v8  ;;  %v241_v21 = vrot.slane %v5819_v12, %v5805_v5  ;;  %v5855_v35 = vsub.s32 7, %v214_v1  ;;  %s5443_s5 = scalar_lea.vmem %s5442_s29, 16384  ;;  %p5444_p4 = scmp.lt.s32.totalorder %s7808_s10, %s5442_s29 }
  0x82   : > { %7917 = vst [vmem:[#allocation20_spill] sm:$0xff] %v5821_v13  ;;  %v245_v22 = vrot.slane %v5819_v12, %v5807_v6  ;;  %v249_v23 = vrot.slane %v5819_v12, %v5809_v7  ;;  %v253_v24 = vrot.slane %v5819_v12, %v5811_v8  ;;  %v305_v25 = vrot.slane %v225_v17, %v5805_v5  ;;  %p5440_p9 = pneg %p5439_p2  ;;  %p5445_p3 = scmp.lt.s32.totalorder %s5443_s5, %s5437_s1 }
  0x83   : > { %v309_v26 = vrot.slane %v229_v18, %v5805_v5  ;;  %v313_v27 = vrot.slane %v233_v19, %v5805_v5  ;;  %v317_v28 = vrot.slane %v237_v20, %v5805_v5  ;;  %v321_v29 = vrot.slane %v241_v21, %v5805_v5 }
  0x84   : > { %v325_v30 = vrot.slane %v245_v22, %v5805_v5  ;;  %v329_v31 = vrot.slane %v249_v23, %v5805_v5  ;;  %v333_v32 = vrot.slane %v253_v24, %v5805_v5  ;;  %v366_v33 = vsub.f32 %v5813_v9, %v305_v25  ;;  %p5446_p12 = por %p5445_p3, %p5444_p4 }
  0x85   : > { %v367_v34 = vsub.f32 %v5813_v9, %v309_v26  ;;  %v5857_v36 = vsub.s32 %v1192_v10, %v214_v1  ;;  %v368_v37 = vsub.f32 %v5813_v9, %v313_v27  ;;  %v369_v38 = vsub.f32 %v5813_v9, %v317_v28 }
  0x86   : > { %v370_v39 = vsub.f32 %v5813_v9, %v321_v29  ;;  %v371_v40 = vsub.f32 %v5813_v9, %v325_v30  ;;  %v372_v41 = vsub.f32 %v5813_v9, %v329_v31  ;;  %v373_v42 = vsub.f32 %v5813_v9, %v333_v32  ;;  %p5447_p13 = pnand %p5446_p12, %p5440_p9 }
  0x87   : > { %v382_v43 = vsub.f32 %v5821_v13, %v305_v25  ;;  %v383_v44 = vsub.f32 %v5821_v13, %v309_v26  ;;  %v384_v45 = vsub.f32 %v5821_v13, %v313_v27  ;;  %v385_v46 = vsub.f32 %v5821_v13, %v317_v28 }
  0x88   : > { %v386_v47 = vsub.f32 %v5821_v13, %v321_v29  ;;  %v387_v48 = vsub.f32 %v5821_v13, %v325_v30  ;;  %v388_v49 = vsub.f32 %v5821_v13, %v329_v31  ;;  %v389_v50 = vsub.f32 %v5821_v13, %v333_v32 }
  0x89   : > { %v398_v51 = vand.u32 2147483647, %v366_v33  ;;  %v399_v52 = vand.u32 2147483647, %v367_v34  ;;  %v400_v53 = vand.u32 2147483647, %v368_v37  ;;  %v689_v56 = vrot.slane %v5816_v11, %v5823_v14 }
  0x8a   : > { %v401_v54 = vand.u32 2147483647, %v369_v38  ;;  %v402_v55 = vand.u32 2147483647, %v370_v39  ;;  %v403_v57 = vand.u32 2147483647, %v371_v40  ;;  %v693_v60 = vrot.slane %v5816_v11, %v5825_v15 }
  0x8b   : > { %v404_v58 = vand.u32 2147483647, %v372_v41  ;;  %v405_v59 = vand.u32 2147483647, %v373_v42  ;;  %v414_v61 = vand.u32 2147483647, %v382_v43  ;;  %v697_v0 = vrot.slane %v5816_v11, %v5827_v16 }
  0x8c   : > { %v415_v62 = vand.u32 2147483647, %v383_v44  ;;  %v416_v63 = vand.u32 2147483647, %v384_v45  ;;  %v417_v1 = vand.u32 2147483647, %v385_v46  ;;  %v701_v4 = vrot.slane %v5816_v11, %v5855_v35 }
  0x8d   : > { %v418_v2 = vand.u32 2147483647, %v386_v47  ;;  %v419_v3 = vand.u32 2147483647, %v387_v48  ;;  %v420_v10 = vand.u32 2147483647, %v388_v49  ;;  %v705_v19 = vrot.slane %v5819_v12, %v5823_v14 }
  0x8e   : > { %v421_v17 = vand.u32 2147483647, %v389_v50  ;;  %v430_v18 = vsub.f32 1.0, %v398_v51  ;;  %v431_v20 = vsub.f32 1.0, %v399_v52  ;;  %v432_v21 = vsub.f32 1.0, %v400_v53 }
  0x8f   : > { %v433_v22 = vsub.f32 1.0, %v401_v54  ;;  %v434_v23 = vsub.f32 1.0, %v402_v55  ;;  %v435_v24 = vsub.f32 1.0, %v403_v57  ;;  %v436_v25 = vsub.f32 1.0, %v404_v58 }
  0x90   : > { %v437_v26 = vsub.f32 1.0, %v405_v59  ;;  %v446_v27 = vsub.f32 1.0, %v414_v61  ;;  %v447_v28 = vsub.f32 1.0, %v415_v62  ;;  %v448_v29 = vsub.f32 1.0, %v416_v63 }
  0x91   : > { %v449_v30 = vsub.f32 1.0, %v417_v1  ;;  %v450_v31 = vsub.f32 1.0, %v418_v2  ;;  %v451_v32 = vsub.f32 1.0, %v419_v3  ;;  %v452_v33 = vsub.f32 1.0, %v420_v10 }
  0x92   : > { %v453_v34 = vsub.f32 1.0, %v421_v17  ;;  %v462_v37 = vmax.f32 %v430_v18, 0.0  ;;  %v463_v38 = vmax.f32 %v431_v20, 0.0  ;;  %v464_v39 = vmax.f32 %v432_v21, 0.0  ;;  %v5355_v17 = vld [vmem:[%s5799_s18 + $0x4] ss:$8 sps:$4 sm:$0xff]  }
  0x93   : > { %v465_v40 = vmax.f32 %v433_v22, 0.0  ;;  %v466_v41 = vmax.f32 %v434_v23, 0.0  ;;  %v467_v42 = vmax.f32 %v435_v24, 0.0  ;;  %v468_v43 = vmax.f32 %v436_v25, 0.0  ;;  %4646 = vmatprep.mubr.bf16.mxu0 %v5355_v17  ;;  %4699 = vmatprep.mubr.bf16.mxu1 %v5355_v17 }
  0x94   : > { %v469_v44 = vmax.f32 %v437_v26, 0.0  ;;  %v478_v45 = vmax.f32 %v446_v27, 0.0  ;;  %v479_v46 = vmax.f32 %v447_v28, 0.0  ;;  %v480_v47 = vmax.f32 %v448_v29, 0.0 }
  0x95   : > { %v481_v48 = vmax.f32 %v449_v30, 0.0  ;;  %v482_v49 = vmax.f32 %v450_v31, 0.0  ;;  %v483_v50 = vmax.f32 %v451_v32, 0.0  ;;  %v484_v51 = vmax.f32 %v452_v33, 0.0 }
  0x96   : > { %v485_v52 = vmax.f32 %v453_v34, 0.0  ;;  %v709_v53 = vrot.slane %v5819_v12, %v5825_v15  ;;  %v7873_v54 = vmov 0   ;;  %v713_v57 = vrot.slane %v5819_v12, %v5827_v16 }
  0x97   : > { %v5890_v55 = vsel %vm502_vm4, 1, %v7873_v54  ;;  %v717_v58 = vrot.slane %v5819_v12, %v5855_v35  ;;  %v5897_v59 = vrot.slane %v689_v56, %v5823_v14  ;;  %v5900_v61 = vsel %vm503_vm5, 1, %v7873_v54 }
  0x98   : > { %v513_v62 = vrot.slane %v5890_v55, %v5805_v5  ;;  %v517_v63 = vrot.slane %v5890_v55, %v5807_v6  ;;  %v521_v1 = vrot.slane %v5890_v55, %v5809_v7  ;;  %v525_v2 = vrot.slane %v5890_v55, %v5811_v8 }
  0x99   : > { %v529_v3 = vrot.slane %v5900_v61, %v5805_v5  ;;  %v533_v56 = vrot.slane %v5900_v61, %v5807_v6  ;;  %v537_v10 = vrot.slane %v5900_v61, %v5809_v7  ;;  %v541_v18 = vrot.slane %v5900_v61, %v5811_v8 }
  0x9a   : > { %v577_v20 = vrot.slane %v513_v62, %v5805_v5  ;;  %v581_v21 = vrot.slane %v517_v63, %v5805_v5  ;;  %v585_v22 = vrot.slane %v521_v1, %v5805_v5  ;;  %v589_v23 = vrot.slane %v525_v2, %v5805_v5 }
  0x9b   : > { %v593_v24 = vrot.slane %v529_v3, %v5805_v5  ;;  %v597_v25 = vrot.slane %v533_v56, %v5805_v5  ;;  %v601_v26 = vrot.slane %v537_v10, %v5805_v5  ;;  %v605_v27 = vrot.slane %v541_v18, %v5805_v5 }
  0x9c   : > { %vm638_vm6 = vcmp.eq.s32.totalorder %v577_v20, 1  ;;  %vm639_vm7 = vcmp.eq.s32.totalorder %v581_v21, 1  ;;  %vm640_vm8 = vcmp.eq.s32.totalorder %v585_v22, 1  ;;  %vm641_vm9 = vcmp.eq.s32.totalorder %v589_v23, 1 }
  0x9d   : > { %vm642_vm10 = vcmp.eq.s32.totalorder %v593_v24, 1  ;;  %vm643_vm11 = vcmp.eq.s32.totalorder %v597_v25, 1  ;;  %vm644_vm12 = vcmp.eq.s32.totalorder %v601_v26, 1  ;;  %vm645_vm13 = vcmp.eq.s32.totalorder %v605_v27, 1 }
  0x9e   : > { %v5928_v28 = vsel %vm638_vm6, %v462_v37, 0.0  ;;  %v773_v29 = vrot.slane %v693_v60, %v5823_v14  ;;  %v777_v30 = vrot.slane %v697_v0, %v5823_v14  ;;  %v5939_v31 = vsel %vm639_vm7, %v463_v38, 0.0 }
  0x9f   : > { %v5942_v32 = vsel %vm640_vm8, %v464_v39, 0.0  ;;  %v5945_v33 = vsel %vm641_vm9, %v465_v40, 0.0  ;;  %v5948_v34 = vsel %vm642_vm10, %v466_v41, 0.0  ;;  %v5951_v37 = vsel %vm643_vm11, %v467_v42, 0.0 }
  0xa0   : > { %v5954_v60 = vsel %vm644_vm12, %v468_v43, 0.0  ;;  %v5957_v0 = vsel %vm645_vm13, %v469_v44, 0.0  ;;  %v5960_v38 = vsel %vm638_vm6, %v478_v45, 0.0  ;;  %v5963_v39 = vsel %vm639_vm7, %v479_v46, 0.0 }
  0xa1   : > { %v5966_v40 = vsel %vm640_vm8, %v480_v47, 0.0  ;;  %v5969_v41 = vsel %vm641_vm9, %v481_v48, 0.0  ;;  %v5972_v42 = vsel %vm642_vm10, %v482_v49, 0.0  ;;  %v5975_v43 = vsel %vm643_vm11, %v483_v50, 0.0 }
  0xa2   : > { %v781_v44 = vrot.slane %v701_v4, %v5823_v14  ;;  %v785_v45 = vrot.slane %v705_v19, %v5823_v14  ;;  %v789_v46 = vrot.slane %v709_v53, %v5823_v14  ;;  %v5987_v47 = vsel %vm644_vm12, %v484_v51, 0.0 }
  0xa3   : > { %v793_v48 = vrot.slane %v713_v57, %v5823_v14  ;;  %v797_v49 = vrot.slane %v717_v58, %v5823_v14  ;;  %v830_v50 = vsub.f32 %v5813_v9, %v5897_v59  ;;  %v5994_v11 = vsel %vm645_vm13, %v485_v52, 0.0 }
  0xa4   : > { %v831_v4 = vsub.f32 %v5813_v9, %v773_v29  ;;  %v832_v12 = vsub.f32 %v5813_v9, %v777_v30  ;;  %v833_v19 = vsub.f32 %v5813_v9, %v781_v44  ;;  %v834_v53 = vsub.f32 %v5813_v9, %v785_v45 }
  0xa5   : > { %v835_v51 = vsub.f32 %v5813_v9, %v789_v46  ;;  %v836_v57 = vsub.f32 %v5813_v9, %v793_v48  ;;  %v837_v58 = vsub.f32 %v5813_v9, %v797_v49  ;;  %v846_v62 = vsub.f32 %v5821_v13, %v5897_v59 }
  0xa6   : > { %v847_v52 = vsub.f32 %v5821_v13, %v773_v29  ;;  %v848_v63 = vsub.f32 %v5821_v13, %v777_v30  ;;  %v849_v1 = vsub.f32 %v5821_v13, %v781_v44  ;;  %v850_v2 = vsub.f32 %v5821_v13, %v785_v45 }
  0xa7   : > { %v851_v3 = vsub.f32 %v5821_v13, %v789_v46  ;;  %v852_v56 = vsub.f32 %v5821_v13, %v793_v48  ;;  %v862_v10 = vand.u32 2147483647, %v830_v50  ;;  %v853_v17 = vsub.f32 %v5821_v13, %v797_v49 }
  0xa8   : > { %v863_v18 = vand.u32 2147483647, %v831_v4  ;;  %v864_v20 = vand.u32 2147483647, %v832_v12  ;;  %v865_v21 = vand.u32 2147483647, %v833_v19  ;;  %v961_v24 = vrot.slane %v5890_v55, %v5823_v14 }
  0xa9   : > { %v866_v22 = vand.u32 2147483647, %v834_v53  ;;  %v867_v59 = vand.u32 2147483647, %v835_v51  ;;  %v868_v23 = vand.u32 2147483647, %v836_v57  ;;  %v965_v29 = vrot.slane %v5890_v55, %v5825_v15 }
  0xaa   : > { %v869_v25 = vand.u32 2147483647, %v837_v58  ;;  %v878_v26 = vand.u32 2147483647, %v846_v62  ;;  %v879_v27 = vand.u32 2147483647, %v847_v52  ;;  %v969_v46 = vrot.slane %v5890_v55, %v5827_v16 }
  0xab   : > { %v880_v30 = vand.u32 2147483647, %v848_v63  ;;  %v881_v44 = vand.u32 2147483647, %v849_v1  ;;  %v882_v45 = vand.u32 2147483647, %v850_v2  ;;  %v973_v4 = vrot.slane %v5890_v55, %v5855_v35 }
  0xac   : > { %v883_v48 = vand.u32 2147483647, %v851_v3  ;;  %v884_v49 = vand.u32 2147483647, %v852_v56  ;;  %v885_v50 = vand.u32 2147483647, %v853_v17 }
  0xad   : > { %v894_v12 = vsub.f32 1.0, %v862_v10  ;;  %v895_v19 = vsub.f32 1.0, %v863_v18  ;;  %v896_v53 = vsub.f32 1.0, %v864_v20  ;;  %v897_v51 = vsub.f32 1.0, %v865_v21 }
  0xae   : > { %v898_v57 = vsub.f32 1.0, %v866_v22  ;;  %v899_v58 = vsub.f32 1.0, %v867_v59  ;;  %v900_v62 = vsub.f32 1.0, %v868_v23  ;;  %v901_v52 = vsub.f32 1.0, %v869_v25 }
  0xaf   : > { %v910_v63 = vsub.f32 1.0, %v878_v26  ;;  %v911_v1 = vsub.f32 1.0, %v879_v27  ;;  %v912_v2 = vsub.f32 1.0, %v880_v30  ;;  %v913_v54 = vsub.f32 1.0, %v881_v44 }
  0xb0   : > { %v914_v13 = vsub.f32 1.0, %v882_v45  ;;  %v915_v9 = vsub.f32 1.0, %v883_v48  ;;  %v916_v3 = vsub.f32 1.0, %v884_v49  ;;  %v917_v56 = vsub.f32 1.0, %v885_v50 }
  0xb1   : > { %v926_v17 = vmax.f32 %v894_v12, 0.0  ;;  %v927_v8 = vmax.f32 %v895_v19, 0.0  ;;  %v928_v7 = vmax.f32 %v896_v53, 0.0  ;;  %v929_v55 = vmax.f32 %v897_v51, 0.0 }
  0xb2   : > { %v930_v10 = vmax.f32 %v898_v57, 0.0  ;;  %v931_v18 = vmax.f32 %v899_v58, 0.0  ;;  %v932_v20 = vmax.f32 %v900_v62, 0.0  ;;  %v933_v21 = vmax.f32 %v901_v52, 0.0 }
  0xb3   : > { %v942_v22 = vmax.f32 %v910_v63, 0.0  ;;  %v943_v59 = vmax.f32 %v911_v1, 0.0  ;;  %v944_v23 = vmax.f32 %v912_v2, 0.0  ;;  %v945_v25 = vmax.f32 %v913_v54, 0.0 }
  0xb4   : > { %v946_v26 = vmax.f32 %v914_v13, 0.0  ;;  %v947_v27 = vmax.f32 %v915_v9, 0.0  ;;  %v977_v30 = vrot.slane %v5900_v61, %v5823_v14  ;;  %v981_v44 = vrot.slane %v5900_v61, %v5825_v15 }
  0xb5   : > { %v985_v45 = vrot.slane %v5900_v61, %v5827_v16  ;;  %v989_v48 = vrot.slane %v5900_v61, %v5855_v35  ;;  %v1025_v49 = vrot.slane %v961_v24, %v5823_v14  ;;  %v1029_v50 = vrot.slane %v965_v29, %v5823_v14 }
  0xb6   : > { %v1033_v54 = vrot.slane %v969_v46, %v5823_v14  ;;  %v1037_v9 = vrot.slane %v973_v4, %v5823_v14  ;;  %v1041_v13 = vrot.slane %v977_v30, %v5823_v14  ;;  %v1045_v12 = vrot.slane %v981_v44, %v5823_v14 }
  0xb7   : > { %v1049_v19 = vrot.slane %v985_v45, %v5823_v14  ;;  %v1053_v53 = vrot.slane %v989_v48, %v5823_v14  ;;  %vm1086_vm14 = vcmp.eq.s32.totalorder %v1025_v49, 1  ;;  %vm1087_vm15 = vcmp.eq.s32.totalorder %v1029_v50, 1 }
  0xb8   : > { %v948_v51 = vmax.f32 %v916_v3, 0.0  ;;  %v949_v61 = vmax.f32 %v917_v56, 0.0  ;;  %vm1090_vm0 = vcmp.eq.s32.totalorder %v1041_v13, 1  ;;  %vm1091_vm1 = vcmp.eq.s32.totalorder %v1045_v12, 1  ;;  %v6095_v12 = vld [vmem:[%s5792_s11 + $0x10] sm:$0xff] }
  0xb9   : > { %vm1088_vm2 = vcmp.eq.s32.totalorder %v1033_v54, 1  ;;  %vm1089_vm3 = vcmp.eq.s32.totalorder %v1037_v9, 1  ;;  %vm1092_vm4 = vcmp.eq.s32.totalorder %v1049_v19, 1  ;;  %vm1093_vm5 = vcmp.eq.s32.totalorder %v1053_v53, 1 }
  0xba   : > { %v1102_v24 = vsel %vm1086_vm14, %v926_v17, 0.0  ;;  %v1103_v29 = vsel %vm1087_vm15, %v927_v8, 0.0  ;;  %v1106_v46 = vsel %vm1090_vm0, %v930_v10, 0.0  ;;  %v1107_v4 = vsel %vm1091_vm1, %v931_v18, 0.0 }
  0xbb   : > { %v1108_v57 = vsel %vm1092_vm4, %v932_v20, 0.0  ;;  %v1109_v58 = vsel %vm1093_vm5, %v933_v21, 0.0  ;;  %v1118_v62 = vsel %vm1086_vm14, %v942_v22, 0.0  ;;  %v1119_v52 = vsel %vm1087_vm15, %v943_v59, 0.0 }
  0xbc   : > { %v1104_v63 = vsel %vm1088_vm2, %v928_v7, 0.0  ;;  %v1105_v1 = vsel %vm1089_vm3, %v929_v55, 0.0  ;;  %v1122_v2 = vsel %vm1090_vm0, %v946_v26, 0.0  ;;  %v1123_v8 = vsel %vm1091_vm1, %v947_v27, 0.0 }
  0xbd   : > { %v1120_v3 = vsel %vm1088_vm2, %v944_v23, 0.0  ;;  %v1121_v56 = vsel %vm1089_vm3, %v945_v25, 0.0  ;;  %v1124_v17 = vsel %vm1092_vm4, %v948_v51, 0.0  ;;  %v1125_v10 = vsel %vm1093_vm5, %v949_v61, 0.0 }
  0xbe   : > { %v6052_v18 = vpack.c.bf16 %v1118_v62, %v1102_v24  ;;  %v6054_v20 = vpack.c.bf16 %v1119_v52, %v1103_v29  ;;  %v6056_v21 = vpack.c.bf16 %v1122_v2, %v1106_v46  ;;  %v6058_v7 = vpack.c.bf16 %v1123_v8, %v1107_v4 }
  0xbf   : > { %v6060_v55 = vpack.c.bf16 %v1124_v17, %v1108_v57  ;;  %v6062_v22 = vpack.c.bf16 %v1125_v10, %v1109_v58  ;;  %v5225_v59 = vpack.c.bf16 %v5939_v31, %v5928_v28  ;;  %v5227_v23 = vpack.c.bf16 %v5945_v33, %v5942_v32 }
  0xc0   : > { %v5229_v25 = vpack.c.bf16 %v5951_v37, %v5948_v34  ;;  %v5231_v26 = vpack.c.bf16 %v5957_v0, %v5954_v60  ;;  %v5226_v27 = vpack.c.bf16 %v5963_v39, %v5960_v38  ;;  %v5228_v30 = vpack.c.bf16 %v5969_v41, %v5966_v40 }
  0xc1   : > { %v1196_v44 = vrot.slane %v5225_v59, %v5857_v36  ;;  %v1210_v45 = vrot.slane %v5227_v23, %v5857_v36  ;;  %v5230_v28 = vpack.c.bf16 %v5975_v43, %v5972_v42  ;;  %v5232_v31 = vpack.c.bf16 %v5994_v11, %v5987_v47 }
  0xc2   : > { %v1224_v32 = vrot.slane %v5229_v25, %v5857_v36  ;;  %v1238_v33 = vrot.slane %v5231_v26, %v5857_v36  ;;  %v1203_v34 = vrot.slane %v5226_v27, %v5857_v36  ;;  %v1217_v37 = vrot.slane %v5228_v30, %v5857_v36 }
  0xc3   : > { %v1246_v60 = vcombine.low %v1196_v44, %v1210_v45  ;;  %v1247_v0 = vcombine.high %v1196_v44, %v1210_v45  ;;  %v1231_v38 = vrot.slane %v5230_v28, %v5857_v36  ;;  %v1245_v39 = vrot.slane %v5232_v31, %v5857_v36 }
  0xc4   : > { %v1250_v40 = vcombine.low %v1224_v32, %v1238_v33  ;;  %v1251_v41 = vcombine.high %v1224_v32, %v1238_v33  ;;  %v1248_v42 = vcombine.low %v1203_v34, %v1217_v37  ;;  %v1249_v43 = vcombine.high %v1203_v34, %v1217_v37 }
  0xc5   : > { %v1260_v47 = vrot.slane %v1246_v60, %v5857_v36  ;;  %v1274_v11 = vrot.slane %v1247_v0, %v5857_v36  ;;  %v1252_v48 = vcombine.low %v1231_v38, %v1245_v39  ;;  %v1253_v49 = vcombine.high %v1231_v38, %v1245_v39 }
  0xc6   : > { %v1288_v50 = vrot.slane %v1250_v40, %v5857_v36  ;;  %v1302_v54 = vrot.slane %v1251_v41, %v5857_v36  ;;  %v1267_v9 = vrot.slane %v1248_v42, %v5857_v36  ;;  %v1281_v13 = vrot.slane %v1249_v43, %v5857_v36 }
  0xc7   : > { %v6097_v19 = vpack.c.bf16 %v1120_v3, %v1104_v63  ;;  %v6099_v53 = vpack.c.bf16 %v1121_v56, %v1105_v1  ;;  %v1295_v51 = vrot.slane %v1252_v48, %v5857_v36  ;;  %v1309_v61 = vrot.slane %v1253_v49, %v5857_v36 }
  0xc8   : > { %v1310_v24 = vcombine.low %v1260_v47, %v1288_v50  ;;  %v6103_v29 = vcombine.low %v1274_v11, %v1302_v54  ;;  %v6105_v46 = vcombine.high %v1260_v47, %v1288_v50  ;;  %v6107_v4 = vcombine.high %v1274_v11, %v1302_v54 }
  0xc9   : > { %v6109_v57 = vcombine.low %v1267_v9, %v1295_v51  ;;  %v6111_v58 = vcombine.low %v1281_v13, %v1309_v61  ;;  %v257_v62 = vrot.slane %v6095_v12, %v5805_v5  ;;  %v261_v52 = vrot.slane %v6095_v12, %v5807_v6 }
  0xca   : > { %v1456_v63 = vunpack.i.h.s16 %v1310_v24  ;;  %v6117_v1 = vpack.i.b16 %v1310_v24, %v1310_v24  ;;  %v6121_v2 = vpack.i.b16 %v6103_v29, %v6103_v29  ;;  %v6123_v8 = vcombine.high %v1267_v9, %v1295_v51 }
  0xcb   : > { %v1460_v3 = vunpack.i.h.s16 %v6103_v29  ;;  %v6128_v56 = vpack.i.b16 %v6105_v46, %v6105_v46  ;;  %v6132_v17 = vpack.i.b16 %v6107_v4, %v6107_v4  ;;  %v6134_v10 = vcombine.high %v1281_v13, %v1309_v61 }
  0xcc   : > { %v1525_v59 = vrot.slane %v6117_v1, %v5823_v14  ;;  %v1533_v23 = vrot.slane %v6117_v1, %v5825_v15  ;;  %v1521_v25 = vrot.slane %v6117_v1, %v5805_v5  ;;  %v1529_v26 = vrot.slane %v6117_v1, %v5807_v6 }
  0xcd   : > { %v6144_v27 = vpack.i.b16 %v1456_v63, %v1456_v63  ;;  %v1653_v30 = vrot.slane %v6121_v2, %v5823_v14  ;;  %v1661_v44 = vrot.slane %v6121_v2, %v5825_v15  ;;  %v1649_v45 = vrot.slane %v6121_v2, %v5805_v5 }
  0xce   : > { %v2550_v28 = vpack.i.b16 %v1525_v59, %v1525_v59  ;;  %v2564_v31 = vpack.i.b16 %v1533_v23, %v1533_v23  ;;  %v2543_v32 = vpack.i.b16 %v1521_v25, %v1521_v25  ;;  %v2557_v33 = vpack.i.b16 %v1529_v26, %v1529_v26 }
  0xcf   : > { %v1589_v34 = vrot.slane %v6144_v27, %v5823_v14  ;;  %v1597_v37 = vrot.slane %v6144_v27, %v5825_v15  ;;  %v1585_v60 = vrot.slane %v6144_v27, %v5805_v5  ;;  %v1593_v0 = vrot.slane %v6144_v27, %v5807_v6 }
  0xd0   : > { %v2555_v38 = vrot.slane %v2550_v28, %v5805_v5  ;;  %v2569_v39 = vrot.slane %v2564_v31, %v5805_v5  ;;  %v2548_v40 = vrot.slane %v2543_v32, %v5805_v5  ;;  %v2562_v41 = vrot.slane %v2557_v33, %v5805_v5 }
  0xd1   : > { %v2662_v42 = vpack.i.b16 %v1589_v34, %v1589_v34  ;;  %v2676_v43 = vpack.i.b16 %v1597_v37, %v1597_v37  ;;  %v2655_v47 = vpack.i.b16 %v1585_v60, %v1585_v60  ;;  %v2669_v11 = vpack.i.b16 %v1593_v0, %v1593_v0 }
  0xd2   : > { %v4335_v48 = vmul.bf16 %v2555_v38, %v6054_v20  ;;  %v4337_v49 = vmul.bf16 %v2569_v39, %v6099_v53  ;;  %v4334_v50 = vmul.bf16 %v2548_v40, %v6052_v18  ;;  %v4336_v54 = vmul.bf16 %v2562_v41, %v6097_v19 }
  0xd3   : > { %v2667_v9 = vrot.slane %v2662_v42, %v5805_v5  ;;  %v2681_v13 = vrot.slane %v2676_v43, %v5805_v5  ;;  %v2660_v51 = vrot.slane %v2655_v47, %v5805_v5  ;;  %v2674_v61 = vrot.slane %v2669_v11, %v5805_v5 }
  0xd4   : > { %4614 = vmatprep.subr.bf16.mxu0 %v4335_v48  ;;  %4667 = vmatprep.subr.bf16.mxu1 %v4337_v49  ;;  %v2774_v24 = vpack.i.b16 %v1653_v30, %v1653_v30  ;;  %v2788_v29 = vpack.i.b16 %v1661_v44, %v1661_v44  ;;  %v2767_v63 = vpack.i.b16 %v1649_v45, %v1649_v45  ;;  %v1464_v42 = vunpack.i.h.s16 %v6105_v46 }
  0xd5   : > { %4615 = vmatpush1.bf16.msra.mxu0 %v4334_v50  ;;  %4668 = vmatpush1.bf16.msra.mxu1 %v4336_v54  ;;  %v4351_v59 = vmul.bf16 %v2667_v9, %v6054_v20  ;;  %v4353_v23 = vmul.bf16 %v2681_v13, %v6099_v53  ;;  %v4350_v25 = vmul.bf16 %v2660_v51, %v6052_v18 }
  0xd6   : > { %v4352_v26 = vmul.bf16 %v2674_v61, %v6097_v19  ;;  %v2779_v28 = vrot.slane %v2774_v24, %v5805_v5  ;;  %v2793_v31 = vrot.slane %v2788_v29, %v5805_v5  ;;  %v2772_v32 = vrot.slane %v2767_v63, %v5805_v5 }
  0xd7   : > { %4616 = vmatprep.subr.bf16.mxu0 %v4351_v59  ;;  %4669 = vmatprep.subr.bf16.mxu1 %v4353_v23  ;;  %v1657_v30 = vrot.slane %v6121_v2, %v5807_v6  ;;  %v6181_v44 = vpack.i.b16 %v1460_v3, %v1460_v3  ;;  %v1781_v45 = vrot.slane %v6128_v56, %v5823_v14 }
  0xd8   : > { %v4367_v33 = vmul.bf16 %v2779_v28, %v6054_v20  ;;  %v4369_v34 = vmul.bf16 %v2793_v31, %v6099_v53  ;;  %v4366_v37 = vmul.bf16 %v2772_v32, %v6052_v18  ;;  %v1789_v60 = vrot.slane %v6128_v56, %v5825_v15 }
  0xd9   : > { %4617 = vmatpush1.bf16.msra.mxu0 %v4350_v25  ;;  %4670 = vmatpush1.bf16.msra.mxu1 %v4352_v26  ;;  %v2781_v0 = vpack.i.b16 %v1657_v30, %v1657_v30  ;;  %v1717_v38 = vrot.slane %v6181_v44, %v5823_v14  ;;  %v1725_v3 = vrot.slane %v6181_v44, %v5825_v15 }
  0xda   : > { %4618 = vmatprep.subr.bf16.mxu0 %v4367_v33  ;;  %4671 = vmatprep.subr.bf16.mxu1 %v4369_v34  ;;  %v1713_v39 = vrot.slane %v6181_v44, %v5805_v5  ;;  %v1721_v40 = vrot.slane %v6181_v44, %v5807_v6  ;;  %v2998_v41 = vpack.i.b16 %v1781_v45, %v1781_v45 }
  0xdb   : > { %v2786_v43 = vrot.slane %v2781_v0, %v5805_v5  ;;  %v2886_v47 = vpack.i.b16 %v1717_v38, %v1717_v38  ;;  %v2900_v11 = vpack.i.b16 %v1725_v3, %v1725_v3  ;;  %v3012_v48 = vpack.i.b16 %v1789_v60, %v1789_v60 }
  0xdc   : > { %v2879_v49 = vpack.i.b16 %v1713_v39, %v1713_v39  ;;  %v2893_v50 = vpack.i.b16 %v1721_v40, %v1721_v40  ;;  %v3003_v54 = vrot.slane %v2998_v41, %v5805_v5  ;;  %v1777_v9 = vrot.slane %v6128_v56, %v5805_v5 }
  0xdd   : > { %4619 = vmatpush1.bf16.msra.mxu0 %v4366_v37  ;;  %v4368_v13 = vmul.bf16 %v2786_v43, %v6097_v19  ;;  %v2891_v51 = vrot.slane %v2886_v47, %v5805_v5  ;;  %v2905_v61 = vrot.slane %v2900_v11, %v5805_v5  ;;  %v3017_v46 = vrot.slane %v3012_v48, %v5805_v5 }
  0xde   : > { %v2884_v24 = vrot.slane %v2879_v49, %v5805_v5  ;;  %v2898_v29 = vrot.slane %v2893_v50, %v5805_v5  ;;  %v4399_v63 = vmul.bf16 %v3003_v54, %v6054_v20  ;;  %v2991_v59 = vpack.i.b16 %v1777_v9, %v1777_v9 }
  0xdf   : > { %4672 = vmatpush1.bf16.msra.mxu1 %v4368_v13  ;;  %v4383_v23 = vmul.bf16 %v2891_v51, %v6054_v20  ;;  %v4385_v25 = vmul.bf16 %v2905_v61, %v6099_v53  ;;  %v4401_v26 = vmul.bf16 %v3017_v46, %v6099_v53  ;;  %v1785_v28 = vrot.slane %v6128_v56, %v5807_v6 }
  0xe0   : > { %v4382_v31 = vmul.bf16 %v2884_v24, %v6052_v18  ;;  %v4384_v32 = vmul.bf16 %v2898_v29, %v6097_v19  ;;  %v2996_v30 = vrot.slane %v2991_v59, %v5805_v5  ;;  %v6218_v45 = vpack.i.b16 %v1464_v42, %v1464_v42 }
  0xe1   : > { %4620 = vmatprep.subr.bf16.mxu0 %v4383_v23  ;;  %4673 = vmatprep.subr.bf16.mxu1 %v4385_v25  ;;  %v3005_v33 = vpack.i.b16 %v1785_v28, %v1785_v28  ;;  %v1909_v34 = vrot.slane %v6132_v17, %v5823_v14  ;;  %v1917_v37 = vrot.slane %v6132_v17, %v5825_v15  ;;  %v1468_v60 = vunpack.i.h.s16 %v6107_v4 }
  0xe2   : > { %4621 = vmatpush1.bf16.msra.mxu0 %v4382_v31  ;;  %v4398_v0 = vmul.bf16 %v2996_v30, %v6052_v18  ;;  %v1845_v38 = vrot.slane %v6218_v45, %v5823_v14  ;;  %v1853_v3 = vrot.slane %v6218_v45, %v5825_v15  ;;  %v1841_v39 = vrot.slane %v6218_v45, %v5805_v5 }
  0xe3   : > { %4674 = vmatpush1.bf16.msra.mxu1 %v4384_v32  ;;  %4622 = vmatprep.subr.bf16.mxu0 %v4399_v63  ;;  %v3010_v40 = vrot.slane %v3005_v33, %v5805_v5  ;;  %v1849_v41 = vrot.slane %v6218_v45, %v5807_v6  ;;  %v3222_v4 = vpack.i.b16 %v1909_v34, %v1909_v34  ;;  %v1472_v42 = vunpack.i.h.s16 %v6109_v57 }
  0xe4   : > { %4675 = vmatprep.subr.bf16.mxu1 %v4401_v26  ;;  %v3110_v43 = vpack.i.b16 %v1845_v38, %v1845_v38  ;;  %v3124_v47 = vpack.i.b16 %v1853_v3, %v1853_v3  ;;  %v3103_v11 = vpack.i.b16 %v1841_v39, %v1841_v39  ;;  %v3236_v48 = vpack.i.b16 %v1917_v37, %v1917_v37 }
  0xe5   : > { %v4400_v49 = vmul.bf16 %v3010_v40, %v6097_v19  ;;  %v3117_v50 = vpack.i.b16 %v1849_v41, %v1849_v41  ;;  %v3227_v54 = vrot.slane %v3222_v4, %v5805_v5  ;;  %v1905_v9 = vrot.slane %v6132_v17, %v5805_v5 }
  0xe6   : > { %4623 = vmatpush1.bf16.msra.mxu0 %v4398_v0  ;;  %v3115_v13 = vrot.slane %v3110_v43, %v5805_v5  ;;  %v3129_v51 = vrot.slane %v3124_v47, %v5805_v5  ;;  %v3108_v61 = vrot.slane %v3103_v11, %v5805_v5  ;;  %v3241_v46 = vrot.slane %v3236_v48, %v5805_v5 }
  0xe7   : > { %4676 = vmatpush1.bf16.msra.mxu1 %v4400_v49  ;;  %v3122_v24 = vrot.slane %v3117_v50, %v5805_v5  ;;  %v4431_v29 = vmul.bf16 %v3227_v54, %v6054_v20  ;;  %v3215_v63 = vpack.i.b16 %v1905_v9, %v1905_v9  ;;  %v1913_v59 = vrot.slane %v6132_v17, %v5807_v6 }
  0xe8   : > { %v4415_v23 = vmul.bf16 %v3115_v13, %v6054_v20  ;;  %v4417_v25 = vmul.bf16 %v3129_v51, %v6099_v53  ;;  %v4414_v26 = vmul.bf16 %v3108_v61, %v6052_v18  ;;  %v4433_v28 = vmul.bf16 %v3241_v46, %v6099_v53 }
  0xe9   : > { %v4416_v31 = vmul.bf16 %v3122_v24, %v6097_v19  ;;  %v3220_v32 = vrot.slane %v3215_v63, %v5805_v5  ;;  %v3229_v30 = vpack.i.b16 %v1913_v59, %v1913_v59  ;;  %v6254_v33 = vpack.i.b16 %v1468_v60, %v1468_v60 }
  0xea   : > { %4624 = vmatprep.subr.bf16.mxu0 %v4415_v23  ;;  %4677 = vmatprep.subr.bf16.mxu1 %v4417_v25  ;;  %v6258_v34 = vpack.i.b16 %v6109_v57, %v6109_v57  ;;  %v6260_v37 = vpack.i.b16 %v1472_v42, %v1472_v42  ;;  %v6264_v0 = vpack.i.b16 %v6111_v58, %v6111_v58 }
  0xeb   : > { %4625 = vmatpush1.bf16.msra.mxu0 %v4414_v26  ;;  %4678 = vmatpush1.bf16.msra.mxu1 %v4416_v31  ;;  %v4430_v38 = vmul.bf16 %v3220_v32, %v6052_v18  ;;  %v3234_v3 = vrot.slane %v3229_v30, %v5805_v5  ;;  %v1973_v60 = vrot.slane %v6254_v33, %v5823_v14 }
  0xec   : > { %4626 = vmatprep.subr.bf16.mxu0 %v4431_v29  ;;  %4679 = vmatprep.subr.bf16.mxu1 %v4433_v28  ;;  %v1981_v57 = vrot.slane %v6254_v33, %v5825_v15  ;;  %v1969_v39 = vrot.slane %v6254_v33, %v5805_v5  ;;  %v1977_v40 = vrot.slane %v6254_v33, %v5807_v6 }
  0xed   : > { %v4432_v41 = vmul.bf16 %v3234_v3, %v6097_v19  ;;  %v3334_v4 = vpack.i.b16 %v1973_v60, %v1973_v60  ;;  %v2037_v42 = vrot.slane %v6258_v34, %v5823_v14  ;;  %v2045_v43 = vrot.slane %v6258_v34, %v5825_v15 }
  0xee   : > { %v3348_v47 = vpack.i.b16 %v1981_v57, %v1981_v57  ;;  %v3327_v11 = vpack.i.b16 %v1969_v39, %v1969_v39  ;;  %v3341_v48 = vpack.i.b16 %v1977_v40, %v1977_v40  ;;  %v2033_v49 = vrot.slane %v6258_v34, %v5805_v5 }
  0xef   : > { %4627 = vmatpush1.bf16.msra.mxu0 %v4430_v38  ;;  %4680 = vmatpush1.bf16.msra.mxu1 %v4432_v41  ;;  %v3339_v50 = vrot.slane %v3334_v4, %v5805_v5  ;;  %v3446_v54 = vpack.i.b16 %v2037_v42, %v2037_v42  ;;  %v3460_v9 = vpack.i.b16 %v2045_v43, %v2045_v43  ;;  %v1476_v4 = vunpack.i.h.s16 %v6111_v58 }
  0xf0   : > { %v3353_v13 = vrot.slane %v3348_v47, %v5805_v5  ;;  %v3332_v51 = vrot.slane %v3327_v11, %v5805_v5  ;;  %v3346_v61 = vrot.slane %v3341_v48, %v5805_v5  ;;  %v3439_v46 = vpack.i.b16 %v2033_v49, %v2033_v49 }
  0xf1   : > { %v4447_v24 = vmul.bf16 %v3339_v50, %v6054_v20  ;;  %v3451_v29 = vrot.slane %v3446_v54, %v5805_v5  ;;  %v3465_v63 = vrot.slane %v3460_v9, %v5805_v5  ;;  %v2041_v59 = vrot.slane %v6258_v34, %v5807_v6 }
  0xf2   : > { %v4449_v23 = vmul.bf16 %v3353_v13, %v6099_v53  ;;  %v4446_v25 = vmul.bf16 %v3332_v51, %v6052_v18  ;;  %v4448_v26 = vmul.bf16 %v3346_v61, %v6097_v19  ;;  %v3444_v28 = vrot.slane %v3439_v46, %v5805_v5 }
  0xf3   : > { %4628 = vmatprep.subr.bf16.mxu0 %v4447_v24  ;;  %v4463_v31 = vmul.bf16 %v3451_v29, %v6054_v20  ;;  %v4465_v32 = vmul.bf16 %v3465_v63, %v6099_v53  ;;  %v3453_v30 = vpack.i.b16 %v2041_v59, %v2041_v59  ;;  %v2101_v38 = vrot.slane %v6260_v37, %v5823_v14 }
  0xf4   : > { %4681 = vmatprep.subr.bf16.mxu1 %v4449_v23  ;;  %4629 = vmatpush1.bf16.msra.mxu0 %v4446_v25  ;;  %v4462_v3 = vmul.bf16 %v3444_v28, %v6052_v18  ;;  %v2109_v60 = vrot.slane %v6260_v37, %v5825_v15  ;;  %v2097_v57 = vrot.slane %v6260_v37, %v5805_v5 }
  0xf5   : > { %4682 = vmatpush1.bf16.msra.mxu1 %v4448_v26  ;;  %4630 = vmatprep.subr.bf16.mxu0 %v4463_v31  ;;  %v3458_v39 = vrot.slane %v3453_v30, %v5805_v5  ;;  %v3558_v40 = vpack.i.b16 %v2101_v38, %v2101_v38  ;;  %v2105_v41 = vrot.slane %v6260_v37, %v5807_v6 }
  0xf6   : > { %4683 = vmatprep.subr.bf16.mxu1 %v4465_v32  ;;  %v3572_v42 = vpack.i.b16 %v2109_v60, %v2109_v60  ;;  %v3551_v43 = vpack.i.b16 %v2097_v57, %v2097_v57  ;;  %v2165_v47 = vrot.slane %v6264_v0, %v5823_v14  ;;  %v2173_v11 = vrot.slane %v6264_v0, %v5825_v15 }
  0xf7   : > { %v4464_v48 = vmul.bf16 %v3458_v39, %v6097_v19  ;;  %v3563_v49 = vrot.slane %v3558_v40, %v5805_v5  ;;  %v3565_v50 = vpack.i.b16 %v2105_v41, %v2105_v41  ;;  %v2161_v54 = vrot.slane %v6264_v0, %v5805_v5 }
  0xf8   : > { %4631 = vmatpush1.bf16.msra.mxu0 %v4462_v3  ;;  %v3577_v58 = vrot.slane %v3572_v42, %v5805_v5  ;;  %v3556_v9 = vrot.slane %v3551_v43, %v5805_v5  ;;  %v3670_v13 = vpack.i.b16 %v2165_v47, %v2165_v47  ;;  %v3684_v51 = vpack.i.b16 %v2173_v11, %v2173_v11 }
  0xf9   : > { %4684 = vmatpush1.bf16.msra.mxu1 %v4464_v48  ;;  %v4479_v61 = vmul.bf16 %v3563_v49, %v6054_v20  ;;  %v3570_v46 = vrot.slane %v3565_v50, %v5805_v5  ;;  %v3663_v24 = vpack.i.b16 %v2161_v54, %v2161_v54  ;;  %v2169_v29 = vrot.slane %v6264_v0, %v5807_v6 }
  0xfa   : > { %v4481_v63 = vmul.bf16 %v3577_v58, %v6099_v53  ;;  %v4478_v59 = vmul.bf16 %v3556_v9, %v6052_v18  ;;  %v3675_v23 = vrot.slane %v3670_v13, %v5805_v5  ;;  %v3689_v25 = vrot.slane %v3684_v51, %v5805_v5 }
  0xfb   : > { %4632 = vmatprep.subr.bf16.mxu0 %v4479_v61  ;;  %v4480_v26 = vmul.bf16 %v3570_v46, %v6097_v19  ;;  %v3668_v28 = vrot.slane %v3663_v24, %v5805_v5  ;;  %v3677_v31 = vpack.i.b16 %v2169_v29, %v2169_v29  ;;  %v6329_v32 = vpack.i.b16 %v1476_v4, %v1476_v4 }
  0xfc   : > { %4685 = vmatprep.subr.bf16.mxu1 %v4481_v63  ;;  %4633 = vmatpush1.bf16.msra.mxu0 %v4478_v59  ;;  %v4495_v30 = vmul.bf16 %v3675_v23, %v6054_v20  ;;  %v4497_v38 = vmul.bf16 %v3689_v25, %v6099_v53  ;;  %v6335_v3 = vpack.i.b16 %v6123_v8, %v6123_v8  ;;  %v1480_v60 = vunpack.i.h.s16 %v6123_v8 }
  0xfd   : > { %4686 = vmatpush1.bf16.msra.mxu1 %v4480_v26  ;;  %v4494_v57 = vmul.bf16 %v3668_v28, %v6052_v18  ;;  %v3682_v39 = vrot.slane %v3677_v31, %v5805_v5  ;;  %v2229_v40 = vrot.slane %v6329_v32, %v5823_v14  ;;  %v2237_v41 = vrot.slane %v6329_v32, %v5825_v15 }
  0xfe   : > { %4634 = vmatprep.subr.bf16.mxu0 %v4495_v30  ;;  %4687 = vmatprep.subr.bf16.mxu1 %v4497_v38  ;;  %v2225_v4 = vrot.slane %v6329_v32, %v5805_v5  ;;  %v2233_v42 = vrot.slane %v6329_v32, %v5807_v6  ;;  %v2293_v8 = vrot.slane %v6335_v3, %v5823_v14  ;;  %v1484_v43 = vunpack.i.h.s16 %v6134_v10 }
  0xff   : > { %v4496_v47 = vmul.bf16 %v3682_v39, %v6097_v19  ;;  %v3782_v11 = vpack.i.b16 %v2229_v40, %v2229_v40  ;;  %v3796_v48 = vpack.i.b16 %v2237_v41, %v2237_v41  ;;  %v2301_v49 = vrot.slane %v6335_v3, %v5825_v15 }
 0x100   : > { %4635 = vmatpush1.bf16.msra.mxu0 %v4494_v57  ;;  %v3775_v50 = vpack.i.b16 %v2225_v4, %v2225_v4  ;;  %v3789_v54 = vpack.i.b16 %v2233_v42, %v2233_v42  ;;  %v3894_v58 = vpack.i.b16 %v2293_v8, %v2293_v8  ;;  %v2289_v9 = vrot.slane %v6335_v3, %v5805_v5 }
 0x101   : > { %4688 = vmatpush1.bf16.msra.mxu1 %v4496_v47  ;;  %v3787_v13 = vrot.slane %v3782_v11, %v5805_v5  ;;  %v3801_v51 = vrot.slane %v3796_v48, %v5805_v5  ;;  %v3908_v61 = vpack.i.b16 %v2301_v49, %v2301_v49  ;;  %v2297_v46 = vrot.slane %v6335_v3, %v5807_v6 }
 0x102   : > { %v3780_v24 = vrot.slane %v3775_v50, %v5805_v5  ;;  %v3794_v29 = vrot.slane %v3789_v54, %v5805_v5  ;;  %v3899_v63 = vrot.slane %v3894_v58, %v5805_v5  ;;  %v3887_v59 = vpack.i.b16 %v2289_v9, %v2289_v9 }
 0x103   : > { %v4511_v23 = vmul.bf16 %v3787_v13, %v6054_v20  ;;  %v4513_v25 = vmul.bf16 %v3801_v51, %v6099_v53  ;;  %v3913_v26 = vrot.slane %v3908_v61, %v5805_v5  ;;  %v3901_v28 = vpack.i.b16 %v2297_v46, %v2297_v46 }
 0x104   : > { %v4510_v31 = vmul.bf16 %v3780_v24, %v6052_v18  ;;  %v4512_v30 = vmul.bf16 %v3794_v29, %v6097_v19  ;;  %v4527_v38 = vmul.bf16 %v3899_v63, %v6054_v20  ;;  %v3892_v57 = vrot.slane %v3887_v59, %v5805_v5 }
 0x105   : > { %4636 = vmatprep.subr.bf16.mxu0 %v4511_v23  ;;  %4689 = vmatprep.subr.bf16.mxu1 %v4513_v25  ;;  %v4529_v39 = vmul.bf16 %v3913_v26, %v6099_v53  ;;  %v3906_v40 = vrot.slane %v3901_v28, %v5805_v5  ;;  %v6372_v41 = vpack.i.b16 %v1480_v60, %v1480_v60 }
 0x106   : > { %4637 = vmatpush1.bf16.msra.mxu0 %v4510_v31  ;;  %4690 = vmatpush1.bf16.msra.mxu1 %v4512_v30  ;;  %v4526_v4 = vmul.bf16 %v3892_v57, %v6052_v18  ;;  %v6377_v42 = vpack.i.b16 %v6134_v10, %v6134_v10  ;;  %v6379_v8 = vpack.i.b16 %v1484_v43, %v1484_v43 }
 0x107   : > { %4638 = vmatprep.subr.bf16.mxu0 %v4527_v38  ;;  %4691 = vmatprep.subr.bf16.mxu1 %v4529_v39  ;;  %v4528_v47 = vmul.bf16 %v3906_v40, %v6097_v19  ;;  %v2357_v11 = vrot.slane %v6372_v41, %v5823_v14  ;;  %v2365_v60 = vrot.slane %v6372_v41, %v5825_v15 }
 0x108   : > { %v2353_v48 = vrot.slane %v6372_v41, %v5805_v5  ;;  %v2361_v49 = vrot.slane %v6372_v41, %v5807_v6  ;;  %v2421_v10 = vrot.slane %v6377_v42, %v5823_v14  ;;  %v2429_v43 = vrot.slane %v6377_v42, %v5825_v15 }
 0x109   : > { %v4006_v50 = vpack.i.b16 %v2357_v11, %v2357_v11  ;;  %v4020_v54 = vpack.i.b16 %v2365_v60, %v2365_v60  ;;  %v2417_v58 = vrot.slane %v6377_v42, %v5805_v5  ;;  %v2425_v9 = vrot.slane %v6377_v42, %v5807_v6 }
 0x10a   : > { %4639 = vmatpush1.bf16.msra.mxu0 %v4526_v4  ;;  %4692 = vmatpush1.bf16.msra.mxu1 %v4528_v47  ;;  %v3999_v13 = vpack.i.b16 %v2353_v48, %v2353_v48  ;;  %v4013_v51 = vpack.i.b16 %v2361_v49, %v2361_v49  ;;  %v4118_v61 = vpack.i.b16 %v2421_v10, %v2421_v10 }
 0x10b   : > { %v4011_v46 = vrot.slane %v4006_v50, %v5805_v5  ;;  %v4025_v24 = vrot.slane %v4020_v54, %v5805_v5  ;;  %v4132_v29 = vpack.i.b16 %v2429_v43, %v2429_v43  ;;  %v4111_v63 = vpack.i.b16 %v2417_v58, %v2417_v58 }
 0x10c   : > { %v4004_v59 = vrot.slane %v3999_v13, %v5805_v5  ;;  %v4018_v23 = vrot.slane %v4013_v51, %v5805_v5  ;;  %v4123_v25 = vrot.slane %v4118_v61, %v5805_v5  ;;  %v4125_v26 = vpack.i.b16 %v2425_v9, %v2425_v9  ;;  %v7918_v51 = vld [vmem:[#allocation17_spill] sm:$0xff] }
 0x10d   : > { %v4543_v28 = vmul.bf16 %v4011_v46, %v6054_v20  ;;  %v4545_v31 = vmul.bf16 %v4025_v24, %v6099_v53  ;;  %v4137_v30 = vrot.slane %v4132_v29, %v5805_v5  ;;  %v4116_v38 = vrot.slane %v4111_v63, %v5805_v5  ;;  %v7919_v63 = vld [vmem:[#allocation18_spill] sm:$0xff] }
 0x10e   : > { %v4542_v57 = vmul.bf16 %v4004_v59, %v6052_v18  ;;  %v4544_v39 = vmul.bf16 %v4018_v23, %v6097_v19  ;;  %v4559_v40 = vmul.bf16 %v4123_v25, %v6054_v20  ;;  %v4130_v4 = vrot.slane %v4125_v26, %v5805_v5 }
 0x10f   : > { %4640 = vmatprep.subr.bf16.mxu0 %v4543_v28  ;;  %4693 = vmatprep.subr.bf16.mxu1 %v4545_v31  ;;  %v4561_v47 = vmul.bf16 %v4137_v30, %v6099_v53  ;;  %v4558_v11 = vmul.bf16 %v4116_v38, %v6052_v18  ;;  %v2485_v60 = vrot.slane %v6379_v8, %v5823_v14 }
 0x110   : > { %4641 = vmatpush1.bf16.msra.mxu0 %v4542_v57  ;;  %4694 = vmatpush1.bf16.msra.mxu1 %v4544_v39  ;;  %v4560_v48 = vmul.bf16 %v4130_v4, %v6097_v19  ;;  %v2493_v49 = vrot.slane %v6379_v8, %v5825_v15  ;;  %v2481_v10 = vrot.slane %v6379_v8, %v5805_v5 }
 0x111   : > { %4642 = vmatprep.subr.bf16.mxu0 %v4559_v40  ;;  %4695 = vmatprep.subr.bf16.mxu1 %v4561_v47  ;;  %v4230_v43 = vpack.i.b16 %v2485_v60, %v2485_v60  ;;  %v2489_v50 = vrot.slane %v6379_v8, %v5807_v6  ;;  %v1541_v54 = vrot.slane %v6117_v1, %v5827_v16  ;;  %v6441_v47 = vld [vmem:[%s5799_s18] ss:$8 sps:$4 sm:$0xff]  }
 0x112   : > { %v4244_v58 = vpack.i.b16 %v2493_v49, %v2493_v49  ;;  %v4223_v9 = vpack.i.b16 %v2481_v10, %v2481_v10  ;;  %v1549_v13 = vrot.slane %v6117_v1, %v5855_v35  ;;  %v1537_v61 = vrot.slane %v6117_v1, %v7918_v51 }
 0x113   : > { %v4235_v46 = vrot.slane %v4230_v43, %v5805_v5  ;;  %v4237_v24 = vpack.i.b16 %v2489_v50, %v2489_v50  ;;  %v2578_v29 = vpack.i.b16 %v1541_v54, %v1541_v54  ;;  %v1545_v59 = vrot.slane %v6117_v1, %v7919_v63 }
 0x114   : > { %4643 = vmatpush1.bf16.msra.mxu0 %v4558_v11  ;;  %4696 = vmatpush1.bf16.msra.mxu1 %v4560_v48  ;;  %v4249_v23 = vrot.slane %v4244_v58, %v5805_v5  ;;  %v4228_v25 = vrot.slane %v4223_v9, %v5805_v5  ;;  %v2592_v26 = vpack.i.b16 %v1549_v13, %v1549_v13  ;;  %v6460_v9 = vld [vmem:[%s5799_s18 + $0x14] ss:$8 sps:$4 sm:$0xff]  }
 0x115   : > { %v4575_v28 = vmul.bf16 %v4235_v46, %v6054_v20  ;;  %v4242_v31 = vrot.slane %v4237_v24, %v5805_v5  ;;  %v2583_v30 = vrot.slane %v2578_v29, %v5805_v5  ;;  %v2571_v38 = vpack.i.b16 %v1537_v61, %v1537_v61 }
 0x116   : > { %v4577_v57 = vmul.bf16 %v4249_v23, %v6099_v53  ;;  %v4574_v39 = vmul.bf16 %v4228_v25, %v6052_v18  ;;  %v2597_v1 = vrot.slane %v2592_v26, %v5805_v5  ;;  %v2585_v40 = vpack.i.b16 %v1545_v59, %v1545_v59 }
 0x117   : > { %4644 = vmatprep.subr.bf16.mxu0 %v4575_v28  ;;  %v4576_v4 = vmul.bf16 %v4242_v31, %v6097_v19  ;;  %v4339_v11 = vmul.bf16 %v2583_v30, %v6058_v7  ;;  %v2576_v20 = vrot.slane %v2571_v38, %v5805_v5  ;;  %v1605_v60 = vrot.slane %v6144_v27, %v5827_v16 }
 0x118   : > { %4697 = vmatprep.subr.bf16.mxu1 %v4577_v57  ;;  %4645 = vmatpush1.bf16.msra.mxu0 %v4574_v39  ;;  %v4341_v18 = vmul.bf16 %v2597_v1, %v6062_v22  ;;  %v2590_v53 = vrot.slane %v2585_v40, %v5805_v5  ;;  %v1613_v48 = vrot.slane %v6144_v27, %v5855_v35 }
 0x119   : > { %4698 = vmatpush1.bf16.msra.mxu1 %v4576_v4  ;;  %4720 = vmatprep.subr.bf16.mxu0 %v4339_v11  ;;  %v4338_v19 = vmul.bf16 %v2576_v20, %v6056_v21  ;;  %v2690_v49 = vpack.i.b16 %v1605_v60, %v1605_v60  ;;  %v1601_v10 = vrot.slane %v6144_v27, %v7918_v51 }
 0x11a   : > { %4773 = vmatprep.subr.bf16.mxu1 %v4341_v18  ;;  %v4340_v43 = vmul.bf16 %v2590_v53, %v6060_v55  ;;  %v2704_v50 = vpack.i.b16 %v1613_v48, %v1613_v48  ;;  %v1609_v54 = vrot.slane %v6144_v27, %v7919_v63  ;;  %v1669_v58 = vrot.slane %v6121_v2, %v5827_v16 }
 0x11b   : > { %4647 = vmatmul.mubr.bf16.vlgmr.msra.gmra.mrb[0].mxu0 %v6441_v47  ;;  %v2695_v13 = vrot.slane %v2690_v49, %v5805_v5  ;;  %v2683_v61 = vpack.i.b16 %v1601_v10, %v1601_v10  ;;  %v1677_v46 = vrot.slane %v6121_v2, %v5855_v35  ;;  %v1665_v24 = vrot.slane %v6121_v2, %v7918_v51 }
 0x11c   : > { %4700 = vmatmul.mubr.bf16.vlgmr.msra.gmra.mrb[0].mxu1 %v6441_v47  ;;  %4721 = vmatpush1.bf16.msra.mxu0 %v4338_v19  ;;  %v2709_v27 = vrot.slane %v2704_v50, %v5805_v5  ;;  %v2697_v29 = vpack.i.b16 %v1609_v54, %v1609_v54  ;;  %v2802_v59 = vpack.i.b16 %v1669_v58, %v1669_v58 }
 0x11d   : > { %4774 = vmatpush1.bf16.msra.mxu1 %v4340_v43  ;;  %v4355_v23 = vmul.bf16 %v2695_v13, %v6058_v7  ;;  %v2688_v25 = vrot.slane %v2683_v61, %v5805_v5  ;;  %v2816_v26 = vpack.i.b16 %v1677_v46, %v1677_v46  ;;  %v2795_v28 = vpack.i.b16 %v1665_v24, %v1665_v24 }
 0x11e   : > { %v4357_v31 = vmul.bf16 %v2709_v27, %v6062_v22  ;;  %v2702_v30 = vrot.slane %v2697_v29, %v5805_v5  ;;  %v2807_v38 = vrot.slane %v2802_v59, %v5805_v5  ;;  %v1673_v57 = vrot.slane %v6121_v2, %v7919_v63  ;;  %4656 = vmatprep.mubr.bf16.mxu0 %v6460_v9 }
 0x11f   : > { %4722 = vmatprep.subr.bf16.mxu0 %v4355_v23  ;;  %v4354_v39 = vmul.bf16 %v2688_v25, %v6056_v21  ;;  %v2821_v1 = vrot.slane %v2816_v26, %v5805_v5  ;;  %v2800_v40 = vrot.slane %v2795_v28, %v5805_v5  ;;  %v1733_v4 = vrot.slane %v6181_v44, %v5827_v16 }
 0x120   : > { %4775 = vmatprep.subr.bf16.mxu1 %v4357_v31  ;;  %v4356_v11 = vmul.bf16 %v2702_v30, %v6060_v55  ;;  %v4371_v20 = vmul.bf16 %v2807_v38, %v6058_v7  ;;  %v2809_v60 = vpack.i.b16 %v1673_v57, %v1673_v57  ;;  %v1741_v2 = vrot.slane %v6181_v44, %v5855_v35 }
 0x121   : > { %4723 = vmatpush1.bf16.msra.mxu0 %v4354_v39  ;;  %v4373_v18 = vmul.bf16 %v2821_v1, %v6062_v22  ;;  %v4370_v53 = vmul.bf16 %v2800_v40, %v6056_v21  ;;  %v2914_v48 = vpack.i.b16 %v1733_v4, %v1733_v4  ;;  %v1729_v19 = vrot.slane %v6181_v44, %v7918_v51 }
 0x122   : > { %4776 = vmatpush1.bf16.msra.mxu1 %v4356_v11  ;;  %4724 = vmatprep.subr.bf16.mxu0 %v4371_v20  ;;  %v2814_v49 = vrot.slane %v2809_v60, %v5805_v5  ;;  %v2928_v10 = vpack.i.b16 %v1741_v2, %v1741_v2  ;;  %v1737_v43 = vrot.slane %v6181_v44, %v7919_v63 }
 0x123   : > { %4777 = vmatprep.subr.bf16.mxu1 %v4373_v18  ;;  %v2919_v50 = vrot.slane %v2914_v48, %v5805_v5  ;;  %v2907_v54 = vpack.i.b16 %v1729_v19, %v1729_v19  ;;  %v1797_v58 = vrot.slane %v6128_v56, %v5827_v16  ;;  %v1805_v13 = vrot.slane %v6128_v56, %v5855_v35 }
 0x124   : > { %v4372_v61 = vmul.bf16 %v2814_v49, %v6060_v55  ;;  %v2933_v46 = vrot.slane %v2928_v10, %v5805_v5  ;;  %v2921_v24 = vpack.i.b16 %v1737_v43, %v1737_v43  ;;  %v1793_v27 = vrot.slane %v6128_v56, %v7918_v51  ;;  %4709 = vmatprep.mubr.bf16.mxu1 %v6460_v9 }
 0x125   : > { %4725 = vmatpush1.bf16.msra.mxu0 %v4370_v53  ;;  %v4387_v44 = vmul.bf16 %v2919_v50, %v6058_v7  ;;  %v2912_v29 = vrot.slane %v2907_v54, %v5805_v5  ;;  %v3026_v59 = vpack.i.b16 %v1797_v58, %v1797_v58  ;;  %v3040_v23 = vpack.i.b16 %v1805_v13, %v1805_v13 }
 0x126   : > { %4778 = vmatpush1.bf16.msra.mxu1 %v4372_v61  ;;  %v4389_v25 = vmul.bf16 %v2933_v46, %v6062_v22  ;;  %v2926_v26 = vrot.slane %v2921_v24, %v5805_v5  ;;  %v3019_v28 = vpack.i.b16 %v1793_v27, %v1793_v27  ;;  %v1801_v31 = vrot.slane %v6128_v56, %v7919_v63  ;;  %v6520_v56 = vld [vmem:[%s5799_s18 + $0x10] ss:$8 sps:$4 sm:$0xff]  }
 0x127   : > { %4726 = vmatprep.subr.bf16.mxu0 %v4387_v44  ;;  %v4386_v30 = vmul.bf16 %v2912_v29, %v6056_v21  ;;  %v3031_v38 = vrot.slane %v3026_v59, %v5805_v5  ;;  %v3045_v57 = vrot.slane %v3040_v23, %v5805_v5  ;;  %v1861_v39 = vrot.slane %v6218_v45, %v5827_v16 }
 0x128   : > { %4779 = vmatprep.subr.bf16.mxu1 %v4389_v25  ;;  %v4388_v1 = vmul.bf16 %v2926_v26, %v6060_v55  ;;  %v3024_v40 = vrot.slane %v3019_v28, %v5805_v5  ;;  %v3033_v4 = vpack.i.b16 %v1801_v31, %v1801_v31  ;;  %v1869_v11 = vrot.slane %v6218_v45, %v5855_v35 }
 0x129   : > { %4727 = vmatpush1.bf16.msra.mxu0 %v4386_v30  ;;  %v4403_v20 = vmul.bf16 %v3031_v38, %v6058_v7  ;;  %v4405_v60 = vmul.bf16 %v3045_v57, %v6062_v22  ;;  %v3138_v2 = vpack.i.b16 %v1861_v39, %v1861_v39  ;;  %v1857_v18 = vrot.slane %v6218_v45, %v7918_v51 }
 0x12a   : > { %4780 = vmatpush1.bf16.msra.mxu1 %v4388_v1  ;;  %v4402_v53 = vmul.bf16 %v3024_v40, %v6056_v21  ;;  %v3038_v48 = vrot.slane %v3033_v4, %v5805_v5  ;;  %v3152_v19 = vpack.i.b16 %v1869_v11, %v1869_v11  ;;  %v1865_v49 = vrot.slane %v6218_v45, %v7919_v63 }
 0x12b   : > { %4728 = vmatprep.subr.bf16.mxu0 %v4403_v20  ;;  %4781 = vmatprep.subr.bf16.mxu1 %v4405_v60  ;;  %v3143_v10 = vrot.slane %v3138_v2, %v5805_v5  ;;  %v3131_v43 = vpack.i.b16 %v1857_v18, %v1857_v18  ;;  %v1925_v50 = vrot.slane %v6132_v17, %v5827_v16 }
 0x12c   : > { %v4404_v54 = vmul.bf16 %v3038_v48, %v6060_v55  ;;  %v3157_v58 = vrot.slane %v3152_v19, %v5805_v5  ;;  %v3145_v13 = vpack.i.b16 %v1865_v49, %v1865_v49  ;;  %v1933_v61 = vrot.slane %v6132_v17, %v5855_v35  ;;  %4657 = vmatmul.mubr.bf16.gmra.mrb[4].mxu0 %v6520_v56 }
 0x12d   : > { %4729 = vmatpush1.bf16.msra.mxu0 %v4402_v53  ;;  %v4419_v45 = vmul.bf16 %v3143_v10, %v6058_v7  ;;  %v3136_v46 = vrot.slane %v3131_v43, %v5805_v5  ;;  %v3250_v24 = vpack.i.b16 %v1925_v50, %v1925_v50  ;;  %v1921_v27 = vrot.slane %v6132_v17, %v7918_v51 }
 0x12e   : > { %4782 = vmatpush1.bf16.msra.mxu1 %v4404_v54  ;;  %v4421_v44 = vmul.bf16 %v3157_v58, %v6062_v22  ;;  %v3150_v29 = vrot.slane %v3145_v13, %v5805_v5  ;;  %v3264_v59 = vpack.i.b16 %v1933_v61, %v1933_v61  ;;  %v1929_v23 = vrot.slane %v6132_v17, %v7919_v63 }
 0x12f   : > { %4730 = vmatprep.subr.bf16.mxu0 %v4419_v45  ;;  %v4418_v25 = vmul.bf16 %v3136_v46, %v6056_v21  ;;  %v3255_v26 = vrot.slane %v3250_v24, %v5805_v5  ;;  %v3243_v28 = vpack.i.b16 %v1921_v27, %v1921_v27  ;;  %v1989_v31 = vrot.slane %v6254_v33, %v5827_v16 }
 0x130   : > { %4783 = vmatprep.subr.bf16.mxu1 %v4421_v44  ;;  %v4420_v30 = vmul.bf16 %v3150_v29, %v6060_v55  ;;  %v3269_v38 = vrot.slane %v3264_v59, %v5805_v5  ;;  %v3257_v57 = vpack.i.b16 %v1929_v23, %v1929_v23  ;;  %v1997_v39 = vrot.slane %v6254_v33, %v5855_v35 }
 0x131   : > { %4731 = vmatpush1.bf16.msra.mxu0 %v4418_v25  ;;  %v4435_v17 = vmul.bf16 %v3255_v26, %v6058_v7  ;;  %v3248_v1 = vrot.slane %v3243_v28, %v5805_v5  ;;  %v3362_v40 = vpack.i.b16 %v1989_v31, %v1989_v31  ;;  %v1985_v4 = vrot.slane %v6254_v33, %v7918_v51 }
 0x132   : > { %4784 = vmatpush1.bf16.msra.mxu1 %v4420_v30  ;;  %v4437_v11 = vmul.bf16 %v3269_v38, %v6062_v22  ;;  %v3262_v20 = vrot.slane %v3257_v57, %v5805_v5  ;;  %v3376_v60 = vpack.i.b16 %v1997_v39, %v1997_v39  ;;  %v1993_v2 = vrot.slane %v6254_v33, %v7919_v63 }
 0x133   : > { %4732 = vmatprep.subr.bf16.mxu0 %v4435_v17  ;;  %v4434_v18 = vmul.bf16 %v3248_v1, %v6056_v21  ;;  %v3367_v53 = vrot.slane %v3362_v40, %v5805_v5  ;;  %v3355_v48 = vpack.i.b16 %v1985_v4, %v1985_v4  ;;  %v2053_v19 = vrot.slane %v6258_v34, %v5827_v16 }
 0x134   : > { %4785 = vmatprep.subr.bf16.mxu1 %v4437_v11  ;;  %v4436_v49 = vmul.bf16 %v3262_v20, %v6060_v55  ;;  %v3381_v10 = vrot.slane %v3376_v60, %v5805_v5  ;;  %v3369_v43 = vpack.i.b16 %v1993_v2, %v1993_v2  ;;  %v2061_v50 = vrot.slane %v6258_v34, %v5855_v35 }
 0x135   : > { %4733 = vmatpush1.bf16.msra.mxu0 %v4434_v18  ;;  %v4451_v33 = vmul.bf16 %v3367_v53, %v6058_v7  ;;  %v3360_v54 = vrot.slane %v3355_v48, %v5805_v5  ;;  %v3474_v58 = vpack.i.b16 %v2053_v19, %v2053_v19  ;;  %v2049_v13 = vrot.slane %v6258_v34, %v7918_v51 }
 0x136   : > { %4786 = vmatpush1.bf16.msra.mxu1 %v4436_v49  ;;  %v4453_v61 = vmul.bf16 %v3381_v10, %v6062_v22  ;;  %v3374_v45 = vrot.slane %v3369_v43, %v5805_v5  ;;  %v3488_v46 = vpack.i.b16 %v2061_v50, %v2061_v50  ;;  %v2057_v24 = vrot.slane %v6258_v34, %v7919_v63 }
 0x137   : > { %4734 = vmatprep.subr.bf16.mxu0 %v4451_v33  ;;  %v4450_v27 = vmul.bf16 %v3360_v54, %v6056_v21  ;;  %v3479_v44 = vrot.slane %v3474_v58, %v5805_v5  ;;  %v3467_v29 = vpack.i.b16 %v2049_v13, %v2049_v13  ;;  %v2117_v59 = vrot.slane %v6260_v37, %v5827_v16 }
 0x138   : > { %4787 = vmatprep.subr.bf16.mxu1 %v4453_v61  ;;  %v4452_v23 = vmul.bf16 %v3374_v45, %v6060_v55  ;;  %v3493_v25 = vrot.slane %v3488_v46, %v5805_v5  ;;  %v3481_v26 = vpack.i.b16 %v2057_v24, %v2057_v24  ;;  %v2125_v28 = vrot.slane %v6260_v37, %v5855_v35 }
 0x139   : > { %4735 = vmatpush1.bf16.msra.mxu0 %v4450_v27  ;;  %v4467_v34 = vmul.bf16 %v3479_v44, %v6058_v7  ;;  %v3472_v31 = vrot.slane %v3467_v29, %v5805_v5  ;;  %v3586_v30 = vpack.i.b16 %v2117_v59, %v2117_v59  ;;  %v2113_v38 = vrot.slane %v6260_v37, %v7918_v51 }
 0x13a   : > { %4788 = vmatpush1.bf16.msra.mxu1 %v4452_v23  ;;  %v4469_v57 = vmul.bf16 %v3493_v25, %v6062_v22  ;;  %v3486_v39 = vrot.slane %v3481_v26, %v5805_v5  ;;  %v3600_v17 = vpack.i.b16 %v2125_v28, %v2125_v28  ;;  %v2121_v1 = vrot.slane %v6260_v37, %v7919_v63 }
 0x13b   : > { %4736 = vmatprep.subr.bf16.mxu0 %v4467_v34  ;;  %v4466_v40 = vmul.bf16 %v3472_v31, %v6056_v21  ;;  %v3591_v4 = vrot.slane %v3586_v30, %v5805_v5  ;;  %v3579_v11 = vpack.i.b16 %v2113_v38, %v2113_v38  ;;  %v2181_v20 = vrot.slane %v6264_v0, %v5827_v16 }
 0x13c   : > { %4789 = vmatprep.subr.bf16.mxu1 %v4469_v57  ;;  %v4468_v60 = vmul.bf16 %v3486_v39, %v6060_v55  ;;  %v3605_v2 = vrot.slane %v3600_v17, %v5805_v5  ;;  %v3593_v18 = vpack.i.b16 %v2121_v1, %v2121_v1  ;;  %v2189_v53 = vrot.slane %v6264_v0, %v5855_v35 }
 0x13d   : > { %4737 = vmatpush1.bf16.msra.mxu0 %v4466_v40  ;;  %v4483_v37 = vmul.bf16 %v3591_v4, %v6058_v7  ;;  %v3584_v48 = vrot.slane %v3579_v11, %v5805_v5  ;;  %v3698_v19 = vpack.i.b16 %v2181_v20, %v2181_v20  ;;  %v2177_v49 = vrot.slane %v6264_v0, %v7918_v51 }
 0x13e   : > { %4790 = vmatpush1.bf16.msra.mxu1 %v4468_v60  ;;  %v4485_v10 = vmul.bf16 %v3605_v2, %v6062_v22  ;;  %v3598_v43 = vrot.slane %v3593_v18, %v5805_v5  ;;  %v3712_v50 = vpack.i.b16 %v2189_v53, %v2189_v53  ;;  %v2185_v33 = vrot.slane %v6264_v0, %v7919_v63  ;;  %v6643_v53 = vld [vmem:[%s5792_s11 + $0x18] sm:$0xff] }
 0x13f   : > { %4738 = vmatprep.subr.bf16.mxu0 %v4483_v37  ;;  %v4482_v54 = vmul.bf16 %v3584_v48, %v6056_v21  ;;  %v3703_v58 = vrot.slane %v3698_v19, %v5805_v5  ;;  %v3691_v13 = vpack.i.b16 %v2177_v49, %v2177_v49  ;;  %v2245_v61 = vrot.slane %v6329_v32, %v5827_v16  ;;  %v6646_v37 = vld [vmem:[%s5792_s11 + $0x10] sm:$0xff] }
 0x140   : > { %4791 = vmatprep.subr.bf16.mxu1 %v4485_v10  ;;  %v4484_v45 = vmul.bf16 %v3598_v43, %v6060_v55  ;;  %v3717_v46 = vrot.slane %v3712_v50, %v5805_v5  ;;  %v3705_v24 = vpack.i.b16 %v2185_v33, %v2185_v33  ;;  %v2253_v27 = vrot.slane %v6329_v32, %v5855_v35 }
 0x141   : > { %4739 = vmatpush1.bf16.msra.mxu0 %v4482_v54  ;;  %v4499_v0 = vmul.bf16 %v3703_v58, %v6058_v7  ;;  %v3696_v44 = vrot.slane %v3691_v13, %v5805_v5  ;;  %v3810_v29 = vpack.i.b16 %v2245_v61, %v2245_v61  ;;  %v2241_v59 = vrot.slane %v6329_v32, %v7918_v51 }
 0x142   : > { %4792 = vmatpush1.bf16.msra.mxu1 %v4484_v45  ;;  %v4501_v23 = vmul.bf16 %v3717_v46, %v6062_v22  ;;  %v3710_v25 = vrot.slane %v3705_v24, %v5805_v5  ;;  %v3824_v26 = vpack.i.b16 %v2253_v27, %v2253_v27  ;;  %v2249_v28 = vrot.slane %v6329_v32, %v7919_v63 }
 0x143   : > { %4740 = vmatprep.subr.bf16.mxu0 %v4499_v0  ;;  %v4498_v34 = vmul.bf16 %v3696_v44, %v6056_v21  ;;  %v3815_v31 = vrot.slane %v3810_v29, %v5805_v5  ;;  %v3803_v30 = vpack.i.b16 %v2241_v59, %v2241_v59  ;;  %v2309_v38 = vrot.slane %v6335_v3, %v5827_v16 }
 0x144   : > { %4793 = vmatprep.subr.bf16.mxu1 %v4501_v23  ;;  %v4500_v57 = vmul.bf16 %v3710_v25, %v6060_v55  ;;  %v3829_v39 = vrot.slane %v3824_v26, %v5805_v5  ;;  %v3817_v17 = vpack.i.b16 %v2249_v28, %v2249_v28  ;;  %v2317_v32 = vrot.slane %v6335_v3, %v5855_v35 }
 0x145   : > { %4741 = vmatpush1.bf16.msra.mxu0 %v4498_v34  ;;  %v4515_v1 = vmul.bf16 %v3815_v31, %v6058_v7  ;;  %v3808_v40 = vrot.slane %v3803_v30, %v5805_v5  ;;  %v3922_v4 = vpack.i.b16 %v2309_v38, %v2309_v38  ;;  %v2305_v11 = vrot.slane %v6335_v3, %v7918_v51 }
 0x146   : > { %4794 = vmatpush1.bf16.msra.mxu1 %v4500_v57  ;;  %v4517_v20 = vmul.bf16 %v3829_v39, %v6062_v22  ;;  %v3822_v60 = vrot.slane %v3817_v17, %v5805_v5  ;;  %v3936_v2 = vpack.i.b16 %v2317_v32, %v2317_v32  ;;  %v2313_v18 = vrot.slane %v6335_v3, %v7919_v63 }
 0x147   : > { %vm496_vm6 = vcmp.ge.f32.partialorder %v6646_v37, 0.0  ;;  %vm500_vm7 = vcmp.le.f32.partialorder %v6646_v37, 15.0  ;;  %4742 = vmatprep.subr.bf16.mxu0 %v4515_v1  ;;  %v4514_v48 = vmul.bf16 %v3808_v40, %v6056_v21  ;;  %v3927_v19 = vrot.slane %v3922_v4, %v5805_v5  ;;  %4710 = vmatmul.mubr.bf16.gmra.mrb[4].mxu1 %v6520_v56 }
 0x148   : > { %v3915_v49 = vpack.i.b16 %v2305_v11, %v2305_v11  ;;  %v2373_v10 = vrot.slane %v6372_v41, %v5827_v16  ;;  %vm497_vm8 = vcmp.ge.f32.partialorder %v6643_v53, 0.0  ;;  %4795 = vmatprep.subr.bf16.mxu1 %v4517_v20  ;;  %v4516_v3 = vmul.bf16 %v3822_v60, %v6060_v55  ;;  %vm6700_vm10 = vmand %vm496_vm6, %vm500_vm7 }
 0x149   : > { %v3941_v43 = vrot.slane %v3936_v2, %v5805_v5  ;;  %v3929_v50 = vpack.i.b16 %v2313_v18, %v2313_v18  ;;  %v2381_v33 = vrot.slane %v6372_v41, %v5855_v35  ;;  %4743 = vmatpush1.bf16.msra.mxu0 %v4514_v48  ;;  %v4531_v54 = vmul.bf16 %v3927_v19, %v6058_v7 }
 0x14a   : > { %v3920_v58 = vrot.slane %v3915_v49, %v5805_v5  ;;  %v4034_v13 = vpack.i.b16 %v2373_v10, %v2373_v10  ;;  %v2369_v61 = vrot.slane %v6372_v41, %v7918_v51  ;;  %4796 = vmatpush1.bf16.msra.mxu1 %v4516_v3  ;;  %v2377_v27 = vrot.slane %v6372_v41, %v7919_v63 }
 0x14b   : > { %v4533_v45 = vmul.bf16 %v3941_v43, %v6062_v22  ;;  %v3934_v46 = vrot.slane %v3929_v50, %v5805_v5  ;;  %v4048_v24 = vpack.i.b16 %v2381_v33, %v2381_v33  ;;  %4744 = vmatprep.subr.bf16.mxu0 %v4531_v54  ;;  %vm501_vm9 = vcmp.le.f32.partialorder %v6643_v53, 15.0 }
 0x14c   : > { %v4530_v0 = vmul.bf16 %v3920_v58, %v6056_v21  ;;  %v4039_v44 = vrot.slane %v4034_v13, %v5805_v5  ;;  %v4027_v29 = vpack.i.b16 %v2369_v61, %v2369_v61  ;;  %v4041_v25 = vpack.i.b16 %v2377_v27, %v2377_v27  ;;  %vm6712_vm11 = vmand %vm497_vm8, %vm501_vm9  ;;  %v6720_v61 = vld [vmem:[%s5799_s18 + $0x4] ss:$8 sps:$4 sm:$0xff]  }
 0x14d   : > { %4797 = vmatprep.subr.bf16.mxu1 %v4533_v45  ;;  %v4532_v59 = vmul.bf16 %v3934_v46, %v6060_v55  ;;  %v4053_v23 = vrot.slane %v4048_v24, %v5805_v5  ;;  %v2437_v26 = vrot.slane %v6377_v42, %v5827_v16  ;;  %v2445_v34 = vrot.slane %v6377_v42, %v5855_v35 }
 0x14e   : > { %4745 = vmatpush1.bf16.msra.mxu0 %v4530_v0  ;;  %v4547_v41 = vmul.bf16 %v4039_v44, %v6058_v7  ;;  %v4032_v28 = vrot.slane %v4027_v29, %v5805_v5  ;;  %v2433_v31 = vrot.slane %v6377_v42, %v7918_v51  ;;  %v4046_v38 = vrot.slane %v4041_v25, %v5805_v5 }
 0x14f   : > { %4798 = vmatpush1.bf16.msra.mxu1 %v4532_v59  ;;  %v4549_v30 = vmul.bf16 %v4053_v23, %v6062_v22  ;;  %v4146_v57 = vpack.i.b16 %v2437_v26, %v2437_v26  ;;  %v2441_v39 = vrot.slane %v6377_v42, %v7919_v63  ;;  %v4160_v32 = vpack.i.b16 %v2445_v34, %v2445_v34 }
 0x150   : > { %4746 = vmatprep.subr.bf16.mxu0 %v4547_v41  ;;  %v4546_v17 = vmul.bf16 %v4032_v28, %v6056_v21  ;;  %v4139_v1 = vpack.i.b16 %v2433_v31, %v2433_v31  ;;  %v2501_v40 = vrot.slane %v6379_v8, %v5827_v16  ;;  %v4548_v4 = vmul.bf16 %v4046_v38, %v6060_v55 }
 0x151   : > { %4799 = vmatprep.subr.bf16.mxu1 %v4549_v30  ;;  %v4151_v11 = vrot.slane %v4146_v57, %v5805_v5  ;;  %v4153_v20 = vpack.i.b16 %v2441_v39, %v2441_v39  ;;  %v2509_v60 = vrot.slane %v6379_v8, %v5855_v35  ;;  %v4165_v42 = vrot.slane %v4160_v32, %v5805_v5 }
 0x152   : > { %4747 = vmatpush1.bf16.msra.mxu0 %v4546_v17  ;;  %v4144_v2 = vrot.slane %v4139_v1, %v5805_v5  ;;  %v4258_v18 = vpack.i.b16 %v2501_v40, %v2501_v40  ;;  %v2497_v48 = vrot.slane %v6379_v8, %v7918_v51  ;;  %v2505_v43 = vrot.slane %v6379_v8, %v7919_v63 }
 0x153   : > { %4800 = vmatpush1.bf16.msra.mxu1 %v4548_v4  ;;  %v4563_v49 = vmul.bf16 %v4151_v11, %v6058_v7  ;;  %v4158_v10 = vrot.slane %v4153_v20, %v5805_v5  ;;  %v4272_v3 = vpack.i.b16 %v2509_v60, %v2509_v60  ;;  %v4565_v33 = vmul.bf16 %v4165_v42, %v6062_v22 }
 0x154   : > { %v4562_v54 = vmul.bf16 %v4144_v2, %v6056_v21  ;;  %v4263_v58 = vrot.slane %v4258_v18, %v5805_v5  ;;  %v4251_v13 = vpack.i.b16 %v2497_v48, %v2497_v48  ;;  %4752 = vmatprep.mubr.bf16.mxu0 %v6720_v61  ;;  %v4265_v46 = vpack.i.b16 %v2505_v43, %v2505_v43 }
 0x155   : > { %4748 = vmatprep.subr.bf16.mxu0 %v4563_v49  ;;  %v4564_v8 = vmul.bf16 %v4158_v10, %v6060_v55  ;;  %v4277_v45 = vrot.slane %v4272_v3, %v5805_v5  ;;  %4805 = vmatprep.mubr.bf16.mxu1 %v6720_v61  ;;  %v7924_v24 = vmov 0   ;;  %v265_v29 = vrot.slane %v6646_v37, %v7918_v51 }
 0x156   : > { %v6729_v27 = vsel %vm6700_vm10, 1, %v7924_v24  ;;  %4801 = vmatprep.subr.bf16.mxu1 %v4565_v33  ;;  %4749 = vmatpush1.bf16.msra.mxu0 %v4562_v54  ;;  %v4579_v0 = vmul.bf16 %v4263_v58, %v6058_v7  ;;  %v4256_v44 = vrot.slane %v4251_v13, %v5805_v5  ;;  %v6738_v59 = vsel %vm6712_vm11, 1, %v7924_v24 }
 0x157   : > { %4802 = vmatpush1.bf16.msra.mxu1 %v4564_v8  ;;  %v4581_v23 = vmul.bf16 %v4277_v45, %v6062_v22  ;;  %v4270_v25 = vrot.slane %v4265_v46, %v5805_v5  ;;  %v269_v26 = vrot.slane %v6646_v37, %v7919_v63  ;;  %v273_v7 = vrot.slane %v6643_v53, %v5805_v5 }
 0x158   : > { %4750 = vmatprep.subr.bf16.mxu0 %v4579_v0  ;;  %v4578_v41 = vmul.bf16 %v4256_v44, %v6056_v21  ;;  %v277_v28 = vrot.slane %v6643_v53, %v5807_v6  ;;  %v281_v34 = vrot.slane %v6643_v53, %v7918_v51  ;;  %v285_v22 = vrot.slane %v6643_v53, %v7919_v63 }
 0x159   : > { %4803 = vmatprep.subr.bf16.mxu1 %v4581_v23  ;;  %v4580_v31 = vmul.bf16 %v4270_v25, %v6060_v55  ;;  %v6758_v30 = vrot.slane %v257_v62, %v5805_v5  ;;  %v6764_v21 = vrot.slane %v261_v52, %v5805_v5  ;;  %v6767_v38 = vrot.slane %v265_v29, %v5805_v5  ;;  %v7925_v52 = vld [vmem:[#allocation19_spill] sm:$0xff] }
 0x15a   : > { %4751 = vmatpush1.bf16.msra.mxu0 %v4578_v41  ;;  %v6770_v57 = vrot.slane %v269_v26, %v5805_v5  ;;  %v6773_v55 = vrot.slane %v273_v7, %v5805_v5  ;;  %v6776_v39 = vrot.slane %v277_v28, %v5805_v5  ;;  %v6779_v62 = vrot.slane %v281_v34, %v5805_v5 }
 0x15b   : > { %4804 = vmatpush1.bf16.msra.mxu1 %v4580_v31  ;;  %v6782_v12 = vrot.slane %v285_v22, %v5805_v5  ;;  %v374_v17 = vsub.f32 %v7925_v52, %v6758_v30  ;;  %v375_v32 = vsub.f32 %v7925_v52, %v6764_v21  ;;  %v376_v1 = vsub.f32 %v7925_v52, %v6767_v38 }
 0x15c   : > { %v377_v40 = vsub.f32 %v7925_v52, %v6770_v57  ;;  %v378_v4 = vsub.f32 %v7925_v52, %v6773_v55  ;;  %v379_v11 = vsub.f32 %v7925_v52, %v6776_v39  ;;  %v380_v20 = vsub.f32 %v7925_v52, %v6779_v62 }
 0x15d   : > { %4753 = vmatmul.mubr.bf16.vlgmr.msra.gmra.mrb[8].mxu0 %v6441_v47  ;;  %v381_v60 = vsub.f32 %v7925_v52, %v6782_v12  ;;  %v406_v42 = vand.u32 2147483647, %v374_v17  ;;  %v407_v2 = vand.u32 2147483647, %v375_v32  ;;  %v408_v18 = vand.u32 2147483647, %v376_v1 }
 0x15e   : > { %4806 = vmatmul.mubr.bf16.vlgmr.msra.gmra.mrb[8].mxu1 %v6441_v47  ;;  %v409_v48 = vand.u32 2147483647, %v377_v40  ;;  %v410_v19 = vand.u32 2147483647, %v378_v4  ;;  %v411_v49 = vand.u32 2147483647, %v379_v11  ;;  %v545_v10 = vrot.slane %v6729_v27, %v5805_v5  ;;  %4762 = vmatprep.mubr.bf16.mxu0 %v6460_v9 }
 0x15f   : > { %v412_v3 = vand.u32 2147483647, %v380_v20  ;;  %v413_v43 = vand.u32 2147483647, %v381_v60  ;;  %v438_v50 = vsub.f32 1.0, %v406_v42  ;;  %v439_v33 = vsub.f32 1.0, %v407_v2  ;;  %4815 = vmatprep.mubr.bf16.mxu1 %v6460_v9 }
 0x160   : > { %v440_v54 = vsub.f32 1.0, %v408_v18  ;;  %v441_v58 = vsub.f32 1.0, %v409_v48  ;;  %v442_v13 = vsub.f32 1.0, %v410_v19  ;;  %v443_v8 = vsub.f32 1.0, %v411_v49 }
 0x161   : > { %v444_v45 = vsub.f32 1.0, %v412_v3  ;;  %v445_v47 = vsub.f32 1.0, %v413_v43  ;;  %v470_v46 = vmax.f32 %v438_v50, 0.0  ;;  %v471_v24 = vmax.f32 %v439_v33, 0.0 }
 0x162   : > { %v472_v0 = vmax.f32 %v440_v54, 0.0  ;;  %v473_v44 = vmax.f32 %v441_v58, 0.0  ;;  %v474_v29 = vmax.f32 %v442_v13, 0.0  ;;  %v475_v23 = vmax.f32 %v443_v8, 0.0 }
 0x163   : > { %v476_v25 = vmax.f32 %v444_v45, 0.0  ;;  %v477_v26 = vmax.f32 %v445_v47, 0.0  ;;  %v549_v7 = vrot.slane %v6729_v27, %v5807_v6  ;;  %v553_v9 = vrot.slane %v6729_v27, %v7918_v51 }
 0x164   : > { %v557_v41 = vrot.slane %v6729_v27, %v7919_v63  ;;  %v561_v28 = vrot.slane %v6738_v59, %v5805_v5  ;;  %v565_v34 = vrot.slane %v6738_v59, %v5807_v6  ;;  %v569_v22 = vrot.slane %v6738_v59, %v7918_v51 }
 0x165   : > { %v573_v31 = vrot.slane %v6738_v59, %v7919_v63  ;;  %v6821_v17 = vrot.slane %v545_v10, %v5805_v5  ;;  %v6824_v32 = vrot.slane %v549_v7, %v5805_v5  ;;  %v6827_v1 = vrot.slane %v553_v9, %v5805_v5  ;;  %4763 = vmatmul.mubr.bf16.gmra.mrb[12].mxu0 %v6520_v56 }
 0x166   : > { %v6831_v40 = vrot.slane %v557_v41, %v5805_v5  ;;  %v6834_v4 = vrot.slane %v561_v28, %v5805_v5  ;;  %v6837_v11 = vrot.slane %v565_v34, %v5805_v5  ;;  %v6840_v20 = vrot.slane %v569_v22, %v5805_v5  ;;  %4816 = vmatmul.mubr.bf16.gmra.mrb[12].mxu1 %v6520_v56  ;;  %v7934_v28 = vld [vmem:[#allocation20_spill] sm:$0xff] }
 0x167   : > { %7926 = vst [vmem:[#allocation19_spill] sm:$0xff] %v6821_v17  ;;  %7927 = vst [vmem:[#allocation21_spill] sm:$0xff] %v6824_v32  ;;  %v6844_v60 = vrot.slane %v573_v31, %v5805_v5  ;;  %vm646_vm12 = vcmp.eq.s32.totalorder %v6821_v17, 1  ;;  %vm647_vm13 = vcmp.eq.s32.totalorder %v6824_v32, 1  ;;  %vm648_vm14 = vcmp.eq.s32.totalorder %v6827_v1, 1  ;;  %4858 = vmatprep.mubr.bf16.mxu0 %v6720_v61  ;;  %4911 = vmatprep.mubr.bf16.mxu1 %v6720_v61 }
 0x168   : > { %7928 = vst [vmem:[#allocation22_spill] sm:$0xff] %v6827_v1  ;;  %7929 = vst [vmem:[#allocation23_spill] sm:$0xff] %v6831_v40  ;;  %vm649_vm15 = vcmp.eq.s32.totalorder %v6831_v40, 1  ;;  %vm650_vm0 = vcmp.eq.s32.totalorder %v6834_v4, 1  ;;  %vm651_vm1 = vcmp.eq.s32.totalorder %v6837_v11, 1  ;;  %vm652_vm2 = vcmp.eq.s32.totalorder %v6840_v20, 1 }
 0x169   : > { %7930 = vst [vmem:[#allocation24_spill] sm:$0xff] %v6834_v4  ;;  %7931 = vst [vmem:[#allocation25_spill] sm:$0xff] %v6837_v11  ;;  %vm653_vm3 = vcmp.eq.s32.totalorder %v6844_v60, 1  ;;  %v6858_v56 = vsel %vm646_vm12, %v470_v46, 0.0  ;;  %v6862_v42 = vsel %vm647_vm13, %v471_v24, 0.0  ;;  %v6866_v61 = vsel %vm648_vm14, %v472_v0, 0.0 }
 0x16a   : > { %7932 = vst [vmem:[#allocation26_spill] sm:$0xff] %v6840_v20  ;;  %7933 = vst [vmem:[#allocation27_spill] sm:$0xff] %v6844_v60  ;;  %v6870_v2 = vsel %vm649_vm15, %v473_v44, 0.0  ;;  %v6874_v18 = vsel %vm650_vm0, %v474_v29, 0.0  ;;  %v6878_v48 = vsel %vm651_vm1, %v475_v23, 0.0  ;;  %v6882_v19 = vsel %vm652_vm2, %v476_v25, 0.0 }
 0x16b   : > { %v6886_v49 = vsel %vm653_vm3, %v477_v26, 0.0  ;;  %v721_v10 = vrot.slane %v6646_v37, %v5823_v14  ;;  %v725_v3 = vrot.slane %v6646_v37, %v5825_v15  ;;  %v729_v43 = vrot.slane %v6646_v37, %v5827_v16 }
 0x16c   : > { %v733_v50 = vrot.slane %v6646_v37, %v5855_v35  ;;  %v737_v33 = vrot.slane %v6643_v53, %v5823_v14  ;;  %v741_v54 = vrot.slane %v6643_v53, %v5825_v15  ;;  %v745_v58 = vrot.slane %v6643_v53, %v5827_v16 }
 0x16d   : > { %v749_v13 = vrot.slane %v6643_v53, %v5855_v35  ;;  %v801_v8 = vrot.slane %v721_v10, %v5823_v14  ;;  %v805_v45 = vrot.slane %v725_v3, %v5823_v14  ;;  %v809_v47 = vrot.slane %v729_v43, %v5823_v14 }
 0x16e   : > { %v813_v37 = vrot.slane %v733_v50, %v5823_v14  ;;  %v817_v46 = vrot.slane %v737_v33, %v5823_v14  ;;  %v821_v24 = vrot.slane %v741_v54, %v5823_v14  ;;  %v825_v0 = vrot.slane %v745_v58, %v5823_v14 }
 0x16f   : > { %v829_v44 = vrot.slane %v749_v13, %v5823_v14  ;;  %v838_v29 = vsub.f32 %v7925_v52, %v801_v8  ;;  %v839_v53 = vsub.f32 %v7925_v52, %v805_v45  ;;  %v840_v23 = vsub.f32 %v7925_v52, %v809_v47 }
 0x170   : > { %v841_v25 = vsub.f32 %v7925_v52, %v813_v37  ;;  %v842_v26 = vsub.f32 %v7925_v52, %v817_v46  ;;  %v843_v7 = vsub.f32 %v7925_v52, %v821_v24  ;;  %v844_v9 = vsub.f32 %v7925_v52, %v825_v0 }
 0x171   : > { %v845_v41 = vsub.f32 %v7925_v52, %v829_v44  ;;  %v854_v34 = vsub.f32 %v7934_v28, %v801_v8  ;;  %v855_v22 = vsub.f32 %v7934_v28, %v805_v45  ;;  %v856_v31 = vsub.f32 %v7934_v28, %v809_v47 }
 0x172   : > { %v857_v10 = vsub.f32 %v7934_v28, %v813_v37  ;;  %v858_v3 = vsub.f32 %v7934_v28, %v817_v46  ;;  %v859_v43 = vsub.f32 %v7934_v28, %v821_v24  ;;  %v860_v50 = vsub.f32 %v7934_v28, %v825_v0 }
 0x173   : > { %v861_v33 = vsub.f32 %v7934_v28, %v829_v44  ;;  %v870_v54 = vand.u32 2147483647, %v838_v29  ;;  %v871_v58 = vand.u32 2147483647, %v839_v53  ;;  %v872_v13 = vand.u32 2147483647, %v840_v23 }
 0x174   : > { %v873_v52 = vand.u32 2147483647, %v841_v25  ;;  %v874_v63 = vand.u32 2147483647, %v842_v26  ;;  %v875_v8 = vand.u32 2147483647, %v843_v7  ;;  %v993_v45 = vrot.slane %v6729_v27, %v5823_v14 }
 0x175   : > { %v876_v47 = vand.u32 2147483647, %v844_v9  ;;  %v877_v51 = vand.u32 2147483647, %v845_v41  ;;  %v886_v37 = vand.u32 2147483647, %v854_v34  ;;  %v997_v46 = vrot.slane %v6729_v27, %v5825_v15 }
 0x176   : > { %v887_v24 = vand.u32 2147483647, %v855_v22  ;;  %v888_v60 = vand.u32 2147483647, %v856_v31  ;;  %v889_v0 = vand.u32 2147483647, %v857_v10  ;;  %v1001_v44 = vrot.slane %v6729_v27, %v5827_v16 }
 0x177   : > { %v890_v29 = vand.u32 2147483647, %v858_v3  ;;  %v891_v53 = vand.u32 2147483647, %v859_v43  ;;  %v892_v23 = vand.u32 2147483647, %v860_v50  ;;  %v1005_v25 = vrot.slane %v6729_v27, %v5855_v35 }
 0x178   : > { %v893_v26 = vand.u32 2147483647, %v861_v33  ;;  %v902_v7 = vsub.f32 1.0, %v870_v54  ;;  %v903_v9 = vsub.f32 1.0, %v871_v58  ;;  %v904_v41 = vsub.f32 1.0, %v872_v13 }
 0x179   : > { %v905_v34 = vsub.f32 1.0, %v873_v52  ;;  %v906_v20 = vsub.f32 1.0, %v874_v63  ;;  %v907_v11 = vsub.f32 1.0, %v875_v8  ;;  %v908_v4 = vsub.f32 1.0, %v876_v47 }
 0x17a   : > { %v909_v22 = vsub.f32 1.0, %v877_v51  ;;  %v918_v31 = vsub.f32 1.0, %v886_v37  ;;  %v919_v10 = vsub.f32 1.0, %v887_v24  ;;  %v920_v40 = vsub.f32 1.0, %v888_v60 }
 0x17b   : > { %v921_v1 = vsub.f32 1.0, %v889_v0  ;;  %v922_v32 = vsub.f32 1.0, %v890_v29  ;;  %v923_v3 = vsub.f32 1.0, %v891_v53  ;;  %v924_v43 = vsub.f32 1.0, %v892_v23 }
 0x17c   : > { %v925_v50 = vsub.f32 1.0, %v893_v26  ;;  %v934_v17 = vmax.f32 %v902_v7, 0.0  ;;  %v935_v6 = vmax.f32 %v903_v9, 0.0  ;;  %v936_v27 = vmax.f32 %v904_v41, 0.0 }
 0x17d   : > { %v937_v33 = vmax.f32 %v905_v34, 0.0  ;;  %v938_v54 = vmax.f32 %v906_v20, 0.0  ;;  %v939_v58 = vmax.f32 %v907_v11, 0.0  ;;  %v940_v13 = vmax.f32 %v908_v4, 0.0 }
 0x17e   : > { %v941_v52 = vmax.f32 %v909_v22, 0.0  ;;  %v950_v63 = vmax.f32 %v918_v31, 0.0  ;;  %v951_v8 = vmax.f32 %v919_v10, 0.0  ;;  %v952_v47 = vmax.f32 %v920_v40, 0.0 }
 0x17f   : > { %v953_v51 = vmax.f32 %v921_v1, 0.0  ;;  %v954_v37 = vmax.f32 %v922_v32, 0.0  ;;  %v955_v24 = vmax.f32 %v923_v3, 0.0  ;;  %v956_v60 = vmax.f32 %v924_v43, 0.0 }
 0x180   : > { %v957_v0 = vmax.f32 %v925_v50, 0.0  ;;  %v1009_v29 = vrot.slane %v6738_v59, %v5823_v14  ;;  %v1013_v53 = vrot.slane %v6738_v59, %v5825_v15  ;;  %v1017_v20 = vrot.slane %v6738_v59, %v5827_v16 }
 0x181   : > { %v1021_v4 = vrot.slane %v6738_v59, %v5855_v35  ;;  %v1057_v11 = vrot.slane %v993_v45, %v5823_v14  ;;  %v1061_v1 = vrot.slane %v997_v46, %v5823_v14  ;;  %v1065_v32 = vrot.slane %v1001_v44, %v5823_v14 }
 0x182   : > { %v1069_v40 = vrot.slane %v1005_v25, %v5823_v14  ;;  %v1073_v23 = vrot.slane %v1009_v29, %v5823_v14  ;;  %v1077_v26 = vrot.slane %v1013_v53, %v5823_v14  ;;  %v1081_v7 = vrot.slane %v1017_v20, %v5823_v14 }
 0x183   : > { %v1085_v9 = vrot.slane %v1021_v4, %v5823_v14  ;;  %vm1094_vm4 = vcmp.eq.s32.totalorder %v1057_v11, 1  ;;  %vm1095_vm5 = vcmp.eq.s32.totalorder %v1061_v1, 1  ;;  %vm1096_vm6 = vcmp.eq.s32.totalorder %v1065_v32, 1 }
 0x184   : > { %vm1097_vm7 = vcmp.eq.s32.totalorder %v1069_v40, 1  ;;  %vm1098_vm8 = vcmp.eq.s32.totalorder %v1073_v23, 1  ;;  %vm1099_vm9 = vcmp.eq.s32.totalorder %v1077_v26, 1  ;;  %vm1100_vm10 = vcmp.eq.s32.totalorder %v1081_v7, 1 }
 0x185   : > { %vm1101_vm11 = vcmp.eq.s32.totalorder %v1085_v9, 1  ;;  %v1110_v59 = vsel %vm1094_vm4, %v934_v17, 0.0  ;;  %v1111_v45 = vsel %vm1095_vm5, %v935_v6, 0.0  ;;  %v1112_v46 = vsel %vm1096_vm6, %v936_v27, 0.0 }
 0x186   : > { %v1113_v44 = vsel %vm1097_vm7, %v937_v33, 0.0  ;;  %v1114_v25 = vsel %vm1098_vm8, %v938_v54, 0.0  ;;  %v1115_v41 = vsel %vm1099_vm9, %v939_v58, 0.0  ;;  %v1116_v34 = vsel %vm1100_vm10, %v940_v13, 0.0 }
 0x187   : > { %v1117_v22 = vsel %vm1101_vm11, %v941_v52, 0.0  ;;  %v1126_v31 = vsel %vm1094_vm4, %v950_v63, 0.0  ;;  %v1127_v10 = vsel %vm1095_vm5, %v951_v8, 0.0  ;;  %v1128_v17 = vsel %vm1096_vm6, %v952_v47, 0.0 }
 0x188   : > { %v1129_v6 = vsel %vm1097_vm7, %v953_v51, 0.0  ;;  %v1130_v3 = vsel %vm1098_vm8, %v954_v37, 0.0  ;;  %v1131_v43 = vsel %vm1099_vm9, %v955_v24, 0.0  ;;  %v1132_v50 = vsel %vm1100_vm10, %v956_v60, 0.0 }
 0x189   : > { %v1133_v27 = vsel %vm1101_vm11, %v957_v0, 0.0  ;;  %v6968_v33 = vpack.c.bf16 %v1126_v31, %v1110_v59  ;;  %v6970_v54 = vpack.c.bf16 %v1127_v10, %v1111_v45  ;;  %v6972_v58 = vpack.c.bf16 %v1128_v17, %v1112_v46 }
 0x18a   : > { %v6974_v13 = vpack.c.bf16 %v1129_v6, %v1113_v44  ;;  %v6976_v52 = vpack.c.bf16 %v1130_v3, %v1114_v25  ;;  %v6978_v63 = vpack.c.bf16 %v1131_v43, %v1115_v41  ;;  %v6980_v8 = vpack.c.bf16 %v1132_v50, %v1116_v34 }
 0x18b   : > { %v6982_v47 = vpack.c.bf16 %v1133_v27, %v1117_v22  ;;  %v5233_v51 = vpack.c.bf16 %v6862_v42, %v6858_v56  ;;  %v5235_v37 = vpack.c.bf16 %v6870_v2, %v6866_v61  ;;  %v5237_v24 = vpack.c.bf16 %v6878_v48, %v6874_v18 }
 0x18c   : > { %v5239_v60 = vpack.c.bf16 %v6886_v49, %v6882_v19  ;;  %v390_v0 = vsub.f32 %v7934_v28, %v6758_v30  ;;  %v391_v29 = vsub.f32 %v7934_v28, %v6764_v21  ;;  %v392_v53 = vsub.f32 %v7934_v28, %v6767_v38 }
 0x18d   : > { %v1332_v56 = vrot.slane %v5233_v51, %v5857_v36  ;;  %v1346_v42 = vrot.slane %v5235_v37, %v5857_v36  ;;  %v1360_v61 = vrot.slane %v5237_v24, %v5857_v36  ;;  %v393_v2 = vsub.f32 %v7934_v28, %v6770_v57 }
 0x18e   : > { %v1374_v18 = vrot.slane %v5239_v60, %v5857_v36  ;;  %v394_v30 = vsub.f32 %v7934_v28, %v6773_v55  ;;  %v395_v21 = vsub.f32 %v7934_v28, %v6776_v39  ;;  %v396_v38 = vsub.f32 %v7934_v28, %v6779_v62 }
 0x18f   : > { %v1382_v48 = vcombine.low %v1332_v56, %v1346_v42  ;;  %v1383_v19 = vcombine.high %v1332_v56, %v1346_v42  ;;  %v397_v49 = vsub.f32 %v7934_v28, %v6782_v12  ;;  %v7012_v20 = vand.u32 2147483647, %v390_v0  ;;  %v7935_v0 = vld [vmem:[#allocation16_spill] sm:$0xff] }
 0x190   : > { %v1386_v4 = vcombine.low %v1360_v61, %v1374_v18  ;;  %v1387_v57 = vcombine.high %v1360_v61, %v1374_v18  ;;  %v7014_v11 = vand.u32 2147483647, %v391_v29  ;;  %v7016_v1 = vand.u32 2147483647, %v392_v53 }
 0x191   : > { %v1396_v55 = vrot.slane %v1382_v48, %v5857_v36  ;;  %v1410_v39 = vrot.slane %v1383_v19, %v5857_v36  ;;  %v7020_v32 = vand.u32 2147483647, %v393_v2  ;;  %v7022_v62 = vand.u32 2147483647, %v394_v30 }
 0x192   : > { %v1424_v40 = vrot.slane %v1386_v4, %v5857_v36  ;;  %v1438_v12 = vrot.slane %v1387_v57, %v5857_v36  ;;  %v7026_v28 = vand.u32 2147483647, %v395_v21  ;;  %v7028_v23 = vand.u32 2147483647, %v396_v38 }
 0x193   : > { %v7030_v26 = vand.u32 2147483647, %v397_v49  ;;  %v454_v7 = vsub.f32 1.0, %v7012_v20  ;;  %v455_v9 = vsub.f32 1.0, %v7014_v11  ;;  %v456_v59 = vsub.f32 1.0, %v7016_v1 }
 0x194   : > { %v1446_v45 = vcombine.low %v1396_v55, %v1424_v40  ;;  %v7035_v46 = vcombine.low %v1410_v39, %v1438_v12  ;;  %v7037_v44 = vcombine.high %v1396_v55, %v1424_v40  ;;  %v7039_v25 = vcombine.high %v1410_v39, %v1438_v12 }
 0x195   : > { %v457_v41 = vsub.f32 1.0, %v7020_v32  ;;  %v458_v34 = vsub.f32 1.0, %v7022_v62  ;;  %v459_v22 = vsub.f32 1.0, %v7026_v28  ;;  %v460_v31 = vsub.f32 1.0, %v7028_v23 }
 0x196   : > { %v7045_v10 = vpack.i.b16 %v1446_v45, %v1446_v45  ;;  %v1457_v17 = vunpack.i.h.s16 %v1446_v45  ;;  %v7049_v6 = vpack.i.b16 %v7035_v46, %v7035_v46  ;;  %v1461_v3 = vunpack.i.h.s16 %v7035_v46 }
 0x197   : > { %v7054_v43 = vpack.i.b16 %v7037_v44, %v7037_v44  ;;  %v1465_v50 = vunpack.i.h.s16 %v7037_v44  ;;  %v7059_v27 = vpack.i.b16 %v7039_v25, %v7039_v25  ;;  %v1469_v51 = vunpack.i.h.s16 %v7039_v25 }
 0x198   : > { %v1557_v37 = vrot.slane %v7045_v10, %v5823_v14  ;;  %v1565_v24 = vrot.slane %v7045_v10, %v5825_v15  ;;  %v1553_v60 = vrot.slane %v7045_v10, %v5805_v5  ;;  %v1561_v29 = vrot.slane %v7045_v10, %v7935_v0 }
 0x199   : > { %v7070_v53 = vpack.i.b16 %v1457_v17, %v1457_v17  ;;  %v1685_v56 = vrot.slane %v7049_v6, %v5823_v14  ;;  %v1693_v42 = vrot.slane %v7049_v6, %v5825_v15  ;;  %v1681_v61 = vrot.slane %v7049_v6, %v5805_v5 }
 0x19a   : > { %v2606_v2 = vpack.i.b16 %v1557_v37, %v1557_v37  ;;  %v2620_v18 = vpack.i.b16 %v1565_v24, %v1565_v24  ;;  %v2599_v30 = vpack.i.b16 %v1553_v60, %v1553_v60  ;;  %v2613_v21 = vpack.i.b16 %v1561_v29, %v1561_v29 }
 0x19b   : > { %v1621_v38 = vrot.slane %v7070_v53, %v5823_v14  ;;  %v1629_v48 = vrot.slane %v7070_v53, %v5825_v15  ;;  %v1617_v19 = vrot.slane %v7070_v53, %v5805_v5  ;;  %v1625_v49 = vrot.slane %v7070_v53, %v7935_v0 }
 0x19c   : > { %v2611_v20 = vrot.slane %v2606_v2, %v5805_v5  ;;  %v2625_v4 = vrot.slane %v2620_v18, %v5805_v5  ;;  %v2604_v57 = vrot.slane %v2599_v30, %v5805_v5  ;;  %v2618_v55 = vrot.slane %v2613_v21, %v5805_v5 }
 0x19d   : > { %v2718_v39 = vpack.i.b16 %v1621_v38, %v1621_v38  ;;  %v2732_v40 = vpack.i.b16 %v1629_v48, %v1629_v48  ;;  %v2711_v12 = vpack.i.b16 %v1617_v19, %v1617_v19  ;;  %v2725_v45 = vpack.i.b16 %v1625_v49, %v1625_v49 }
 0x19e   : > { %v4343_v46 = vmul.bf16 %v2611_v20, %v6970_v54  ;;  %v4345_v17 = vmul.bf16 %v2625_v4, %v6974_v13  ;;  %v4342_v37 = vmul.bf16 %v2604_v57, %v6968_v33  ;;  %v4344_v24 = vmul.bf16 %v2618_v55, %v6972_v58 }
 0x19f   : > { %v2723_v60 = vrot.slane %v2718_v39, %v5805_v5  ;;  %v2737_v29 = vrot.slane %v2732_v40, %v5805_v5  ;;  %v2716_v2 = vrot.slane %v2711_v12, %v5805_v5  ;;  %v2730_v18 = vrot.slane %v2725_v45, %v5805_v5 }
 0x1a0   : > { %4826 = vmatprep.subr.bf16.mxu0 %v4343_v46  ;;  %4879 = vmatprep.subr.bf16.mxu1 %v4345_v17  ;;  %v2830_v30 = vpack.i.b16 %v1685_v56, %v1685_v56  ;;  %v2844_v21 = vpack.i.b16 %v1693_v42, %v1693_v42  ;;  %v2823_v38 = vpack.i.b16 %v1681_v61, %v1681_v61  ;;  %v461_v48 = vsub.f32 1.0, %v7030_v26 }
 0x1a1   : > { %4827 = vmatpush1.bf16.msra.mxu0 %v4342_v37  ;;  %4880 = vmatpush1.bf16.msra.mxu1 %v4344_v24  ;;  %v4359_v19 = vmul.bf16 %v2723_v60, %v6970_v54  ;;  %v4361_v49 = vmul.bf16 %v2737_v29, %v6974_v13  ;;  %v4358_v20 = vmul.bf16 %v2716_v2, %v6968_v33  ;;  %v7102_v4 = vmax.f32 %v454_v7, 0.0 }
 0x1a2   : > { %v4360_v57 = vmul.bf16 %v2730_v18, %v6972_v58  ;;  %v2835_v55 = vrot.slane %v2830_v30, %v5805_v5  ;;  %v2849_v56 = vrot.slane %v2844_v21, %v5805_v5  ;;  %v2828_v42 = vrot.slane %v2823_v38, %v5805_v5 }
 0x1a3   : > { %4828 = vmatprep.subr.bf16.mxu0 %v4359_v19  ;;  %4881 = vmatprep.subr.bf16.mxu1 %v4361_v49  ;;  %v1689_v61 = vrot.slane %v7049_v6, %v7935_v0  ;;  %v7110_v39 = vpack.i.b16 %v1461_v3, %v1461_v3  ;;  %v1813_v40 = vrot.slane %v7054_v43, %v5823_v14  ;;  %v7116_v7 = vmax.f32 %v455_v9, 0.0 }
 0x1a4   : > { %v4375_v12 = vmul.bf16 %v2835_v55, %v6970_v54  ;;  %v4377_v45 = vmul.bf16 %v2849_v56, %v6974_v13  ;;  %v4374_v46 = vmul.bf16 %v2828_v42, %v6968_v33  ;;  %v1821_v17 = vrot.slane %v7054_v43, %v5825_v15 }
 0x1a5   : > { %4829 = vmatpush1.bf16.msra.mxu0 %v4358_v20  ;;  %4882 = vmatpush1.bf16.msra.mxu1 %v4360_v57  ;;  %v2837_v3 = vpack.i.b16 %v1689_v61, %v1689_v61  ;;  %v1749_v37 = vrot.slane %v7110_v39, %v5823_v14  ;;  %v1757_v11 = vrot.slane %v7110_v39, %v5825_v15  ;;  %v7129_v9 = vmax.f32 %v456_v59, 0.0 }
 0x1a6   : > { %4830 = vmatprep.subr.bf16.mxu0 %v4375_v12  ;;  %4883 = vmatprep.subr.bf16.mxu1 %v4377_v45  ;;  %v1745_v24 = vrot.slane %v7110_v39, %v5805_v5  ;;  %v1753_v60 = vrot.slane %v7110_v39, %v7935_v0  ;;  %v3054_v29 = vpack.i.b16 %v1813_v40, %v1813_v40  ;;  %v7137_v2 = vmax.f32 %v457_v41, 0.0 }
 0x1a7   : > { %v2842_v18 = vrot.slane %v2837_v3, %v5805_v5  ;;  %v2942_v30 = vpack.i.b16 %v1749_v37, %v1749_v37  ;;  %v2956_v21 = vpack.i.b16 %v1757_v11, %v1757_v11  ;;  %v3068_v1 = vpack.i.b16 %v1821_v17, %v1821_v17 }
 0x1a8   : > { %v2935_v59 = vpack.i.b16 %v1745_v24, %v1745_v24  ;;  %v2949_v38 = vpack.i.b16 %v1753_v60, %v1753_v60  ;;  %v3059_v19 = vrot.slane %v3054_v29, %v5805_v5  ;;  %v1809_v49 = vrot.slane %v7054_v43, %v5805_v5 }
 0x1a9   : > { %4831 = vmatpush1.bf16.msra.mxu0 %v4374_v46  ;;  %v4376_v20 = vmul.bf16 %v2842_v18, %v6972_v58  ;;  %v2947_v57 = vrot.slane %v2942_v30, %v5805_v5  ;;  %v2961_v32 = vrot.slane %v2956_v21, %v5805_v5  ;;  %v3073_v41 = vrot.slane %v3068_v1, %v5805_v5 }
 0x1aa   : > { %v2940_v55 = vrot.slane %v2935_v59, %v5805_v5  ;;  %v2954_v56 = vrot.slane %v2949_v38, %v5805_v5  ;;  %v4407_v42 = vmul.bf16 %v3059_v19, %v6970_v54  ;;  %v3047_v61 = vpack.i.b16 %v1809_v49, %v1809_v49 }
 0x1ab   : > { %4884 = vmatpush1.bf16.msra.mxu1 %v4376_v20  ;;  %v4391_v40 = vmul.bf16 %v2947_v57, %v6970_v54  ;;  %v4393_v12 = vmul.bf16 %v2961_v32, %v6974_v13  ;;  %v4409_v45 = vmul.bf16 %v3073_v41, %v6974_v13  ;;  %v1817_v46 = vrot.slane %v7054_v43, %v7935_v0 }
 0x1ac   : > { %v4390_v17 = vmul.bf16 %v2940_v55, %v6968_v33  ;;  %v4392_v3 = vmul.bf16 %v2954_v56, %v6972_v58  ;;  %v3052_v37 = vrot.slane %v3047_v61, %v5805_v5  ;;  %v7161_v11 = vpack.i.b16 %v1465_v50, %v1465_v50 }
 0x1ad   : > { %4832 = vmatprep.subr.bf16.mxu0 %v4391_v40  ;;  %4885 = vmatprep.subr.bf16.mxu1 %v4393_v12  ;;  %v3061_v24 = vpack.i.b16 %v1817_v46, %v1817_v46  ;;  %v1941_v60 = vrot.slane %v7059_v27, %v5823_v14  ;;  %v1949_v29 = vrot.slane %v7059_v27, %v5825_v15  ;;  %v490_v18 = vmax.f32 %v458_v34, 0.0 }
 0x1ae   : > { %4833 = vmatpush1.bf16.msra.mxu0 %v4390_v17  ;;  %v4406_v30 = vmul.bf16 %v3052_v37, %v6968_v33  ;;  %v1877_v44 = vrot.slane %v7161_v11, %v5823_v14  ;;  %v1885_v50 = vrot.slane %v7161_v11, %v5825_v15  ;;  %v1873_v21 = vrot.slane %v7161_v11, %v5805_v5 }
 0x1af   : > { %4886 = vmatpush1.bf16.msra.mxu1 %v4392_v3  ;;  %4834 = vmatprep.subr.bf16.mxu0 %v4407_v42  ;;  %v3066_v1 = vrot.slane %v3061_v24, %v5805_v5  ;;  %v1881_v62 = vrot.slane %v7161_v11, %v7935_v0  ;;  %v3278_v34 = vpack.i.b16 %v1941_v60, %v1941_v60  ;;  %v491_v59 = vmax.f32 %v459_v22, 0.0 }
 0x1b0   : > { %4887 = vmatprep.subr.bf16.mxu1 %v4409_v45  ;;  %v3166_v38 = vpack.i.b16 %v1877_v44, %v1877_v44  ;;  %v3180_v19 = vpack.i.b16 %v1885_v50, %v1885_v50  ;;  %v3159_v49 = vpack.i.b16 %v1873_v21, %v1873_v21  ;;  %v3292_v20 = vpack.i.b16 %v1949_v29, %v1949_v29 }
 0x1b1   : > { %v4408_v57 = vmul.bf16 %v3066_v1, %v6972_v58  ;;  %v3173_v32 = vpack.i.b16 %v1881_v62, %v1881_v62  ;;  %v3283_v41 = vrot.slane %v3278_v34, %v5805_v5  ;;  %v1937_v55 = vrot.slane %v7059_v27, %v5805_v5 }
 0x1b2   : > { %4835 = vmatpush1.bf16.msra.mxu0 %v4406_v30  ;;  %v3171_v56 = vrot.slane %v3166_v38, %v5805_v5  ;;  %v3185_v42 = vrot.slane %v3180_v19, %v5805_v5  ;;  %v3164_v28 = vrot.slane %v3159_v49, %v5805_v5  ;;  %v3297_v22 = vrot.slane %v3292_v20, %v5805_v5 }
 0x1b3   : > { %4888 = vmatpush1.bf16.msra.mxu1 %v4408_v57  ;;  %v3178_v61 = vrot.slane %v3173_v32, %v5805_v5  ;;  %v4439_v40 = vmul.bf16 %v3283_v41, %v6970_v54  ;;  %v3271_v12 = vpack.i.b16 %v1937_v55, %v1937_v55  ;;  %v1945_v45 = vrot.slane %v7059_v27, %v7935_v0 }
 0x1b4   : > { %v4423_v46 = vmul.bf16 %v3171_v56, %v6970_v54  ;;  %v4425_v17 = vmul.bf16 %v3185_v42, %v6974_v13  ;;  %v4422_v3 = vmul.bf16 %v3164_v28, %v6968_v33  ;;  %v4441_v37 = vmul.bf16 %v3297_v22, %v6974_v13 }
 0x1b5   : > { %v4424_v24 = vmul.bf16 %v3178_v61, %v6972_v58  ;;  %v3276_v60 = vrot.slane %v3271_v12, %v5805_v5  ;;  %v3285_v29 = vpack.i.b16 %v1945_v45, %v1945_v45  ;;  %v7202_v30 = vpack.i.b16 %v1469_v51, %v1469_v51 }
 0x1b6   : > { %4836 = vmatprep.subr.bf16.mxu0 %v4423_v46  ;;  %4889 = vmatprep.subr.bf16.mxu1 %v4425_v17  ;;  %v492_v44 = vmax.f32 %v460_v31, 0.0  ;;  %v493_v50 = vmax.f32 %v461_v48, 0.0  ;;  %v678_v1 = vsel %vm646_vm12, %v7102_v4, 0.0  ;;  %v679_v34 = vsel %vm647_vm13, %v7116_v7, 0.0 }
 0x1b7   : > { %4837 = vmatpush1.bf16.msra.mxu0 %v4422_v3  ;;  %4890 = vmatpush1.bf16.msra.mxu1 %v4424_v24  ;;  %v4438_v25 = vmul.bf16 %v3276_v60, %v6968_v33  ;;  %v3290_v51 = vrot.slane %v3285_v29, %v5805_v5  ;;  %v2005_v23 = vrot.slane %v7202_v30, %v5823_v14  ;;  %v680_v31 = vsel %vm648_vm14, %v7129_v9, 0.0 }
 0x1b8   : > { %4838 = vmatprep.subr.bf16.mxu0 %v4439_v40  ;;  %4891 = vmatprep.subr.bf16.mxu1 %v4441_v37  ;;  %v2013_v48 = vrot.slane %v7202_v30, %v5825_v15  ;;  %v2001_v4 = vrot.slane %v7202_v30, %v5805_v5  ;;  %v2009_v7 = vrot.slane %v7202_v30, %v7935_v0  ;;  %v681_v19 = vsel %vm649_vm15, %v7137_v2, 0.0 }
 0x1b9   : > { %v4440_v49 = vmul.bf16 %v3290_v51, %v6972_v58  ;;  %v3390_v20 = vpack.i.b16 %v2005_v23, %v2005_v23  ;;  %v682_v9 = vsel %vm650_vm0, %v490_v18, 0.0  ;;  %v683_v41 = vsel %vm651_vm1, %v491_v59, 0.0  ;;  %v7944_v23 = vld [vmem:[#allocation17_spill] sm:$0xff] }
 0x1ba   : > { %v3404_v55 = vpack.i.b16 %v2013_v48, %v2013_v48  ;;  %v3383_v56 = vpack.i.b16 %v2001_v4, %v2001_v4  ;;  %v3397_v42 = vpack.i.b16 %v2009_v7, %v2009_v7  ;;  %v684_v22 = vsel %vm652_vm2, %v492_v44, 0.0 }
 0x1bb   : > { %4839 = vmatpush1.bf16.msra.mxu0 %v4438_v25  ;;  %4892 = vmatpush1.bf16.msra.mxu1 %v4440_v49  ;;  %v3395_v61 = vrot.slane %v3390_v20, %v5805_v5  ;;  %v685_v40 = vsel %vm653_vm3, %v493_v50, 0.0  ;;  %v5234_v12 = vpack.c.bf16 %v679_v34, %v678_v1  ;;  %v5236_v45 = vpack.c.bf16 %v681_v19, %v680_v31  ;;  %v7945_v31 = vld [vmem:[#allocation18_spill] sm:$0xff] }
 0x1bc   : > { %v3409_v18 = vrot.slane %v3404_v55, %v5805_v5  ;;  %v3388_v46 = vrot.slane %v3383_v56, %v5805_v5  ;;  %v3402_v59 = vrot.slane %v3397_v42, %v5805_v5  ;;  %v5238_v17 = vpack.c.bf16 %v683_v41, %v682_v9 }
 0x1bd   : > { %v4455_v3 = vmul.bf16 %v3395_v61, %v6970_v54  ;;  %v5240_v37 = vpack.c.bf16 %v685_v40, %v684_v22  ;;  %v1339_v24 = vrot.slane %v5234_v12, %v5857_v36  ;;  %v1353_v60 = vrot.slane %v5236_v45, %v5857_v36 }
 0x1be   : > { %v4457_v29 = vmul.bf16 %v3409_v18, %v6974_v13  ;;  %v4454_v44 = vmul.bf16 %v3388_v46, %v6968_v33  ;;  %v4456_v50 = vmul.bf16 %v3402_v59, %v6972_v58  ;;  %v1367_v21 = vrot.slane %v5238_v17, %v5857_v36 }
 0x1bf   : > { %4840 = vmatprep.subr.bf16.mxu0 %v4455_v3  ;;  %v1381_v1 = vrot.slane %v5240_v37, %v5857_v36  ;;  %v1384_v62 = vcombine.low %v1339_v24, %v1353_v60  ;;  %v1385_v34 = vcombine.high %v1339_v24, %v1353_v60  ;;  %v1573_v25 = vrot.slane %v7045_v10, %v5827_v16 }
 0x1c0   : > { %4893 = vmatprep.subr.bf16.mxu1 %v4457_v29  ;;  %4841 = vmatpush1.bf16.msra.mxu0 %v4454_v44  ;;  %v1581_v51 = vrot.slane %v7045_v10, %v5855_v35  ;;  %v1569_v26 = vrot.slane %v7045_v10, %v7944_v23  ;;  %v1577_v48 = vrot.slane %v7045_v10, %v7945_v31 }
 0x1c1   : > { %4894 = vmatpush1.bf16.msra.mxu1 %v4456_v50  ;;  %v1388_v4 = vcombine.low %v1367_v21, %v1381_v1  ;;  %v1403_v7 = vrot.slane %v1384_v62, %v5857_v36  ;;  %v1389_v38 = vcombine.high %v1367_v21, %v1381_v1  ;;  %v1417_v19 = vrot.slane %v1385_v34, %v5857_v36 }
 0x1c2   : > { %v2634_v49 = vpack.i.b16 %v1573_v25, %v1573_v25  ;;  %v2648_v20 = vpack.i.b16 %v1581_v51, %v1581_v51  ;;  %v2627_v57 = vpack.i.b16 %v1569_v26, %v1569_v26  ;;  %v2641_v9 = vpack.i.b16 %v1577_v48, %v1577_v48 }
 0x1c3   : > { %v1431_v32 = vrot.slane %v1388_v4, %v5857_v36  ;;  %v1445_v41 = vrot.slane %v1389_v38, %v5857_v36  ;;  %v7297_v17 = vrot.slane %v7070_v53, %v5827_v16  ;;  %v7310_v60 = vrot.slane %v7070_v53, %v5855_v35 }
 0x1c4   : > { %v7264_v55 = vrot.slane %v2634_v49, %v5805_v5  ;;  %v7267_v10 = vrot.slane %v2648_v20, %v5805_v5  ;;  %v7270_v56 = vrot.slane %v2627_v57, %v5805_v5  ;;  %v7273_v42 = vrot.slane %v2641_v9, %v5805_v5 }
 0x1c5   : > { %v1448_v28 = vcombine.low %v1403_v7, %v1431_v32  ;;  %v7275_v22 = vcombine.low %v1417_v19, %v1445_v41  ;;  %v7277_v61 = vcombine.high %v1403_v7, %v1431_v32  ;;  %v7279_v2 = vcombine.high %v1417_v19, %v1445_v41 }
 0x1c6   : > { %v4347_v36 = vmul.bf16 %v7264_v55, %v6978_v63  ;;  %v4349_v40 = vmul.bf16 %v7267_v10, %v6982_v47  ;;  %v4346_v12 = vmul.bf16 %v7270_v56, %v6976_v52  ;;  %v4348_v45 = vmul.bf16 %v7273_v42, %v6980_v8 }
 0x1c7   : > { %v7289_v18 = vpack.i.b16 %v1448_v28, %v1448_v28  ;;  %v1473_v46 = vunpack.i.h.s16 %v1448_v28  ;;  %v7293_v59 = vpack.i.b16 %v7275_v22, %v7275_v22  ;;  %v1477_v3 = vunpack.i.h.s16 %v7275_v22 }
 0x1c8   : > { %v7302_v37 = vpack.i.b16 %v7277_v61, %v7277_v61  ;;  %v7306_v24 = vpack.i.b16 %v7279_v2, %v7279_v2  ;;  %v1761_v10 = vrot.slane %v7110_v39, %v7944_v23  ;;  %v1829_v42 = vrot.slane %v7054_v43, %v5827_v16 }
 0x1c9   : > { %v2069_v29 = vrot.slane %v7289_v18, %v5823_v14  ;;  %v2077_v44 = vrot.slane %v7289_v18, %v5825_v15  ;;  %v2065_v50 = vrot.slane %v7289_v18, %v5805_v5  ;;  %v2073_v21 = vrot.slane %v7289_v18, %v7935_v0 }
 0x1ca   : > { %v7320_v1 = vpack.i.b16 %v1473_v46, %v1473_v46  ;;  %v2197_v62 = vrot.slane %v7293_v59, %v5823_v14  ;;  %v2205_v34 = vrot.slane %v7293_v59, %v5825_v15  ;;  %v2193_v25 = vrot.slane %v7293_v59, %v5805_v5 }
 0x1cb   : > { %v3502_v51 = vpack.i.b16 %v2069_v29, %v2069_v29  ;;  %v3516_v26 = vpack.i.b16 %v2077_v44, %v2077_v44  ;;  %v3495_v48 = vpack.i.b16 %v2065_v50, %v2065_v50  ;;  %v3509_v4 = vpack.i.b16 %v2073_v21, %v2073_v21 }
 0x1cc   : > { %v2133_v7 = vrot.slane %v7320_v1, %v5823_v14  ;;  %v2141_v38 = vrot.slane %v7320_v1, %v5825_v15  ;;  %v2129_v19 = vrot.slane %v7320_v1, %v5805_v5  ;;  %v2137_v49 = vrot.slane %v7320_v1, %v7935_v0 }
 0x1cd   : > { %v3507_v20 = vrot.slane %v3502_v51, %v5805_v5  ;;  %v3521_v57 = vrot.slane %v3516_v26, %v5805_v5  ;;  %v3500_v9 = vrot.slane %v3495_v48, %v5805_v5  ;;  %v3514_v32 = vrot.slane %v3509_v4, %v5805_v5 }
 0x1ce   : > { %v3614_v41 = vpack.i.b16 %v2133_v7, %v2133_v7  ;;  %v3628_v28 = vpack.i.b16 %v2141_v38, %v2141_v38  ;;  %v3607_v22 = vpack.i.b16 %v2129_v19, %v2129_v19  ;;  %v3621_v46 = vpack.i.b16 %v2137_v49, %v2137_v49 }
 0x1cf   : > { %v4471_v29 = vmul.bf16 %v3507_v20, %v6970_v54  ;;  %v4473_v44 = vmul.bf16 %v3521_v57, %v6974_v13  ;;  %v4470_v50 = vmul.bf16 %v3500_v9, %v6968_v33  ;;  %v4472_v21 = vmul.bf16 %v3514_v32, %v6972_v58 }
 0x1d0   : > { %v3619_v51 = vrot.slane %v3614_v41, %v5805_v5  ;;  %v3633_v26 = vrot.slane %v3628_v28, %v5805_v5  ;;  %v3612_v48 = vrot.slane %v3607_v22, %v5805_v5  ;;  %v3626_v4 = vrot.slane %v3621_v46, %v5805_v5 }
 0x1d1   : > { %4842 = vmatprep.subr.bf16.mxu0 %v4471_v29  ;;  %4895 = vmatprep.subr.bf16.mxu1 %v4473_v44  ;;  %v3726_v7 = vpack.i.b16 %v2197_v62, %v2197_v62  ;;  %v3740_v38 = vpack.i.b16 %v2205_v34, %v2205_v34  ;;  %v3719_v19 = vpack.i.b16 %v2193_v25, %v2193_v25 }
 0x1d2   : > { %4843 = vmatpush1.bf16.msra.mxu0 %v4470_v50  ;;  %4896 = vmatpush1.bf16.msra.mxu1 %v4472_v21  ;;  %v4487_v49 = vmul.bf16 %v3619_v51, %v6970_v54  ;;  %v4489_v20 = vmul.bf16 %v3633_v26, %v6974_v13  ;;  %v4486_v57 = vmul.bf16 %v3612_v48, %v6968_v33 }
 0x1d3   : > { %v4488_v9 = vmul.bf16 %v3626_v4, %v6972_v58  ;;  %v3731_v32 = vrot.slane %v3726_v7, %v5805_v5  ;;  %v3745_v41 = vrot.slane %v3740_v38, %v5805_v5  ;;  %v3724_v28 = vrot.slane %v3719_v19, %v5805_v5 }
 0x1d4   : > { %4844 = vmatprep.subr.bf16.mxu0 %v4487_v49  ;;  %4897 = vmatprep.subr.bf16.mxu1 %v4489_v20  ;;  %v2201_v62 = vrot.slane %v7293_v59, %v7935_v0  ;;  %v7357_v34 = vpack.i.b16 %v1477_v3, %v1477_v3  ;;  %v2325_v25 = vrot.slane %v7302_v37, %v5823_v14  ;;  %v1481_v4 = vunpack.i.h.s16 %v7277_v61 }
 0x1d5   : > { %v4503_v22 = vmul.bf16 %v3731_v32, %v6970_v54  ;;  %v4505_v46 = vmul.bf16 %v3745_v41, %v6974_v13  ;;  %v4502_v29 = vmul.bf16 %v3724_v28, %v6968_v33  ;;  %v2333_v44 = vrot.slane %v7302_v37, %v5825_v15 }
 0x1d6   : > { %4845 = vmatpush1.bf16.msra.mxu0 %v4486_v57  ;;  %4898 = vmatpush1.bf16.msra.mxu1 %v4488_v9  ;;  %v3733_v50 = vpack.i.b16 %v2201_v62, %v2201_v62  ;;  %v2261_v21 = vrot.slane %v7357_v34, %v5823_v14  ;;  %v2269_v3 = vrot.slane %v7357_v34, %v5825_v15 }
 0x1d7   : > { %4846 = vmatprep.subr.bf16.mxu0 %v4503_v22  ;;  %4899 = vmatprep.subr.bf16.mxu1 %v4505_v46  ;;  %v2257_v51 = vrot.slane %v7357_v34, %v5805_v5  ;;  %v2265_v26 = vrot.slane %v7357_v34, %v7935_v0  ;;  %v3950_v48 = vpack.i.b16 %v2325_v25, %v2325_v25 }
 0x1d8   : > { %v3738_v7 = vrot.slane %v3733_v50, %v5805_v5  ;;  %v3838_v38 = vpack.i.b16 %v2261_v21, %v2261_v21  ;;  %v3852_v19 = vpack.i.b16 %v2269_v3, %v2269_v3  ;;  %v3964_v49 = vpack.i.b16 %v2333_v44, %v2333_v44 }
 0x1d9   : > { %v3831_v20 = vpack.i.b16 %v2257_v51, %v2257_v51  ;;  %v3845_v57 = vpack.i.b16 %v2265_v26, %v2265_v26  ;;  %v3955_v9 = vrot.slane %v3950_v48, %v5805_v5  ;;  %v2321_v32 = vrot.slane %v7302_v37, %v5805_v5 }
 0x1da   : > { %4847 = vmatpush1.bf16.msra.mxu0 %v4502_v29  ;;  %v4504_v41 = vmul.bf16 %v3738_v7, %v6972_v58  ;;  %v3843_v28 = vrot.slane %v3838_v38, %v5805_v5  ;;  %v3857_v62 = vrot.slane %v3852_v19, %v5805_v5  ;;  %v3969_v61 = vrot.slane %v3964_v49, %v5805_v5 }
 0x1db   : > { %v3836_v25 = vrot.slane %v3831_v20, %v5805_v5  ;;  %v3850_v22 = vrot.slane %v3845_v57, %v5805_v5  ;;  %v4535_v46 = vmul.bf16 %v3955_v9, %v6970_v54  ;;  %v3943_v44 = vpack.i.b16 %v2321_v32, %v2321_v32 }
 0x1dc   : > { %4900 = vmatpush1.bf16.msra.mxu1 %v4504_v41  ;;  %v4519_v50 = vmul.bf16 %v3843_v28, %v6970_v54  ;;  %v4521_v29 = vmul.bf16 %v3857_v62, %v6974_v13  ;;  %v4537_v21 = vmul.bf16 %v3969_v61, %v6974_v13  ;;  %v2329_v3 = vrot.slane %v7302_v37, %v7935_v0 }
 0x1dd   : > { %v4518_v51 = vmul.bf16 %v3836_v25, %v6968_v33  ;;  %v4520_v26 = vmul.bf16 %v3850_v22, %v6972_v58  ;;  %v3948_v48 = vrot.slane %v3943_v44, %v5805_v5  ;;  %v7394_v7 = vpack.i.b16 %v1481_v4, %v1481_v4 }
 0x1de   : > { %4848 = vmatprep.subr.bf16.mxu0 %v4519_v50  ;;  %4901 = vmatprep.subr.bf16.mxu1 %v4521_v29  ;;  %v3957_v38 = vpack.i.b16 %v2329_v3, %v2329_v3  ;;  %v2453_v19 = vrot.slane %v7306_v24, %v5823_v14  ;;  %v2461_v49 = vrot.slane %v7306_v24, %v5825_v15  ;;  %v1485_v62 = vunpack.i.h.s16 %v7279_v2 }
 0x1df   : > { %4849 = vmatpush1.bf16.msra.mxu0 %v4518_v51  ;;  %v4534_v20 = vmul.bf16 %v3948_v48, %v6968_v33  ;;  %v2389_v57 = vrot.slane %v7394_v7, %v5823_v14  ;;  %v2397_v9 = vrot.slane %v7394_v7, %v5825_v15  ;;  %v2385_v4 = vrot.slane %v7394_v7, %v5805_v5 }
 0x1e0   : > { %4902 = vmatpush1.bf16.msra.mxu1 %v4520_v26  ;;  %4850 = vmatprep.subr.bf16.mxu0 %v4535_v46  ;;  %v3962_v32 = vrot.slane %v3957_v38, %v5805_v5  ;;  %v2393_v41 = vrot.slane %v7394_v7, %v7935_v0  ;;  %v4174_v28 = vpack.i.b16 %v2453_v19, %v2453_v19 }
 0x1e1   : > { %4903 = vmatprep.subr.bf16.mxu1 %v4537_v21  ;;  %v4062_v61 = vpack.i.b16 %v2389_v57, %v2389_v57  ;;  %v4076_v25 = vpack.i.b16 %v2397_v9, %v2397_v9  ;;  %v4055_v22 = vpack.i.b16 %v2385_v4, %v2385_v4  ;;  %v4188_v44 = vpack.i.b16 %v2461_v49, %v2461_v49 }
 0x1e2   : > { %v4536_v50 = vmul.bf16 %v3962_v32, %v6972_v58  ;;  %v4069_v29 = vpack.i.b16 %v2393_v41, %v2393_v41  ;;  %v4179_v3 = vrot.slane %v4174_v28, %v5805_v5  ;;  %v2449_v46 = vrot.slane %v7306_v24, %v5805_v5 }
 0x1e3   : > { %4851 = vmatpush1.bf16.msra.mxu0 %v4534_v20  ;;  %v4067_v51 = vrot.slane %v4062_v61, %v5805_v5  ;;  %v4081_v26 = vrot.slane %v4076_v25, %v5805_v5  ;;  %v4060_v2 = vrot.slane %v4055_v22, %v5805_v5  ;;  %v4193_v21 = vrot.slane %v4188_v44, %v5805_v5 }
 0x1e4   : > { %4904 = vmatpush1.bf16.msra.mxu1 %v4536_v50  ;;  %v4074_v48 = vrot.slane %v4069_v29, %v5805_v5  ;;  %v4567_v38 = vmul.bf16 %v4179_v3, %v6970_v54  ;;  %v4167_v19 = vpack.i.b16 %v2449_v46, %v2449_v46  ;;  %v2457_v49 = vrot.slane %v7306_v24, %v7935_v0 }
 0x1e5   : > { %v4551_v57 = vmul.bf16 %v4067_v51, %v6970_v54  ;;  %v4553_v20 = vmul.bf16 %v4081_v26, %v6974_v13  ;;  %v4550_v9 = vmul.bf16 %v4060_v2, %v6968_v33  ;;  %v4569_v4 = vmul.bf16 %v4193_v21, %v6974_v13 }
 0x1e6   : > { %v4552_v32 = vmul.bf16 %v4074_v48, %v6972_v58  ;;  %v4172_v41 = vrot.slane %v4167_v19, %v5805_v5  ;;  %v4181_v28 = vpack.i.b16 %v2457_v49, %v2457_v49  ;;  %v7429_v61 = vpack.i.b16 %v1485_v62, %v1485_v62 }
 0x1e7   : > { %4852 = vmatprep.subr.bf16.mxu0 %v4551_v57  ;;  %4905 = vmatprep.subr.bf16.mxu1 %v4553_v20  ;;  %v2746_v25 = vpack.i.b16 %v7297_v17, %v7297_v17  ;;  %v2760_v22 = vpack.i.b16 %v7310_v60, %v7310_v60  ;;  %v1633_v44 = vrot.slane %v7070_v53, %v7944_v23 }
 0x1e8   : > { %4853 = vmatpush1.bf16.msra.mxu0 %v4550_v9  ;;  %4906 = vmatpush1.bf16.msra.mxu1 %v4552_v32  ;;  %v4566_v50 = vmul.bf16 %v4172_v41, %v6968_v33  ;;  %v4186_v29 = vrot.slane %v4181_v28, %v5805_v5  ;;  %v2517_v62 = vrot.slane %v7429_v61, %v5823_v14 }
 0x1e9   : > { %4854 = vmatprep.subr.bf16.mxu0 %v4567_v38  ;;  %4907 = vmatprep.subr.bf16.mxu1 %v4569_v4  ;;  %v2525_v17 = vrot.slane %v7429_v61, %v5825_v15  ;;  %v2513_v60 = vrot.slane %v7429_v61, %v5805_v5  ;;  %v2521_v3 = vrot.slane %v7429_v61, %v7935_v0 }
 0x1ea   : > { %v4568_v46 = vmul.bf16 %v4186_v29, %v6972_v58  ;;  %v4286_v51 = vpack.i.b16 %v2517_v62, %v2517_v62  ;;  %v7449_v26 = vrot.slane %v2746_v25, %v5805_v5  ;;  %v7452_v2 = vrot.slane %v2760_v22, %v5805_v5 }
 0x1eb   : > { %v4300_v14 = vpack.i.b16 %v2525_v17, %v2525_v17  ;;  %v4279_v21 = vpack.i.b16 %v2513_v60, %v2513_v60  ;;  %v4293_v48 = vpack.i.b16 %v2521_v3, %v2521_v3  ;;  %v2739_v15 = vpack.i.b16 %v1633_v44, %v1633_v44 }
 0x1ec   : > { %4855 = vmatpush1.bf16.msra.mxu0 %v4566_v50  ;;  %4908 = vmatpush1.bf16.msra.mxu1 %v4568_v46  ;;  %v4291_v38 = vrot.slane %v4286_v51, %v5805_v5  ;;  %v4363_v0 = vmul.bf16 %v7449_v26, %v6978_v63  ;;  %v4365_v19 = vmul.bf16 %v7452_v2, %v6982_v47 }
 0x1ed   : > { %v4305_v49 = vrot.slane %v4300_v14, %v5805_v5  ;;  %v4284_v57 = vrot.slane %v4279_v21, %v5805_v5  ;;  %v4298_v20 = vrot.slane %v4293_v48, %v5805_v5  ;;  %v7464_v9 = vrot.slane %v2739_v15, %v5805_v5 }
 0x1ee   : > { %v4583_v4 = vmul.bf16 %v4291_v38, %v6970_v54  ;;  %v1641_v32 = vrot.slane %v7070_v53, %v7945_v31  ;;  %v1701_v41 = vrot.slane %v7049_v6, %v5827_v16  ;;  %v1709_v28 = vrot.slane %v7049_v6, %v5855_v35  ;;  %v4648_v29 = vpop.f32.mrb[0].mxu0 }
 0x1ef   : > { %v4585_v25 = vmul.bf16 %v4305_v49, %v6974_v13  ;;  %v4582_v22 = vmul.bf16 %v4284_v57, %v6968_v33  ;;  %v4584_v44 = vmul.bf16 %v4298_v20, %v6972_v58  ;;  %v4362_v50 = vmul.bf16 %v7464_v9, %v6976_v52  ;;  %5038 = vst [vmem:[%s7480_s13] sm:$0xff] %v4648_v29  ;;  %v4701_v33 = vpop.f32.mrb[0].mxu1  ;;  %v4650_v58 = vpop.f32.mrb[1].mxu0  ;;  %v7505_v57 = vld [vmem:[%s5799_s18] ss:$8 sps:$4 sm:$0xff]  }
 0x1f0   : > { %4856 = vmatprep.subr.bf16.mxu0 %v4583_v4  ;;  %v2753_v54 = vpack.i.b16 %v1641_v32, %v1641_v32  ;;  %v2858_v62 = vpack.i.b16 %v1701_v41, %v1701_v41  ;;  %v2872_v53 = vpack.i.b16 %v1709_v28, %v1709_v28  ;;  %v1697_v17 = vrot.slane %v7049_v6, %v7944_v23  ;;  %v4703_v46 = vpop.f32.mrb[1].mxu1  ;;  %v4652_v51 = vpop.f32.mrb[2].mxu0 }
 0x1f1   : > { %4909 = vmatprep.subr.bf16.mxu1 %v4585_v25  ;;  %4857 = vmatpush1.bf16.msra.mxu0 %v4582_v22  ;;  %v1705_v13 = vrot.slane %v7049_v6, %v7945_v31  ;;  %v1765_v60 = vrot.slane %v7110_v39, %v5827_v16  ;;  %v1773_v3 = vrot.slane %v7110_v39, %v5855_v35  ;;  %v4705_v21 = vpop.f32.mrb[2].mxu1  ;;  %v4654_v48 = vpop.f32.mrb[3].mxu0 }
 0x1f2   : > { %5040 = vst [vmem:[%s7480_s13 + $0x10] sm:$0xff] %v4701_v33  ;;  %5039 = vst [vmem:[%s7480_s13 + $0x8] sm:$0xff] %v4650_v58  ;;  %4910 = vmatpush1.bf16.msra.mxu1 %v4584_v44  ;;  %4932 = vmatprep.subr.bf16.mxu0 %v4347_v36  ;;  %v2758_v6 = vrot.slane %v2753_v54, %v5805_v5  ;;  %v2863_v26 = vrot.slane %v2858_v62, %v5805_v5  ;;  %v4707_v49 = vpop.f32.mrb[3].mxu1  ;;  %v7540_v62 = vld [vmem:[%s5799_s18 + $0x14] ss:$8 sps:$4 sm:$0xff]  }
 0x1f3   : > { %v2877_v14 = vrot.slane %v2872_v53, %v5805_v5  ;;  %5041 = vst [vmem:[%s7480_s13 + $0x18] sm:$0xff] %v4703_v46  ;;  %5054 = vst [vmem:[%s7480_s13 + $0x80] sm:$0xff] %v4652_v51  ;;  %4985 = vmatprep.subr.bf16.mxu1 %v4349_v40  ;;  %v2851_v15 = vpack.i.b16 %v1697_v17, %v1697_v17  ;;  %v2865_v38 = vpack.i.b16 %v1705_v13, %v1705_v13 }
 0x1f4   : > { %v2970_v55 = vpack.i.b16 %v1765_v60, %v1765_v60  ;;  %v2984_v36 = vpack.i.b16 %v1773_v3, %v1773_v3  ;;  %5056 = vst [vmem:[%s7480_s13 + $0x90] sm:$0xff] %v4705_v21  ;;  %5055 = vst [vmem:[%s7480_s13 + $0x88] sm:$0xff] %v4654_v48  ;;  %4859 = vmatmul.mubr.bf16.vlgmr.msra.gmra.mrb[16].mxu0 %v7505_v57  ;;  %v4364_v20 = vmul.bf16 %v2758_v6, %v6980_v8 }
 0x1f5   : > { %v4379_v4 = vmul.bf16 %v2863_v26, %v6978_v63  ;;  %v4381_v32 = vmul.bf16 %v2877_v14, %v6982_v47  ;;  %5057 = vst [vmem:[%s7480_s13 + $0x98] sm:$0xff] %v4707_v49  ;;  %4912 = vmatmul.mubr.bf16.vlgmr.msra.gmra.mrb[16].mxu1 %v7505_v57  ;;  %4933 = vmatpush1.bf16.msra.mxu0 %v4346_v12 }
 0x1f6   : > { %v2856_v40 = vrot.slane %v2851_v15, %v5805_v5  ;;  %v2870_v41 = vrot.slane %v2865_v38, %v5805_v5  ;;  %v2975_v28 = vrot.slane %v2970_v55, %v5805_v5  ;;  %4986 = vmatpush1.bf16.msra.mxu1 %v4348_v45  ;;  %4934 = vmatprep.subr.bf16.mxu0 %v4363_v0 }
 0x1f7   : > { %v2989_v25 = vrot.slane %v2984_v36, %v5805_v5  ;;  %v2963_v22 = vpack.i.b16 %v1761_v10, %v1761_v10  ;;  %v1769_v44 = vrot.slane %v7110_v39, %v7945_v31  ;;  %4987 = vmatprep.subr.bf16.mxu1 %v4365_v19  ;;  %v1837_v39 = vrot.slane %v7054_v43, %v5855_v35 }
 0x1f8   : > { %v4378_v56 = vmul.bf16 %v2856_v40, %v6976_v52  ;;  %v4380_v12 = vmul.bf16 %v2870_v41, %v6980_v8  ;;  %v4395_v29 = vmul.bf16 %v2975_v28, %v6978_v63  ;;  %4868 = vmatprep.mubr.bf16.mxu0 %v7540_v62  ;;  %v3082_v2 = vpack.i.b16 %v1829_v42, %v1829_v42  ;;  %v7579_v28 = vld [vmem:[%s5799_s18 + $0x10] ss:$8 sps:$4 sm:$0xff]  }
 0x1f9   : > { %v4397_v45 = vmul.bf16 %v2989_v25, %v6982_v47  ;;  %v2968_v0 = vrot.slane %v2963_v22, %v5805_v5  ;;  %v2977_v54 = vpack.i.b16 %v1769_v44, %v1769_v44  ;;  %4935 = vmatpush1.bf16.msra.mxu0 %v4362_v50  ;;  %v1825_v19 = vrot.slane %v7054_v43, %v7944_v23 }
 0x1fa   : > { %v1833_v53 = vrot.slane %v7054_v43, %v7945_v31  ;;  %v1893_v17 = vrot.slane %v7161_v11, %v5827_v16  ;;  %4988 = vmatpush1.bf16.msra.mxu1 %v4364_v20  ;;  %4936 = vmatprep.subr.bf16.mxu0 %v4379_v4  ;;  %v3096_v13 = vpack.i.b16 %v1837_v39, %v1837_v39 }
 0x1fb   : > { %v4394_v33 = vmul.bf16 %v2968_v0, %v6976_v52  ;;  %v2982_v58 = vrot.slane %v2977_v54, %v5805_v5  ;;  %4989 = vmatprep.subr.bf16.mxu1 %v4381_v32  ;;  %v3087_v9 = vrot.slane %v3082_v2, %v5805_v5  ;;  %v3075_v50 = vpack.i.b16 %v1825_v19, %v1825_v19 }
 0x1fc   : > { %v3089_v60 = vpack.i.b16 %v1833_v53, %v1833_v53  ;;  %v3194_v3 = vpack.i.b16 %v1893_v17, %v1893_v17  ;;  %v3101_v43 = vrot.slane %v3096_v13, %v5805_v5  ;;  %v1901_v51 = vrot.slane %v7161_v11, %v5855_v35  ;;  %4921 = vmatprep.mubr.bf16.mxu1 %v7540_v62 }
 0x1fd   : > { %v4396_v46 = vmul.bf16 %v2982_v58, %v6980_v8  ;;  %v1889_v6 = vrot.slane %v7161_v11, %v7944_v23  ;;  %4937 = vmatpush1.bf16.msra.mxu0 %v4378_v56  ;;  %v4411_v26 = vmul.bf16 %v3087_v9, %v6978_v63  ;;  %v3080_v14 = vrot.slane %v3075_v50, %v5805_v5 }
 0x1fe   : > { %v3094_v21 = vrot.slane %v3089_v60, %v5805_v5  ;;  %v3199_v48 = vrot.slane %v3194_v3, %v5805_v5  ;;  %4990 = vmatpush1.bf16.msra.mxu1 %v4380_v12  ;;  %4938 = vmatprep.subr.bf16.mxu0 %v4395_v29  ;;  %v4413_v15 = vmul.bf16 %v3101_v43, %v6982_v47 }
 0x1ff   : > { %v3208_v38 = vpack.i.b16 %v1901_v51, %v1901_v51  ;;  %v3187_v55 = vpack.i.b16 %v1889_v6, %v1889_v6  ;;  %4991 = vmatprep.subr.bf16.mxu1 %v4397_v45  ;;  %v4410_v36 = vmul.bf16 %v3080_v14, %v6976_v52  ;;  %v1897_v4 = vrot.slane %v7161_v11, %v7945_v31  ;;  %v4658_v25 = vpop.f32.mrb[4].mxu0 }
 0x200   : > { %v4412_v49 = vmul.bf16 %v3094_v21, %v6980_v8  ;;  %v4427_v20 = vmul.bf16 %v3199_v48, %v6978_v63  ;;  %v1957_v40 = vrot.slane %v7059_v27, %v5827_v16  ;;  %v1965_v41 = vrot.slane %v7059_v27, %v5855_v35  ;;  %4869 = vmatmul.mubr.bf16.gmra.mrb[20].mxu0 %v7579_v28  ;;  %v4660_v12 = vpop.f32.mrb[5].mxu0 }
 0x201   : > { %v3213_v32 = vrot.slane %v3208_v38, %v5805_v5  ;;  %v3192_v10 = vrot.slane %v3187_v55, %v5805_v5  ;;  %4939 = vmatpush1.bf16.msra.mxu0 %v4394_v33  ;;  %v3201_v22 = vpack.i.b16 %v1897_v4, %v1897_v4  ;;  %v1953_v11 = vrot.slane %v7059_v27, %v7944_v23  ;;  %v4662_v0 = vpop.f32.mrb[6].mxu0  ;;  %v5366_v55 = vld [vmem:[%s5799_s18 + $0x4] ss:$8 sps:$4 sm:$0xff]  }
 0x202   : > { %v1961_v44 = vrot.slane %v7059_v27, %v7945_v31  ;;  %v2021_v56 = vrot.slane %v7202_v30, %v5827_v16  ;;  %5070 = vst [vmem:[%s7480_s13 + $0x100] sm:$0xff] %v4658_v25  ;;  %4992 = vmatpush1.bf16.msra.mxu1 %v4396_v46  ;;  %4940 = vmatprep.subr.bf16.mxu0 %v4411_v26  ;;  %5071 = vst [vmem:[%s7480_s13 + $0x108] sm:$0xff] %v4660_v12  ;;  %v4664_v19 = vpop.f32.mrb[7].mxu0 }
 0x203   : > { %v4429_v29 = vmul.bf16 %v3213_v32, %v6982_v47  ;;  %v4426_v42 = vmul.bf16 %v3192_v10, %v6976_v52  ;;  %v3306_v45 = vpack.i.b16 %v1957_v40, %v1957_v40  ;;  %4993 = vmatprep.subr.bf16.mxu1 %v4413_v15  ;;  %v3206_v54 = vrot.slane %v3201_v22, %v5805_v5 }
 0x204   : > { %v3320_v27 = vpack.i.b16 %v1965_v41, %v1965_v41  ;;  %v3299_v39 = vpack.i.b16 %v1953_v11, %v1953_v11  ;;  %v3313_v2 = vpack.i.b16 %v1961_v44, %v1961_v44  ;;  %5086 = vst [vmem:[%s7480_s13 + $0x180] sm:$0xff] %v4662_v0  ;;  %v3418_v17 = vpack.i.b16 %v2021_v56, %v2021_v56 }
 0x205   : > { %v3311_v53 = vrot.slane %v3306_v45, %v5805_v5  ;;  %v2029_v33 = vrot.slane %v7202_v30, %v5855_v35  ;;  %v2017_v58 = vrot.slane %v7202_v30, %v7944_v23  ;;  %4922 = vmatmul.mubr.bf16.gmra.mrb[20].mxu1 %v7579_v28  ;;  %5087 = vst [vmem:[%s7480_s13 + $0x188] sm:$0xff] %v4664_v19 }
 0x206   : > { %4941 = vmatpush1.bf16.msra.mxu0 %v4410_v36  ;;  %v4428_v13 = vmul.bf16 %v3206_v54, %v6980_v8  ;;  %v3325_v9 = vrot.slane %v3320_v27, %v5805_v5  ;;  %v3304_v50 = vrot.slane %v3299_v39, %v5805_v5  ;;  %v3318_v60 = vrot.slane %v3313_v2, %v5805_v5 }
 0x207   : > { %4994 = vmatpush1.bf16.msra.mxu1 %v4412_v49  ;;  %4942 = vmatprep.subr.bf16.mxu0 %v4427_v20  ;;  %v4443_v3 = vmul.bf16 %v3311_v53, %v6978_v63  ;;  %v3423_v46 = vrot.slane %v3418_v17, %v5805_v5  ;;  %v3432_v43 = vpack.i.b16 %v2029_v33, %v2029_v33 }
 0x208   : > { %4995 = vmatprep.subr.bf16.mxu1 %v4429_v29  ;;  %v4445_v51 = vmul.bf16 %v3325_v9, %v6982_v47  ;;  %v4442_v6 = vmul.bf16 %v3304_v50, %v6976_v52  ;;  %v4444_v26 = vmul.bf16 %v3318_v60, %v6980_v8  ;;  %v3411_v14 = vpack.i.b16 %v2017_v58, %v2017_v58 }
 0x209   : > { %v4459_v21 = vmul.bf16 %v3423_v46, %v6978_v63  ;;  %v3437_v48 = vrot.slane %v3432_v43, %v5805_v5  ;;  %v2025_v15 = vrot.slane %v7202_v30, %v7945_v31  ;;  %v2085_v38 = vrot.slane %v7289_v18, %v5827_v16  ;;  %4964 = vmatprep.mubr.bf16.mxu0 %v5366_v55 }
 0x20a   : > { %4943 = vmatpush1.bf16.msra.mxu0 %v4426_v42  ;;  %v3416_v36 = vrot.slane %v3411_v14, %v5805_v5  ;;  %v2093_v49 = vrot.slane %v7289_v18, %v5855_v35  ;;  %v2081_v20 = vrot.slane %v7289_v18, %v7944_v23  ;;  %v2089_v4 = vrot.slane %v7289_v18, %v7945_v31 }
 0x20b   : > { %4996 = vmatpush1.bf16.msra.mxu1 %v4428_v13  ;;  %4944 = vmatprep.subr.bf16.mxu0 %v4443_v3  ;;  %v4461_v30 = vmul.bf16 %v3437_v48, %v6982_v47  ;;  %v3425_v32 = vpack.i.b16 %v2025_v15, %v2025_v15  ;;  %v3530_v10 = vpack.i.b16 %v2085_v38, %v2085_v38 }
 0x20c   : > { %4997 = vmatprep.subr.bf16.mxu1 %v4445_v51  ;;  %v4458_v40 = vmul.bf16 %v3416_v36, %v6976_v52  ;;  %v3544_v41 = vpack.i.b16 %v2093_v49, %v2093_v49  ;;  %v3523_v25 = vpack.i.b16 %v2081_v20, %v2081_v20  ;;  %v3537_v22 = vpack.i.b16 %v2089_v4, %v2089_v4 }
 0x20d   : > { %v3430_v11 = vrot.slane %v3425_v32, %v5805_v5  ;;  %v3535_v44 = vrot.slane %v3530_v10, %v5805_v5  ;;  %v2149_v56 = vrot.slane %v7320_v1, %v5827_v16  ;;  %v2157_v18 = vrot.slane %v7320_v1, %v5855_v35  ;;  %5017 = vmatprep.mubr.bf16.mxu1 %v5366_v55 }
 0x20e   : > { %4945 = vmatpush1.bf16.msra.mxu0 %v4442_v6  ;;  %v3549_v12 = vrot.slane %v3544_v41, %v5805_v5  ;;  %v3528_v29 = vrot.slane %v3523_v25, %v5805_v5  ;;  %v3542_v42 = vrot.slane %v3537_v22, %v5805_v5  ;;  %v2145_v45 = vrot.slane %v7320_v1, %v7944_v23 }
 0x20f   : > { %4998 = vmatpush1.bf16.msra.mxu1 %v4444_v26  ;;  %4946 = vmatprep.subr.bf16.mxu0 %v4459_v21  ;;  %v4460_v0 = vmul.bf16 %v3430_v11, %v6980_v8  ;;  %v4475_v54 = vmul.bf16 %v3535_v44, %v6978_v63  ;;  %v3642_v27 = vpack.i.b16 %v2149_v56, %v2149_v56 }
 0x210   : > { %4999 = vmatprep.subr.bf16.mxu1 %v4461_v30  ;;  %v4477_v39 = vmul.bf16 %v3549_v12, %v6982_v47  ;;  %v4474_v2 = vmul.bf16 %v3528_v29, %v6976_v52  ;;  %v4476_v19 = vmul.bf16 %v3542_v42, %v6980_v8  ;;  %v3656_v53 = vpack.i.b16 %v2157_v18, %v2157_v18 }
 0x211   : > { %v3647_v17 = vrot.slane %v3642_v27, %v5805_v5  ;;  %v3635_v33 = vpack.i.b16 %v2145_v45, %v2145_v45  ;;  %v2153_v58 = vrot.slane %v7320_v1, %v7945_v31  ;;  %v2213_v13 = vrot.slane %v7293_v59, %v5827_v16 }
 0x212   : > { %4947 = vmatpush1.bf16.msra.mxu0 %v4458_v40  ;;  %v3661_v9 = vrot.slane %v3656_v53, %v5805_v5  ;;  %v2221_v50 = vrot.slane %v7293_v59, %v5855_v35  ;;  %v2209_v60 = vrot.slane %v7293_v59, %v7944_v23  ;;  %v2217_v3 = vrot.slane %v7293_v59, %v7945_v31 }
 0x213   : > { %5000 = vmatpush1.bf16.msra.mxu1 %v4460_v0  ;;  %4948 = vmatprep.subr.bf16.mxu0 %v4475_v54  ;;  %v4491_v46 = vmul.bf16 %v3647_v17, %v6978_v63  ;;  %v3640_v1 = vrot.slane %v3635_v33, %v5805_v5  ;;  %v3649_v43 = vpack.i.b16 %v2153_v58, %v2153_v58 }
 0x214   : > { %5001 = vmatprep.subr.bf16.mxu1 %v4477_v39  ;;  %v4493_v51 = vmul.bf16 %v3661_v9, %v6982_v47  ;;  %v3754_v6 = vpack.i.b16 %v2213_v13, %v2213_v13  ;;  %v3768_v26 = vpack.i.b16 %v2221_v50, %v2221_v50  ;;  %v3747_v14 = vpack.i.b16 %v2209_v60, %v2209_v60 }
 0x215   : > { %v4490_v21 = vmul.bf16 %v3640_v1, %v6976_v52  ;;  %v3654_v48 = vrot.slane %v3649_v43, %v5805_v5  ;;  %v3761_v15 = vpack.i.b16 %v2217_v3, %v2217_v3  ;;  %v2277_v59 = vrot.slane %v7357_v34, %v5827_v16 }
 0x216   : > { %4949 = vmatpush1.bf16.msra.mxu0 %v4474_v2  ;;  %v3759_v38 = vrot.slane %v3754_v6, %v5805_v5  ;;  %v3773_v55 = vrot.slane %v3768_v26, %v5805_v5  ;;  %v3752_v36 = vrot.slane %v3747_v14, %v5805_v5  ;;  %v2285_v49 = vrot.slane %v7357_v34, %v5855_v35 }
 0x217   : > { %5002 = vmatpush1.bf16.msra.mxu1 %v4476_v19  ;;  %4950 = vmatprep.subr.bf16.mxu0 %v4491_v46  ;;  %v4492_v20 = vmul.bf16 %v3654_v48, %v6980_v8  ;;  %v3766_v4 = vrot.slane %v3761_v15, %v5805_v5  ;;  %v3866_v30 = vpack.i.b16 %v2277_v59, %v2277_v59 }
 0x218   : > { %5003 = vmatprep.subr.bf16.mxu1 %v4493_v51  ;;  %v4507_v32 = vmul.bf16 %v3759_v38, %v6978_v63  ;;  %v4509_v10 = vmul.bf16 %v3773_v55, %v6982_v47  ;;  %v4506_v40 = vmul.bf16 %v3752_v36, %v6976_v52  ;;  %v3880_v41 = vpack.i.b16 %v2285_v49, %v2285_v49 }
 0x219   : > { %v4508_v25 = vmul.bf16 %v3766_v4, %v6980_v8  ;;  %v3871_v22 = vrot.slane %v3866_v30, %v5805_v5  ;;  %v2273_v11 = vrot.slane %v7357_v34, %v7944_v23  ;;  %v2281_v44 = vrot.slane %v7357_v34, %v7945_v31 }
 0x21a   : > { %4951 = vmatpush1.bf16.msra.mxu0 %v4490_v21  ;;  %v3885_v56 = vrot.slane %v3880_v41, %v5805_v5  ;;  %v2341_v18 = vrot.slane %v7302_v37, %v5827_v16  ;;  %v2349_v12 = vrot.slane %v7302_v37, %v5855_v35  ;;  %v2337_v29 = vrot.slane %v7302_v37, %v7944_v23  ;;  %v4711_v51 = vpop.f32.mrb[4].mxu1 }
 0x21b   : > { %5004 = vmatpush1.bf16.msra.mxu1 %v4492_v20  ;;  %4952 = vmatprep.subr.bf16.mxu0 %v4507_v32  ;;  %v4523_v42 = vmul.bf16 %v3871_v22, %v6978_v63  ;;  %v3859_v45 = vpack.i.b16 %v2273_v11, %v2273_v11  ;;  %v3873_v0 = vpack.i.b16 %v2281_v44, %v2281_v44  ;;  %v4713_v48 = vpop.f32.mrb[5].mxu1 }
 0x21c   : > { %5005 = vmatprep.subr.bf16.mxu1 %v4509_v10  ;;  %v4525_v34 = vmul.bf16 %v3885_v56, %v6982_v47  ;;  %v3978_v54 = vpack.i.b16 %v2341_v18, %v2341_v18  ;;  %v3992_v27 = vpack.i.b16 %v2349_v12, %v2349_v12  ;;  %v3971_v39 = vpack.i.b16 %v2337_v29, %v2337_v29  ;;  %v4715_v36 = vpop.f32.mrb[6].mxu1 }
 0x21d   : > { %v3864_v2 = vrot.slane %v3859_v45, %v5805_v5  ;;  %v3878_v19 = vrot.slane %v3873_v0, %v5805_v5  ;;  %v2345_v53 = vrot.slane %v7302_v37, %v7945_v31  ;;  %v2405_v17 = vrot.slane %v7394_v7, %v5827_v16  ;;  %5072 = vst [vmem:[%s7480_s13 + $0x110] sm:$0xff] %v4711_v51  ;;  %v4717_v4 = vpop.f32.mrb[7].mxu1 }
 0x21e   : > { %4953 = vmatpush1.bf16.msra.mxu0 %v4506_v40  ;;  %v3983_v33 = vrot.slane %v3978_v54, %v5805_v5  ;;  %v3997_v58 = vrot.slane %v3992_v27, %v5805_v5  ;;  %v3976_v13 = vrot.slane %v3971_v39, %v5805_v5  ;;  %v2413_v9 = vrot.slane %v7394_v7, %v5855_v35 }
 0x21f   : > { %5006 = vmatpush1.bf16.msra.mxu1 %v4508_v25  ;;  %4954 = vmatprep.subr.bf16.mxu0 %v4523_v42  ;;  %v4522_v50 = vmul.bf16 %v3864_v2, %v6976_v52  ;;  %v4524_v37 = vmul.bf16 %v3878_v19, %v6980_v8  ;;  %v3985_v60 = vpack.i.b16 %v2345_v53, %v2345_v53 }
 0x220   : > { %5007 = vmatprep.subr.bf16.mxu1 %v4525_v34  ;;  %v4539_v3 = vmul.bf16 %v3983_v33, %v6978_v63  ;;  %v4541_v46 = vmul.bf16 %v3997_v58, %v6982_v47  ;;  %v4538_v1 = vmul.bf16 %v3976_v13, %v6976_v52  ;;  %v4090_v43 = vpack.i.b16 %v2405_v17, %v2405_v17 }
 0x221   : > { %v3990_v6 = vrot.slane %v3985_v60, %v5805_v5  ;;  %v4104_v26 = vpack.i.b16 %v2413_v9, %v2413_v9  ;;  %v2401_v14 = vrot.slane %v7394_v7, %v7944_v23  ;;  %v2409_v21 = vrot.slane %v7394_v7, %v7945_v31  ;;  %5073 = vst [vmem:[%s7480_s13 + $0x118] sm:$0xff] %v4713_v48 }
 0x222   : > { %4955 = vmatpush1.bf16.msra.mxu0 %v4522_v50  ;;  %v4095_v15 = vrot.slane %v4090_v43, %v5805_v5  ;;  %v2469_v59 = vrot.slane %v7306_v24, %v5827_v16  ;;  %v2477_v38 = vrot.slane %v7306_v24, %v5855_v35  ;;  %v2465_v55 = vrot.slane %v7306_v24, %v7944_v23 }
 0x223   : > { %5008 = vmatpush1.bf16.msra.mxu1 %v4524_v37  ;;  %4956 = vmatprep.subr.bf16.mxu0 %v4539_v3  ;;  %v4540_v7 = vmul.bf16 %v3990_v6, %v6980_v8  ;;  %v4109_v49 = vrot.slane %v4104_v26, %v5805_v5  ;;  %v4083_v20 = vpack.i.b16 %v2401_v14, %v2401_v14 }
 0x224   : > { %5088 = vst [vmem:[%s7480_s13 + $0x190] sm:$0xff] %v4715_v36  ;;  %5009 = vmatprep.subr.bf16.mxu1 %v4541_v46  ;;  %v4555_v30 = vmul.bf16 %v4095_v15, %v6978_v63  ;;  %v4097_v32 = vpack.i.b16 %v2409_v21, %v2409_v21  ;;  %v4202_v10 = vpack.i.b16 %v2469_v59, %v2469_v59  ;;  %5089 = vst [vmem:[%s7480_s13 + $0x198] sm:$0xff] %v4717_v4 }
 0x225   : > { %v4216_v40 = vpack.i.b16 %v2477_v38, %v2477_v38  ;;  %v4557_v41 = vmul.bf16 %v4109_v49, %v6982_v47  ;;  %v4088_v25 = vrot.slane %v4083_v20, %v5805_v5  ;;  %v4195_v22 = vpack.i.b16 %v2465_v55, %v2465_v55 }
 0x226   : > { %v2473_v11 = vrot.slane %v7306_v24, %v7945_v31  ;;  %4957 = vmatpush1.bf16.msra.mxu0 %v4538_v1  ;;  %v4102_v44 = vrot.slane %v4097_v32, %v5805_v5  ;;  %v4207_v56 = vrot.slane %v4202_v10, %v5805_v5  ;;  %v2533_v12 = vrot.slane %v7429_v61, %v5827_v16 }
 0x227   : > { %v4221_v18 = vrot.slane %v4216_v40, %v5805_v5  ;;  %5010 = vmatpush1.bf16.msra.mxu1 %v4540_v7  ;;  %4958 = vmatprep.subr.bf16.mxu0 %v4555_v30  ;;  %v4554_v29 = vmul.bf16 %v4088_v25, %v6976_v52  ;;  %v4200_v42 = vrot.slane %v4195_v22, %v5805_v5 }
 0x228   : > { %v4209_v45 = vpack.i.b16 %v2473_v11, %v2473_v11  ;;  %5011 = vmatprep.subr.bf16.mxu1 %v4557_v41  ;;  %v4556_v24 = vmul.bf16 %v4102_v44, %v6980_v8  ;;  %v4571_v0 = vmul.bf16 %v4207_v56, %v6978_v63  ;;  %v4314_v54 = vpack.i.b16 %v2533_v12, %v2533_v12 }
 0x229   : > { %v4573_v34 = vmul.bf16 %v4221_v18, %v6982_v47  ;;  %v2541_v16 = vrot.slane %v7429_v61, %v5855_v35  ;;  %v2529_v39 = vrot.slane %v7429_v61, %v7944_v23  ;;  %v4570_v2 = vmul.bf16 %v4200_v42, %v6976_v52 }
 0x22a   : > { %v4214_v27 = vrot.slane %v4209_v45, %v5805_v5  ;;  %4959 = vmatpush1.bf16.msra.mxu0 %v4554_v29  ;;  %v4319_v19 = vrot.slane %v4314_v54, %v5805_v5  ;;  %v2537_v53 = vrot.slane %v7429_v61, %v7945_v31 }
 0x22b   : > { %5012 = vmatpush1.bf16.msra.mxu1 %v4556_v24  ;;  %4960 = vmatprep.subr.bf16.mxu0 %v4571_v0  ;;  %v4328_v33 = vpack.i.b16 %v2541_v16, %v2541_v16  ;;  %v4307_v58 = vpack.i.b16 %v2529_v39, %v2529_v39 }
 0x22c   : > { %v4572_v17 = vmul.bf16 %v4214_v27, %v6980_v8  ;;  %5013 = vmatprep.subr.bf16.mxu1 %v4573_v34  ;;  %v4587_v35 = vmul.bf16 %v4319_v19, %v6978_v63  ;;  %v4321_v13 = vpack.i.b16 %v2537_v53, %v2537_v53 }
 0x22d   : > { %v4333_v23 = vrot.slane %v4328_v33, %v5805_v5  ;;  %v4312_v9 = vrot.slane %v4307_v58, %v5805_v5 }
 0x22e   : > { %4961 = vmatpush1.bf16.msra.mxu0 %v4570_v2  ;;  %v4326_v31 = vrot.slane %v4321_v13, %v5805_v5 }
 0x22f   : > { %5014 = vmatpush1.bf16.msra.mxu1 %v4572_v17  ;;  %4962 = vmatprep.subr.bf16.mxu0 %v4587_v35  ;;  %v4589_v61 = vmul.bf16 %v4333_v23, %v6982_v47  ;;  %v4586_v50 = vmul.bf16 %v4312_v9, %v6976_v52 }
 0x230   : > { %v4588_v63 = vmul.bf16 %v4326_v31, %v6980_v8  ;;  %v4754_v37 = vpop.f32.mrb[8].mxu0 }
 0x231   : > { %5015 = vmatprep.subr.bf16.mxu1 %v4589_v61  ;;  %5042 = vst [vmem:[%s7480_s13 + $0x20] sm:$0xff] %v4754_v37  ;;  %v4807_v60 = vpop.f32.mrb[8].mxu1  ;;  %v4756_v3 = vpop.f32.mrb[9].mxu0 }
 0x232   : > { %4963 = vmatpush1.bf16.msra.mxu0 %v4586_v50  ;;  %5044 = vst [vmem:[%s7480_s13 + $0x30] sm:$0xff] %v4807_v60  ;;  %5043 = vst [vmem:[%s7480_s13 + $0x28] sm:$0xff] %v4756_v3  ;;  %v4809_v5 = vpop.f32.mrb[9].mxu1  ;;  %v4758_v46 = vpop.f32.mrb[10].mxu0 }
 0x233   : > { %5016 = vmatpush1.bf16.msra.mxu1 %v4588_v63  ;;  %5045 = vst [vmem:[%s7480_s13 + $0x38] sm:$0xff] %v4809_v5  ;;  %5058 = vst [vmem:[%s7480_s13 + $0xa0] sm:$0xff] %v4758_v46  ;;  %v4811_v52 = vpop.f32.mrb[10].mxu1  ;;  %v4760_v8 = vpop.f32.mrb[11].mxu0 }
 0x234   : > { %5060 = vst [vmem:[%s7480_s13 + $0xb0] sm:$0xff] %v4811_v52  ;;  %5059 = vst [vmem:[%s7480_s13 + $0xa8] sm:$0xff] %v4760_v8  ;;  %v4813_v47 = vpop.f32.mrb[11].mxu1 }
 0x235   : > { %4965 = vmatmul.mubr.bf16.vlgmr.msra.gmra.mrb[24].mxu0 %v7505_v57  ;;  %5061 = vst [vmem:[%s7480_s13 + $0xb8] sm:$0xff] %v4813_v47 }
 0x236   : > { %5018 = vmatmul.mubr.bf16.vlgmr.msra.gmra.mrb[24].mxu1 %v7505_v57  ;;  %4974 = vmatprep.mubr.bf16.mxu0 %v7540_v62 }
 0x237   : > { %5027 = vmatprep.mubr.bf16.mxu1 %v7540_v62 }
 0x238   : > { %v4764_v1 = vpop.f32.mrb[12].mxu0 }
 0x239   : > { %5074 = vst [vmem:[%s7480_s13 + $0x120] sm:$0xff] %v4764_v1  ;;  %v4817_v43 = vpop.f32.mrb[12].mxu1  ;;  %v4766_v51 = vpop.f32.mrb[13].mxu0 }
 0x23a   : > { %5076 = vst [vmem:[%s7480_s13 + $0x130] sm:$0xff] %v4817_v43  ;;  %5075 = vst [vmem:[%s7480_s13 + $0x128] sm:$0xff] %v4766_v51  ;;  %v4819_v6 = vpop.f32.mrb[13].mxu1  ;;  %v4768_v26 = vpop.f32.mrb[14].mxu0 }
 0x23b   : > { %5077 = vst [vmem:[%s7480_s13 + $0x138] sm:$0xff] %v4819_v6  ;;  %5090 = vst [vmem:[%s7480_s13 + $0x1a0] sm:$0xff] %v4768_v26  ;;  %v4821_v57 = vpop.f32.mrb[14].mxu1  ;;  %v4770_v14 = vpop.f32.mrb[15].mxu0 }
 0x23c   : > { %5092 = vst [vmem:[%s7480_s13 + $0x1b0] sm:$0xff] %v4821_v57  ;;  %5091 = vst [vmem:[%s7480_s13 + $0x1a8] sm:$0xff] %v4770_v14  ;;  %v4823_v62 = vpop.f32.mrb[15].mxu1 }
 0x23d   : > { %4975 = vmatmul.mubr.bf16.gmra.mrb[28].mxu0 %v7579_v28  ;;  %5093 = vst [vmem:[%s7480_s13 + $0x1b8] sm:$0xff] %v4823_v62 }
 0x23e   : > { %5028 = vmatmul.mubr.bf16.gmra.mrb[28].mxu1 %v7579_v28 }
 0x2c7   : > { %v4860_v21 = vpop.f32.mrb[16].mxu0 }
 0x2c8   : > { %5046 = vst [vmem:[%s7480_s13 + $0x40] sm:$0xff] %v4860_v21  ;;  %v4913_v48 = vpop.f32.mrb[16].mxu1  ;;  %v4862_v15 = vpop.f32.mrb[17].mxu0 }
 0x2c9   : > { %5048 = vst [vmem:[%s7480_s13 + $0x50] sm:$0xff] %v4913_v48  ;;  %5047 = vst [vmem:[%s7480_s13 + $0x48] sm:$0xff] %v4862_v15  ;;  %v4915_v59 = vpop.f32.mrb[17].mxu1  ;;  %v4864_v38 = vpop.f32.mrb[18].mxu0 }
 0x2ca   : > { %5049 = vst [vmem:[%s7480_s13 + $0x58] sm:$0xff] %v4915_v59  ;;  %5062 = vst [vmem:[%s7480_s13 + $0xc0] sm:$0xff] %v4864_v38  ;;  %v4917_v55 = vpop.f32.mrb[18].mxu1  ;;  %v4866_v36 = vpop.f32.mrb[19].mxu0 }
 0x2cb   : > { %5064 = vst [vmem:[%s7480_s13 + $0xd0] sm:$0xff] %v4917_v55  ;;  %5063 = vst [vmem:[%s7480_s13 + $0xc8] sm:$0xff] %v4866_v36  ;;  %v4919_v28 = vpop.f32.mrb[19].mxu1 }
 0x2cc   : > { %5065 = vst [vmem:[%s7480_s13 + $0xd8] sm:$0xff] %v4919_v28 }
 0x2d3   : > { %v4870_v7 = vpop.f32.mrb[20].mxu0 }
 0x2d4   : > { %5078 = vst [vmem:[%s7480_s13 + $0x140] sm:$0xff] %v4870_v7  ;;  %v4872_v49 = vpop.f32.mrb[21].mxu0 }
 0x2d5   : > { %5079 = vst [vmem:[%s7480_s13 + $0x148] sm:$0xff] %v4872_v49  ;;  %v4874_v20 = vpop.f32.mrb[22].mxu0 }
 0x2d6   : > { %5094 = vst [vmem:[%s7480_s13 + $0x1c0] sm:$0xff] %v4874_v20  ;;  %v4876_v4 = vpop.f32.mrb[23].mxu0 }
 0x2d7   : > { %5095 = vst [vmem:[%s7480_s13 + $0x1c8] sm:$0xff] %v4876_v4 }
 0x2d8   : > { %v4923_v30 = vpop.f32.mrb[20].mxu1 }
 0x2d9   : > { %5080 = vst [vmem:[%s7480_s13 + $0x150] sm:$0xff] %v4923_v30  ;;  %v4925_v32 = vpop.f32.mrb[21].mxu1 }
 0x2da   : > { %5081 = vst [vmem:[%s7480_s13 + $0x158] sm:$0xff] %v4925_v32  ;;  %v4927_v10 = vpop.f32.mrb[22].mxu1 }
 0x2db   : > { %5096 = vst [vmem:[%s7480_s13 + $0x1d0] sm:$0xff] %v4927_v10  ;;  %v4929_v40 = vpop.f32.mrb[23].mxu1 }
 0x2dc   : > { %5097 = vst [vmem:[%s7480_s13 + $0x1d8] sm:$0xff] %v4929_v40 }
 0x308   : > { %v4966_v41 = vpop.f32.mrb[24].mxu0 }
 0x309   : > { %5050 = vst [vmem:[%s7480_s13 + $0x60] sm:$0xff] %v4966_v41  ;;  %v5019_v25 = vpop.f32.mrb[24].mxu1  ;;  %v4968_v22 = vpop.f32.mrb[25].mxu0 }
 0x30a   : > { %5052 = vst [vmem:[%s7480_s13 + $0x70] sm:$0xff] %v5019_v25  ;;  %5051 = vst [vmem:[%s7480_s13 + $0x68] sm:$0xff] %v4968_v22  ;;  %v5021_v11 = vpop.f32.mrb[25].mxu1  ;;  %v4970_v44 = vpop.f32.mrb[26].mxu0 }
 0x30b   : > { %5053 = vst [vmem:[%s7480_s13 + $0x78] sm:$0xff] %v5021_v11  ;;  %5066 = vst [vmem:[%s7480_s13 + $0xe0] sm:$0xff] %v4970_v44  ;;  %v5023_v56 = vpop.f32.mrb[26].mxu1  ;;  %v4972_v18 = vpop.f32.mrb[27].mxu0 }
 0x30c   : > { %5068 = vst [vmem:[%s7480_s13 + $0xf0] sm:$0xff] %v5023_v56  ;;  %5067 = vst [vmem:[%s7480_s13 + $0xe8] sm:$0xff] %v4972_v18  ;;  %v5025_v12 = vpop.f32.mrb[27].mxu1 }
 0x30d   : > { %5069 = vst [vmem:[%s7480_s13 + $0xf8] sm:$0xff] %v5025_v12 }
 0x310   : > { %v4976_v29 = vpop.f32.mrb[28].mxu0 }
 0x311   : > { %5082 = vst [vmem:[%s7480_s13 + $0x160] sm:$0xff] %v4976_v29  ;;  %v5029_v42 = vpop.f32.mrb[28].mxu1  ;;  %v4978_v45 = vpop.f32.mrb[29].mxu0 }
 0x312   : > { %5084 = vst [vmem:[%s7480_s13 + $0x170] sm:$0xff] %v5029_v42  ;;  %5083 = vst [vmem:[%s7480_s13 + $0x168] sm:$0xff] %v4978_v45  ;;  %v5031_v24 = vpop.f32.mrb[29].mxu1  ;;  %v4980_v0 = vpop.f32.mrb[30].mxu0 }
 0x313   : > { %5085 = vst [vmem:[%s7480_s13 + $0x178] sm:$0xff] %v5031_v24  ;;  %5098 = vst [vmem:[%s7480_s13 + $0x1e0] sm:$0xff] %v4980_v0  ;;  %v5033_v34 = vpop.f32.mrb[30].mxu1  ;;  %v4982_v54 = vpop.f32.mrb[31].mxu0 }
 0x314   : > { %5100 = vst [vmem:[%s7480_s13 + $0x1f0] sm:$0xff] %v5033_v34  ;;  %5099 = vst [vmem:[%s7480_s13 + $0x1e8] sm:$0xff] %v4982_v54  ;;  %v5035_v27 = vpop.f32.mrb[31].mxu1 }
 0x315   : > { %5101 = vst [vmem:[%s7480_s13 + $0x1f8] sm:$0xff] %v5035_v27 }
 0x316   : > { %5450 = shalt.err (!%p5447_p13)
}
 0x317   : > { %s5451_s11 = scalar_lea.hbm %s7806_s7, 8192  ;;  %s5455_s22 = scalar_lea.hbm %s7868_s3, 32768 }
 0x318   : > { %p5452_p11 = scmp.ne.s32.totalorder %s7806_s7, %s5451_s11  ;;  %p5456_p6 = scmp.lt.u32.totalorder %s7806_s7, %s7868_s3 }
 0x319   : > { %p5457_p10 = scmp.lt.u32.totalorder %s5455_s22, %s5451_s11  ;;  %p5459_p7 = scmp.lt.u32.totalorder %s5451_s11, %s7806_s7 }
 0x31a   : > { %p5453_p5 = pnand %p5452_p11, %p7946_p0 }
 0x31b   : > { %p5458_p1 = por %p5457_p10, %p5456_p6 }
 0x31c   : > { %p5454_p8 = pneg %p5453_p5 }
 0x31d   : > { %p5460_p2 = por %p5459_p7, %p5458_p1 }
 0x31f   : > { %p5461_p9 = pnand %p5460_p2, %p5454_p8 }
 0x321   : > { %5464 = shalt.err (!%p5461_p9)
}
 0x322   : > { %s5543_s13 = smov 2048   ;;  %s5544_s12 = smov 128  }
 0x323   : > { %5275 = dma.vmem_to_hbm [thread:$0]  (%p7946_p0), %s7808_s10, 8192, %s7806_s7, %s5103_s28, %s5543_s13, %s5543_s13, %s5544_s12  }
 0x324 PF: > { %p5291_p4 = scmp.ge.s32.totalorder %s5533_s27, 2  ;;  %s5131_s17 = sand.u32 1, %s5521_s25  }
 0x325   : > { %p7947_p3 = scmp.ne.s32.totalorder %s7901_s15, 0  ;;  %s5132_s4 = scalar_lea.sflag [#allocation6], %s5131_s17 }
 0x327   : > { %p5287_p12 = pnand %p5291_p4, %p7947_p3 }
 0x329   : > { %5504 = dma.done.wait (!%p5287_p12), %s5132_s4, 8192  }
 0x32a   : > { %5506 = vsyncadd (!%p5287_p12), %s5132_s4, 4294959104  ;;  %p23_p0 = scmp.ge.s32.totalorder %s5615_s30, 6   ;;  %s7948_s22 = smov %s5513_s23 }
 0x32b   : > { %s7949_s23 = smov %s5517_s24  ;;  %s7950_s24 = smov %s5675_s19 }
 0x32c   : > { %s7951_s25 = smov %s5525_s26  ;;  %s7952_s26 = smov %s5529_s0 }
 0x32d   : > { %s7953_s0 = smov %s5627_s6  ;;  %s7954_s27 = smov %s5615_s30 }
 0x32e   :  { %25 = sbr.rel (!%p23_p0) target bundleno = 21 (0x15), region = 86 }
 0x335   :  { %5137 = vsyncpa [#allocation5], 1 }
 0x336   :  { %5139 = vsyncpa [#allocation5 + $0x1], 1 }
 0x337   :  { %5140 = vsyncpa [#allocation8], 1 }
 0x338   :  { %5142 = vsyncpa [#allocation8 + $0x1], 1 }
 0x339   :  { %5143 = vsyncpa [#allocation6], 1 }
 0x33a   :  { %5145 = vsyncpa [#allocation6 + $0x1], 1 }

</bundles_post_ra>
